<compile_context>
chip_gen: v5e
topology: v5e:2x2
jax: 0.10.0
libtpu: 0.0.40
codegen_flags: <defaults>
</compile_context>

<pallas_src>
import jax
import jax.numpy as jnp
from jax.experimental import pallas as pl
from jax.experimental.pallas import tpu as pltpu

LANE = 128


def _round_up(v, m):
    return (v + m - 1) // m * m


# ----------------------------------------------------------------------------
# Fused kernel: (conv3x3 + BN + ReLU) * size, then 2x2/2 max pool.
# ----------------------------------------------------------------------------
def _vgg_block_kernel(x_ref, w_ref, s_ref, b_ref, o_ref, act_ref, col_ref):
    # x_ref  : (nb, H, W, Cin)       raw (unpadded) NHWC input images
    # w_ref  : (size, 9*Cp, Cp)      im2col conv weights (channel-padded to Cp)
    # s_ref  : (size, 1, Cp)         fused BN scale  (zero in padded channels)
    # b_ref  : (size, 1, Cp)         fused BN bias + conv bias (zero-padded)
    # o_ref  : (nb, H//2, W//2, Cp)  pooled output, lane-dense
    # act_ref: (nb, H+2, W+2, Cp)    VMEM activation scratch with zero halo ring
    # col_ref: (H*W, 9*Cp)           VMEM im2col patch matrix
    nb, H, W, cin = x_ref.shape
    size = w_ref.shape[0]
    Cp = o_ref.shape[3]
    Hh, Wh = H // 2, W // 2

    # Zero the activation scratch every grid step: provides the padding=1 halo
    # ring and zero-extends channels >= cin (also clears stale data since the
    # scratch persists across grid steps).
    act_ref[...] = jnp.zeros_like(act_ref)

    for ib in range(nb):                                    # static, unrolled
        # Place the image in the scratch interior (channels >= cin stay zero).
        act_ref[ib, 1:H + 1, 1:W + 1, :cin] = x_ref[ib].astype(jnp.float32)

        for l in range(size):                               # static, unrolled
            # im2col: pack the 9 shifted taps into lane-aligned column blocks,
            # then a single (H*W, 9*Cp) @ (9*Cp, Cp) MXU matmul.
            for t in range(9):
                dh, dw = t // 3, t % 3
                col_ref[:, t * Cp:(t + 1) * Cp] = (
                    act_ref[ib, dh:dh + H, dw:dw + W, :].reshape(H * W, Cp))
            acc = jnp.dot(col_ref[...], w_ref[l],
                          preferred_element_type=jnp.float32)    # (H*W, Cp)

            # Fused epilogue: conv bias + eval-mode BatchNorm folded into one
            # per-channel scale/bias, then ReLU (kept in f32).
            y = jnp.maximum(acc * s_ref[l] + b_ref[l], 0.0)

            if l + 1 < size:
                # Next layer's input: write back into the scratch interior
                # (halo ring stays zero) — never leaves VMEM.
                act_ref[ib, 1:H + 1, 1:W + 1, :] = y.reshape(H, W, Cp)
            else:
                # Fused 2x2 stride-2 max pool; only the pooled quarter-size,
                # lane-dense tensor is written to HBM.
                y3 = y.reshape(Hh, 2, W, Cp)
                ya = jnp.maximum(y3[:, 0], y3[:, 1])             # H pairs
                # W pairs: fold the pair onto the lane axis (Cp % 128 == 0) so
                # the max uses lane-aligned slices, not strided sublane slices.
                yb = ya.reshape(Hh, Wh, 2 * Cp)
                pooled = jnp.maximum(yb[:, :, :Cp], yb[:, :, Cp:])
                o_ref[ib] = pooled.astype(o_ref.dtype)


# ----------------------------------------------------------------------------
# Wrapper: NCHW in / NCHW out (PyTorch convention); kernel runs in NHWC.
# params: list of (w_hwio (3,3,cin,cout), scale (cout,), bias (cout,)) per layer,
# with eval-mode BN + conv bias already folded into (scale, bias).
# ----------------------------------------------------------------------------
def vgg_block_forward(x_nchw, params, *, images_per_step=1):
    x = jnp.transpose(x_nchw, (0, 2, 3, 1))             # NCHW -> NHWC (glue)
    N, H, W, Cin = x.shape
    size = len(params)
    Cout = params[-1][0].shape[-1]
    assert H % 2 == 0 and W % 2 == 0                    # MaxPool2d(2) on even dims
    nb = images_per_step
    assert N % nb == 0
    Cp = _round_up(max(Cin, Cout), LANE)                # lane-dense channel width
    Hh, Wh = H // 2, W // 2

    # Pack weights/scale/bias for all layers, zero-padded to Cp channels and
    # pre-flattened for the in-kernel im2col matmul (row = dh*3*Cp + dw*Cp + ci).
    w_all = jnp.zeros((size, 3, 3, Cp, Cp), jnp.float32)
    s_all = jnp.zeros((size, 1, Cp), jnp.float32)
    b_all = jnp.zeros((size, 1, Cp), jnp.float32)
    for l, (w, s, b) in enumerate(params):
        ci, co = w.shape[2], w.shape[3]
        w_all = w_all.at[l, :, :, :ci, :co].set(w.astype(jnp.float32))
        s_all = s_all.at[l, 0, :co].set(s.astype(jnp.float32))
        b_all = b_all.at[l, 0, :co].set(b.astype(jnp.float32))
    w_all = w_all.reshape(size, 9 * Cp, Cp)

    out_padded = pl.pallas_call(
        _vgg_block_kernel,
        out_shape=jax.ShapeDtypeStruct((N, Hh, Wh, Cp), x.dtype),
        grid_spec=pltpu.PrefetchScalarGridSpec(
            num_scalar_prefetch=0,
            # One grid step per `nb` images; with nb=1 and N>=2 the grid keeps
            # >=2 "parallel" iterations so both v7x TensorCores are used.
            grid=(N // nb,),
            in_specs=[
                pl.BlockSpec((nb, H, W, Cin), lambda n: (n, 0, 0, 0)),
                pl.BlockSpec((size, 9 * Cp, Cp), lambda n: (0, 0, 0)),
                pl.BlockSpec((size, 1, Cp), lambda n: (0, 0, 0)),
                pl.BlockSpec((size, 1, Cp), lambda n: (0, 0, 0)),
            ],
            out_specs=pl.BlockSpec((nb, Hh, Wh, Cp), lambda n: (n, 0, 0, 0)),
            scratch_shapes=[
                pltpu.VMEM((nb, H + 2, W + 2, Cp), jnp.float32),   # activations
                pltpu.VMEM((H * W, 9 * Cp), jnp.float32),          # im2col
            ],
        ),
        compiler_params=pltpu.CompilerParams(
            dimension_semantics=("parallel",)),
    )(x, w_all, s_all, b_all)

    out = out_padded[..., :Cout]                        # strip lane padding (glue)
    return jnp.transpose(out, (0, 3, 1, 2))             # NHWC -> NCHW


# ----------------------------------------------------------------------------
# Deterministic parameter init (shapes match nn.Conv2d(3x3) + nn.BatchNorm2d).
# Eval-mode BN + conv bias folded into per-channel (scale, bias).
# ----------------------------------------------------------------------------
def init_params(key, size, in_channels, out_channels, eps=1e-5):
    params = []
    cin = in_channels
    for _ in range(size):
        key, kw, kb, kg, kbe = jax.random.split(key, 5)
        fan_in = cin * 3 * 3
        bound = 1.0 / (fan_in ** 0.5)
        w = jax.random.uniform(kw, (3, 3, cin, out_channels), jnp.float32,
                               -bound, bound)                         # HWIO
        b_conv = jax.random.uniform(kb, (out_channels,), jnp.float32,
                                    -bound, bound)
        gamma = 1.0 + 0.1 * jax.random.normal(kg, (out_channels,), jnp.float32)
        beta = 0.1 * jax.random.normal(kbe, (out_channels,), jnp.float32)
        running_mean = jnp.zeros((out_channels,), jnp.float32)
        running_var = jnp.ones((out_channels,), jnp.float32)

        scale = gamma / jnp.sqrt(running_var + eps)
        bias = beta + (b_conv - running_mean) * scale
        params.append((w, scale, bias))
        cin = out_channels
    return params


# Pure-JAX reference (same math) for a correctness check.
def ref_forward(x_nchw, params):
    y = jnp.transpose(x_nchw, (0, 2, 3, 1))
    for (w, scale, bias) in params:
        conv = jax.lax.conv_general_dilated(
            y, w, window_strides=(1, 1), padding=((1, 1), (1, 1)),
            dimension_numbers=("NHWC", "HWIO", "NHWC"))
        y = jnp.maximum(conv * scale + bias, 0.0)
    N, H, W, C = y.shape
    y = y.reshape(N, H // 2, 2, W // 2, 2, C).max(axis=(2, 4))
    return jnp.transpose(y, (0, 3, 1, 2))


if __name__ == "__main__":
    key = jax.random.PRNGKey(0)
    kx, kp = jax.random.split(key)

    N, Cin, H, W = 2, 4, 16, 16
    Cout, size = 8, 2

    x = jax.random.normal(kx, (N, Cin, H, W), jnp.float32)   # NCHW like PyTorch
    params = init_params(kp, size, Cin, Cout)

    out = jax.block_until_ready(vgg_block_forward(x, params))
    ref = jax.block_until_ready(ref_forward(x, params))

    assert out.shape == (N, Cout, H // 2, W // 2), out.shape
    max_err = float(jnp.max(jnp.abs(out - ref)))
    assert jnp.allclose(out, ref, atol=1e-3, rtol=1e-3), max_err

    print("KERNEL_OK")
</pallas_src>

<mosaic_0001>
module attributes {stable_mosaic.version = 11 : i64} {
  func.func @_vgg_block_kernel(%arg0: i32, %arg1: memref<1x16x16x4xf32, #tpu.memory_space<vmem>>, %arg2: memref<2x1152x128xf32, #tpu.memory_space<vmem>>, %arg3: memref<2x1x128xf32, #tpu.memory_space<vmem>>, %arg4: memref<2x1x128xf32, #tpu.memory_space<vmem>>, %arg5: memref<1x8x8x128xf32, #tpu.memory_space<vmem>>, %arg6: memref<1x18x18x128xf32, #tpu.memory_space<vmem>>, %arg7: memref<256x1152xf32, #tpu.memory_space<vmem>>) attributes {dimension_semantics = [#tpu.dimension_semantics<parallel>], iteration_bounds = array<i64: 2>, scalar_prefetch = 0 : i64, scratch_operands = 2 : i64, tpu.core_type = #tpu.core_type<tc>, window_params = [{transform_indices = @transform_0, window_bounds = array<i64: 1, 16, 16, 4>}, {pipeline_mode = #tpu.pipeline_mode<synchronous>, transform_indices = @transform_1, window_bounds = array<i64: 2, 1152, 128>}, {pipeline_mode = #tpu.pipeline_mode<synchronous>, transform_indices = @transform_2, window_bounds = array<i64: 2, 1, 128>}, {pipeline_mode = #tpu.pipeline_mode<synchronous>, transform_indices = @transform_3, window_bounds = array<i64: 2, 1, 128>}, {transform_indices = @transform_4, window_bounds = array<i64: 1, 8, 8, 128>}]} {
    %cst = arith.constant 0.000000e+00 : f32
    %0 = vector.broadcast %cst : f32 to vector<1x18x18x128xf32>
    %c0 = arith.constant 0 : index
    %c0_0 = arith.constant 0 : index
    %c0_1 = arith.constant 0 : index
    %c0_2 = arith.constant 0 : index
    %1 = vector.load %arg6[%c0, %c0_0, %c0_1, %c0_2] : memref<1x18x18x128xf32, #tpu.memory_space<vmem>>, vector<1x18x18x128xf32>
    tpu.vector_store %arg6[%c0, %c0_0, %c0_1, %c0_2], %0 {strides = array<i32>} : memref<1x18x18x128xf32, #tpu.memory_space<vmem>>, vector<1x18x18x128xf32>,
    %c0_3 = arith.constant 0 : index
    %c0_4 = arith.constant 0 : index
    %c0_5 = arith.constant 0 : index
    %c0_6 = arith.constant 0 : index
    %2 = vector.load %arg1[%c0_3, %c0_4, %c0_5, %c0_6] : memref<1x16x16x4xf32, #tpu.memory_space<vmem>>, vector<1x16x16x4xf32>
    %3 = vector.shape_cast %2 : vector<1x16x16x4xf32> to vector<16x16x4xf32>
    %c0_7 = arith.constant 0 : index
    %c1 = arith.constant 1 : index
    %c1_8 = arith.constant 1 : index
    %c0_9 = arith.constant 0 : index
    %4 = vector.load %arg6[%c0_7, %c1, %c1_8, %c0_9] : memref<1x18x18x128xf32, #tpu.memory_space<vmem>>, vector<1x16x16x4xf32>
    %5 = vector.shape_cast %4 : vector<1x16x16x4xf32> to vector<16x16x4xf32>
    %6 = vector.shape_cast %3 : vector<16x16x4xf32> to vector<1x16x16x4xf32>
    tpu.vector_store %arg6[%c0_7, %c1, %c1_8, %c0_9], %6 {strides = array<i32>} : memref<1x18x18x128xf32, #tpu.memory_space<vmem>>, vector<1x16x16x4xf32>,
    %c0_10 = arith.constant 0 : index
    %c0_11 = arith.constant 0 : index
    %c0_12 = arith.constant 0 : index
    %c0_13 = arith.constant 0 : index
    %7 = vector.load %arg6[%c0_10, %c0_11, %c0_12, %c0_13] : memref<1x18x18x128xf32, #tpu.memory_space<vmem>>, vector<1x16x16x128xf32>
    %8 = vector.shape_cast %7 : vector<1x16x16x128xf32> to vector<16x16x128xf32>
    %9 = vector.shape_cast %8 : vector<16x16x128xf32> to vector<256x128xf32>
    %c0_14 = arith.constant 0 : index
    %c0_15 = arith.constant 0 : index
    %10 = vector.load %arg7[%c0_14, %c0_15] : memref<256x1152xf32, #tpu.memory_space<vmem>>, vector<256x128xf32>
    tpu.vector_store %arg7[%c0_14, %c0_15], %9 {strides = array<i32>} : memref<256x1152xf32, #tpu.memory_space<vmem>>, vector<256x128xf32>,
    %c0_16 = arith.constant 0 : index
    %c0_17 = arith.constant 0 : index
    %c1_18 = arith.constant 1 : index
    %c0_19 = arith.constant 0 : index
    %11 = vector.load %arg6[%c0_16, %c0_17, %c1_18, %c0_19] : memref<1x18x18x128xf32, #tpu.memory_space<vmem>>, vector<1x16x16x128xf32>
    %12 = vector.shape_cast %11 : vector<1x16x16x128xf32> to vector<16x16x128xf32>
    %13 = vector.shape_cast %12 : vector<16x16x128xf32> to vector<256x128xf32>
    %c0_20 = arith.constant 0 : index
    %c128 = arith.constant 128 : index
    %14 = vector.load %arg7[%c0_20, %c128] : memref<256x1152xf32, #tpu.memory_space<vmem>>, vector<256x128xf32>
    tpu.vector_store %arg7[%c0_20, %c128], %13 {strides = array<i32>} : memref<256x1152xf32, #tpu.memory_space<vmem>>, vector<256x128xf32>,
    %c0_21 = arith.constant 0 : index
    %c0_22 = arith.constant 0 : index
    %c2 = arith.constant 2 : index
    %c0_23 = arith.constant 0 : index
    %15 = vector.load %arg6[%c0_21, %c0_22, %c2, %c0_23] : memref<1x18x18x128xf32, #tpu.memory_space<vmem>>, vector<1x16x16x128xf32>
    %16 = vector.shape_cast %15 : vector<1x16x16x128xf32> to vector<16x16x128xf32>
    %17 = vector.shape_cast %16 : vector<16x16x128xf32> to vector<256x128xf32>
    %c0_24 = arith.constant 0 : index
    %c256 = arith.constant 256 : index
    %18 = vector.load %arg7[%c0_24, %c256] : memref<256x1152xf32, #tpu.memory_space<vmem>>, vector<256x128xf32>
    tpu.vector_store %arg7[%c0_24, %c256], %17 {strides = array<i32>} : memref<256x1152xf32, #tpu.memory_space<vmem>>, vector<256x128xf32>,
    %c0_25 = arith.constant 0 : index
    %c1_26 = arith.constant 1 : index
    %c0_27 = arith.constant 0 : index
    %c0_28 = arith.constant 0 : index
    %19 = vector.load %arg6[%c0_25, %c1_26, %c0_27, %c0_28] : memref<1x18x18x128xf32, #tpu.memory_space<vmem>>, vector<1x16x16x128xf32>
    %20 = vector.shape_cast %19 : vector<1x16x16x128xf32> to vector<16x16x128xf32>
    %21 = vector.shape_cast %20 : vector<16x16x128xf32> to vector<256x128xf32>
    %c0_29 = arith.constant 0 : index
    %c384 = arith.constant 384 : index
    %22 = vector.load %arg7[%c0_29, %c384] : memref<256x1152xf32, #tpu.memory_space<vmem>>, vector<256x128xf32>
    tpu.vector_store %arg7[%c0_29, %c384], %21 {strides = array<i32>} : memref<256x1152xf32, #tpu.memory_space<vmem>>, vector<256x128xf32>,
    %c0_30 = arith.constant 0 : index
    %c1_31 = arith.constant 1 : index
    %c1_32 = arith.constant 1 : index
    %c0_33 = arith.constant 0 : index
    %23 = vector.load %arg6[%c0_30, %c1_31, %c1_32, %c0_33] : memref<1x18x18x128xf32, #tpu.memory_space<vmem>>, vector<1x16x16x128xf32>
    %24 = vector.shape_cast %23 : vector<1x16x16x128xf32> to vector<16x16x128xf32>
    %25 = vector.shape_cast %24 : vector<16x16x128xf32> to vector<256x128xf32>
    %c0_34 = arith.constant 0 : index
    %c512 = arith.constant 512 : index
    %26 = vector.load %arg7[%c0_34, %c512] : memref<256x1152xf32, #tpu.memory_space<vmem>>, vector<256x128xf32>
    tpu.vector_store %arg7[%c0_34, %c512], %25 {strides = array<i32>} : memref<256x1152xf32, #tpu.memory_space<vmem>>, vector<256x128xf32>,
    %c0_35 = arith.constant 0 : index
    %c1_36 = arith.constant 1 : index
    %c2_37 = arith.constant 2 : index
    %c0_38 = arith.constant 0 : index
    %27 = vector.load %arg6[%c0_35, %c1_36, %c2_37, %c0_38] : memref<1x18x18x128xf32, #tpu.memory_space<vmem>>, vector<1x16x16x128xf32>
    %28 = vector.shape_cast %27 : vector<1x16x16x128xf32> to vector<16x16x128xf32>
    %29 = vector.shape_cast %28 : vector<16x16x128xf32> to vector<256x128xf32>
    %c0_39 = arith.constant 0 : index
    %c640 = arith.constant 640 : index
    %30 = vector.load %arg7[%c0_39, %c640] : memref<256x1152xf32, #tpu.memory_space<vmem>>, vector<256x128xf32>
    tpu.vector_store %arg7[%c0_39, %c640], %29 {strides = array<i32>} : memref<256x1152xf32, #tpu.memory_space<vmem>>, vector<256x128xf32>,
    %c0_40 = arith.constant 0 : index
    %c2_41 = arith.constant 2 : index
    %c0_42 = arith.constant 0 : index
    %c0_43 = arith.constant 0 : index
    %31 = vector.load %arg6[%c0_40, %c2_41, %c0_42, %c0_43] : memref<1x18x18x128xf32, #tpu.memory_space<vmem>>, vector<1x16x16x128xf32>
    %32 = vector.shape_cast %31 : vector<1x16x16x128xf32> to vector<16x16x128xf32>
    %33 = vector.shape_cast %32 : vector<16x16x128xf32> to vector<256x128xf32>
    %c0_44 = arith.constant 0 : index
    %c768 = arith.constant 768 : index
    %34 = vector.load %arg7[%c0_44, %c768] : memref<256x1152xf32, #tpu.memory_space<vmem>>, vector<256x128xf32>
    tpu.vector_store %arg7[%c0_44, %c768], %33 {strides = array<i32>} : memref<256x1152xf32, #tpu.memory_space<vmem>>, vector<256x128xf32>,
    %c0_45 = arith.constant 0 : index
    %c2_46 = arith.constant 2 : index
    %c1_47 = arith.constant 1 : index
    %c0_48 = arith.constant 0 : index
    %35 = vector.load %arg6[%c0_45, %c2_46, %c1_47, %c0_48] : memref<1x18x18x128xf32, #tpu.memory_space<vmem>>, vector<1x16x16x128xf32>
    %36 = vector.shape_cast %35 : vector<1x16x16x128xf32> to vector<16x16x128xf32>
    %37 = vector.shape_cast %36 : vector<16x16x128xf32> to vector<256x128xf32>
    %c0_49 = arith.constant 0 : index
    %c896 = arith.constant 896 : index
    %38 = vector.load %arg7[%c0_49, %c896] : memref<256x1152xf32, #tpu.memory_space<vmem>>, vector<256x128xf32>
    tpu.vector_store %arg7[%c0_49, %c896], %37 {strides = array<i32>} : memref<256x1152xf32, #tpu.memory_space<vmem>>, vector<256x128xf32>,
    %c0_50 = arith.constant 0 : index
    %c2_51 = arith.constant 2 : index
    %c2_52 = arith.constant 2 : index
    %c0_53 = arith.constant 0 : index
    %39 = vector.load %arg6[%c0_50, %c2_51, %c2_52, %c0_53] : memref<1x18x18x128xf32, #tpu.memory_space<vmem>>, vector<1x16x16x128xf32>
    %40 = vector.shape_cast %39 : vector<1x16x16x128xf32> to vector<16x16x128xf32>
    %41 = vector.shape_cast %40 : vector<16x16x128xf32> to vector<256x128xf32>
    %c0_54 = arith.constant 0 : index
    %c1024 = arith.constant 1024 : index
    %42 = vector.load %arg7[%c0_54, %c1024] : memref<256x1152xf32, #tpu.memory_space<vmem>>, vector<256x128xf32>
    tpu.vector_store %arg7[%c0_54, %c1024], %41 {strides = array<i32>} : memref<256x1152xf32, #tpu.memory_space<vmem>>, vector<256x128xf32>,
    %c0_55 = arith.constant 0 : index
    %c0_56 = arith.constant 0 : index
    %43 = vector.load %arg7[%c0_55, %c0_56] : memref<256x1152xf32, #tpu.memory_space<vmem>>, vector<256x1152xf32>
    %c0_57 = arith.constant 0 : index
    %c0_58 = arith.constant 0 : index
    %c0_59 = arith.constant 0 : index
    %44 = vector.load %arg2[%c0_57, %c0_58, %c0_59] : memref<2x1152x128xf32, #tpu.memory_space<vmem>>, vector<1x1152x128xf32>
    %45 = vector.shape_cast %44 : vector<1x1152x128xf32> to vector<1152x128xf32>
    %cst_60 = arith.constant dense<0.000000e+00> : vector<256x128xf32>
    %46 = tpu.matmul %43, %45, %cst_60 {dimension_numbers = #tpu.dot_dimension_numbers<[1], [0], [0], [1], [0, 0, 1, 1], [], []>} : vector<256x1152xf32>, vector<1152x128xf32>, vector<256x128xf32> -> vector<256x128xf32>
    %c0_61 = arith.constant 0 : index
    %c0_62 = arith.constant 0 : index
    %c0_63 = arith.constant 0 : index
    %47 = vector.load %arg3[%c0_61, %c0_62, %c0_63] : memref<2x1x128xf32, #tpu.memory_space<vmem>>, vector<1x1x128xf32>
    %48 = vector.shape_cast %47 : vector<1x1x128xf32> to vector<1x128xf32>
    %49 = vector.broadcast %48 : vector<1x128xf32> to vector<256x128xf32>
    %50 = arith.mulf %46, %49 : vector<256x128xf32>
    %c0_64 = arith.constant 0 : index
    %c0_65 = arith.constant 0 : index
    %c0_66 = arith.constant 0 : index
    %51 = vector.load %arg4[%c0_64, %c0_65, %c0_66] : memref<2x1x128xf32, #tpu.memory_space<vmem>>, vector<1x1x128xf32>
    %52 = vector.shape_cast %51 : vector<1x1x128xf32> to vector<1x128xf32>
    %53 = vector.broadcast %52 : vector<1x128xf32> to vector<256x128xf32>
    %54 = arith.addf %50, %53 : vector<256x128xf32>
    %cst_67 = arith.constant 0.000000e+00 : f32
    %55 = vector.broadcast %cst_67 : f32 to vector<256x128xf32>
    %56 = arith.maximumf %54, %55 : vector<256x128xf32>
    %57 = vector.shape_cast %56 : vector<256x128xf32> to vector<16x16x128xf32>
    %c0_68 = arith.constant 0 : index
    %c1_69 = arith.constant 1 : index
    %c1_70 = arith.constant 1 : index
    %c0_71 = arith.constant 0 : index
    %58 = vector.load %arg6[%c0_68, %c1_69, %c1_70, %c0_71] : memref<1x18x18x128xf32, #tpu.memory_space<vmem>>, vector<1x16x16x128xf32>
    %59 = vector.shape_cast %58 : vector<1x16x16x128xf32> to vector<16x16x128xf32>
    %60 = vector.shape_cast %57 : vector<16x16x128xf32> to vector<1x16x16x128xf32>
    tpu.vector_store %arg6[%c0_68, %c1_69, %c1_70, %c0_71], %60 {strides = array<i32>} : memref<1x18x18x128xf32, #tpu.memory_space<vmem>>, vector<1x16x16x128xf32>,
    %c0_72 = arith.constant 0 : index
    %c0_73 = arith.constant 0 : index
    %c0_74 = arith.constant 0 : index
    %c0_75 = arith.constant 0 : index
    %61 = vector.load %arg6[%c0_72, %c0_73, %c0_74, %c0_75] : memref<1x18x18x128xf32, #tpu.memory_space<vmem>>, vector<1x16x16x128xf32>
    %62 = vector.shape_cast %61 : vector<1x16x16x128xf32> to vector<16x16x128xf32>
    %63 = vector.shape_cast %62 : vector<16x16x128xf32> to vector<256x128xf32>
    %c0_76 = arith.constant 0 : index
    %c0_77 = arith.constant 0 : index
    %64 = vector.load %arg7[%c0_76, %c0_77] : memref<256x1152xf32, #tpu.memory_space<vmem>>, vector<256x128xf32>
    tpu.vector_store %arg7[%c0_76, %c0_77], %63 {strides = array<i32>} : memref<256x1152xf32, #tpu.memory_space<vmem>>, vector<256x128xf32>,
    %c0_78 = arith.constant 0 : index
    %c0_79 = arith.constant 0 : index
    %c1_80 = arith.constant 1 : index
    %c0_81 = arith.constant 0 : index
    %65 = vector.load %arg6[%c0_78, %c0_79, %c1_80, %c0_81] : memref<1x18x18x128xf32, #tpu.memory_space<vmem>>, vector<1x16x16x128xf32>
    %66 = vector.shape_cast %65 : vector<1x16x16x128xf32> to vector<16x16x128xf32>
    %67 = vector.shape_cast %66 : vector<16x16x128xf32> to vector<256x128xf32>
    %c0_82 = arith.constant 0 : index
    %c128_83 = arith.constant 128 : index
    %68 = vector.load %arg7[%c0_82, %c128_83] : memref<256x1152xf32, #tpu.memory_space<vmem>>, vector<256x128xf32>
    tpu.vector_store %arg7[%c0_82, %c128_83], %67 {strides = array<i32>} : memref<256x1152xf32, #tpu.memory_space<vmem>>, vector<256x128xf32>,
    %c0_84 = arith.constant 0 : index
    %c0_85 = arith.constant 0 : index
    %c2_86 = arith.constant 2 : index
    %c0_87 = arith.constant 0 : index
    %69 = vector.load %arg6[%c0_84, %c0_85, %c2_86, %c0_87] : memref<1x18x18x128xf32, #tpu.memory_space<vmem>>, vector<1x16x16x128xf32>
    %70 = vector.shape_cast %69 : vector<1x16x16x128xf32> to vector<16x16x128xf32>
    %71 = vector.shape_cast %70 : vector<16x16x128xf32> to vector<256x128xf32>
    %c0_88 = arith.constant 0 : index
    %c256_89 = arith.constant 256 : index
    %72 = vector.load %arg7[%c0_88, %c256_89] : memref<256x1152xf32, #tpu.memory_space<vmem>>, vector<256x128xf32>
    tpu.vector_store %arg7[%c0_88, %c256_89], %71 {strides = array<i32>} : memref<256x1152xf32, #tpu.memory_space<vmem>>, vector<256x128xf32>,
    %c0_90 = arith.constant 0 : index
    %c1_91 = arith.constant 1 : index
    %c0_92 = arith.constant 0 : index
    %c0_93 = arith.constant 0 : index
    %73 = vector.load %arg6[%c0_90, %c1_91, %c0_92, %c0_93] : memref<1x18x18x128xf32, #tpu.memory_space<vmem>>, vector<1x16x16x128xf32>
    %74 = vector.shape_cast %73 : vector<1x16x16x128xf32> to vector<16x16x128xf32>
    %75 = vector.shape_cast %74 : vector<16x16x128xf32> to vector<256x128xf32>
    %c0_94 = arith.constant 0 : index
    %c384_95 = arith.constant 384 : index
    %76 = vector.load %arg7[%c0_94, %c384_95] : memref<256x1152xf32, #tpu.memory_space<vmem>>, vector<256x128xf32>
    tpu.vector_store %arg7[%c0_94, %c384_95], %75 {strides = array<i32>} : memref<256x1152xf32, #tpu.memory_space<vmem>>, vector<256x128xf32>,
    %c0_96 = arith.constant 0 : index
    %c1_97 = arith.constant 1 : index
    %c1_98 = arith.constant 1 : index
    %c0_99 = arith.constant 0 : index
    %77 = vector.load %arg6[%c0_96, %c1_97, %c1_98, %c0_99] : memref<1x18x18x128xf32, #tpu.memory_space<vmem>>, vector<1x16x16x128xf32>
    %78 = vector.shape_cast %77 : vector<1x16x16x128xf32> to vector<16x16x128xf32>
    %79 = vector.shape_cast %78 : vector<16x16x128xf32> to vector<256x128xf32>
    %c0_100 = arith.constant 0 : index
    %c512_101 = arith.constant 512 : index
    %80 = vector.load %arg7[%c0_100, %c512_101] : memref<256x1152xf32, #tpu.memory_space<vmem>>, vector<256x128xf32>
    tpu.vector_store %arg7[%c0_100, %c512_101], %79 {strides = array<i32>} : memref<256x1152xf32, #tpu.memory_space<vmem>>, vector<256x128xf32>,
    %c0_102 = arith.constant 0 : index
    %c1_103 = arith.constant 1 : index
    %c2_104 = arith.constant 2 : index
    %c0_105 = arith.constant 0 : index
    %81 = vector.load %arg6[%c0_102, %c1_103, %c2_104, %c0_105] : memref<1x18x18x128xf32, #tpu.memory_space<vmem>>, vector<1x16x16x128xf32>
    %82 = vector.shape_cast %81 : vector<1x16x16x128xf32> to vector<16x16x128xf32>
    %83 = vector.shape_cast %82 : vector<16x16x128xf32> to vector<256x128xf32>
    %c0_106 = arith.constant 0 : index
    %c640_107 = arith.constant 640 : index
    %84 = vector.load %arg7[%c0_106, %c640_107] : memref<256x1152xf32, #tpu.memory_space<vmem>>, vector<256x128xf32>
    tpu.vector_store %arg7[%c0_106, %c640_107], %83 {strides = array<i32>} : memref<256x1152xf32, #tpu.memory_space<vmem>>, vector<256x128xf32>,
    %c0_108 = arith.constant 0 : index
    %c2_109 = arith.constant 2 : index
    %c0_110 = arith.constant 0 : index
    %c0_111 = arith.constant 0 : index
    %85 = vector.load %arg6[%c0_108, %c2_109, %c0_110, %c0_111] : memref<1x18x18x128xf32, #tpu.memory_space<vmem>>, vector<1x16x16x128xf32>
    %86 = vector.shape_cast %85 : vector<1x16x16x128xf32> to vector<16x16x128xf32>
    %87 = vector.shape_cast %86 : vector<16x16x128xf32> to vector<256x128xf32>
    %c0_112 = arith.constant 0 : index
    %c768_113 = arith.constant 768 : index
    %88 = vector.load %arg7[%c0_112, %c768_113] : memref<256x1152xf32, #tpu.memory_space<vmem>>, vector<256x128xf32>
    tpu.vector_store %arg7[%c0_112, %c768_113], %87 {strides = array<i32>} : memref<256x1152xf32, #tpu.memory_space<vmem>>, vector<256x128xf32>,
    %c0_114 = arith.constant 0 : index
    %c2_115 = arith.constant 2 : index
    %c1_116 = arith.constant 1 : index
    %c0_117 = arith.constant 0 : index
    %89 = vector.load %arg6[%c0_114, %c2_115, %c1_116, %c0_117] : memref<1x18x18x128xf32, #tpu.memory_space<vmem>>, vector<1x16x16x128xf32>
    %90 = vector.shape_cast %89 : vector<1x16x16x128xf32> to vector<16x16x128xf32>
    %91 = vector.shape_cast %90 : vector<16x16x128xf32> to vector<256x128xf32>
    %c0_118 = arith.constant 0 : index
    %c896_119 = arith.constant 896 : index
    %92 = vector.load %arg7[%c0_118, %c896_119] : memref<256x1152xf32, #tpu.memory_space<vmem>>, vector<256x128xf32>
    tpu.vector_store %arg7[%c0_118, %c896_119], %91 {strides = array<i32>} : memref<256x1152xf32, #tpu.memory_space<vmem>>, vector<256x128xf32>,
    %c0_120 = arith.constant 0 : index
    %c2_121 = arith.constant 2 : index
    %c2_122 = arith.constant 2 : index
    %c0_123 = arith.constant 0 : index
    %93 = vector.load %arg6[%c0_120, %c2_121, %c2_122, %c0_123] : memref<1x18x18x128xf32, #tpu.memory_space<vmem>>, vector<1x16x16x128xf32>
    %94 = vector.shape_cast %93 : vector<1x16x16x128xf32> to vector<16x16x128xf32>
    %95 = vector.shape_cast %94 : vector<16x16x128xf32> to vector<256x128xf32>
    %c0_124 = arith.constant 0 : index
    %c1024_125 = arith.constant 1024 : index
    %96 = vector.load %arg7[%c0_124, %c1024_125] : memref<256x1152xf32, #tpu.memory_space<vmem>>, vector<256x128xf32>
    tpu.vector_store %arg7[%c0_124, %c1024_125], %95 {strides = array<i32>} : memref<256x1152xf32, #tpu.memory_space<vmem>>, vector<256x128xf32>,
    %c0_126 = arith.constant 0 : index
    %c0_127 = arith.constant 0 : index
    %97 = vector.load %arg7[%c0_126, %c0_127] : memref<256x1152xf32, #tpu.memory_space<vmem>>, vector<256x1152xf32>
    %c1_128 = arith.constant 1 : index
    %c0_129 = arith.constant 0 : index
    %c0_130 = arith.constant 0 : index
    %98 = vector.load %arg2[%c1_128, %c0_129, %c0_130] : memref<2x1152x128xf32, #tpu.memory_space<vmem>>, vector<1x1152x128xf32>
    %99 = vector.shape_cast %98 : vector<1x1152x128xf32> to vector<1152x128xf32>
    %cst_131 = arith.constant dense<0.000000e+00> : vector<256x128xf32>
    %100 = tpu.matmul %97, %99, %cst_131 {dimension_numbers = #tpu.dot_dimension_numbers<[1], [0], [0], [1], [0, 0, 1, 1], [], []>} : vector<256x1152xf32>, vector<1152x128xf32>, vector<256x128xf32> -> vector<256x128xf32>
    %c1_132 = arith.constant 1 : index
    %c0_133 = arith.constant 0 : index
    %c0_134 = arith.constant 0 : index
    %101 = vector.load %arg3[%c1_132, %c0_133, %c0_134] : memref<2x1x128xf32, #tpu.memory_space<vmem>>, vector<1x1x128xf32>
    %102 = vector.shape_cast %101 : vector<1x1x128xf32> to vector<1x128xf32>
    %103 = vector.broadcast %102 : vector<1x128xf32> to vector<256x128xf32>
    %104 = arith.mulf %100, %103 : vector<256x128xf32>
    %c1_135 = arith.constant 1 : index
    %c0_136 = arith.constant 0 : index
    %c0_137 = arith.constant 0 : index
    %105 = vector.load %arg4[%c1_135, %c0_136, %c0_137] : memref<2x1x128xf32, #tpu.memory_space<vmem>>, vector<1x1x128xf32>
    %106 = vector.shape_cast %105 : vector<1x1x128xf32> to vector<1x128xf32>
    %107 = vector.broadcast %106 : vector<1x128xf32> to vector<256x128xf32>
    %108 = arith.addf %104, %107 : vector<256x128xf32>
    %cst_138 = arith.constant 0.000000e+00 : f32
    %109 = vector.broadcast %cst_138 : f32 to vector<256x128xf32>
    %110 = arith.maximumf %108, %109 : vector<256x128xf32>
    %111 = vector.shape_cast %110 : vector<256x128xf32> to vector<8x2x16x128xf32>
    %112 = vector.extract_strided_slice %111 {offsets = [0, 0, 0, 0], sizes = [8, 1, 16, 128], strides = [1, 1, 1, 1]} : vector<8x2x16x128xf32> to vector<8x1x16x128xf32>
    %113 = vector.shape_cast %112 : vector<8x1x16x128xf32> to vector<8x16x128xf32>
    %114 = vector.extract_strided_slice %111 {offsets = [0, 1, 0, 0], sizes = [8, 1, 16, 128], strides = [1, 1, 1, 1]} : vector<8x2x16x128xf32> to vector<8x1x16x128xf32>
    %115 = vector.shape_cast %114 : vector<8x1x16x128xf32> to vector<8x16x128xf32>
    %116 = arith.maximumf %113, %115 : vector<8x16x128xf32>
    %117 = vector.shape_cast %116 : vector<8x16x128xf32> to vector<8x8x256xf32>
    %118 = vector.extract_strided_slice %117 {offsets = [0, 0, 0], sizes = [8, 8, 128], strides = [1, 1, 1]} : vector<8x8x256xf32> to vector<8x8x128xf32>
    %119 = vector.extract_strided_slice %117 {offsets = [0, 0, 128], sizes = [8, 8, 128], strides = [1, 1, 1]} : vector<8x8x256xf32> to vector<8x8x128xf32>
    %120 = arith.maximumf %118, %119 : vector<8x8x128xf32>
    %c0_139 = arith.constant 0 : index
    %c0_140 = arith.constant 0 : index
    %c0_141 = arith.constant 0 : index
    %c0_142 = arith.constant 0 : index
    %121 = vector.load %arg5[%c0_139, %c0_140, %c0_141, %c0_142] : memref<1x8x8x128xf32, #tpu.memory_space<vmem>>, vector<1x8x8x128xf32>
    %122 = vector.shape_cast %121 : vector<1x8x8x128xf32> to vector<8x8x128xf32>
    %123 = vector.shape_cast %120 : vector<8x8x128xf32> to vector<1x8x8x128xf32>
    tpu.vector_store %arg5[%c0_139, %c0_140, %c0_141, %c0_142], %123 {strides = array<i32>} : memref<1x8x8x128xf32, #tpu.memory_space<vmem>>, vector<1x8x8x128xf32>,
    return
  }
  func.func @transform_0(%arg0: i32) -> (i32, i32, i32, i32) {
    %c0_i32 = arith.constant 0 : i32
    %c0_i32_0 = arith.constant 0 : i32
    %c0_i32_1 = arith.constant 0 : i32
    %c0_i32_2 = arith.constant 0 : i32
    return %arg0, %c0_i32, %c0_i32_0, %c0_i32_1 : i32, i32, i32, i32
  }
  func.func @transform_1(%arg0: i32) -> (i32, i32, i32) {
    %c0_i32 = arith.constant 0 : i32
    %c0_i32_0 = arith.constant 0 : i32
    %c0_i32_1 = arith.constant 0 : i32
    %c0_i32_2 = arith.constant 0 : i32
    return %c0_i32, %c0_i32_0, %c0_i32_1 : i32, i32, i32
  }
  func.func @transform_2(%arg0: i32) -> (i32, i32, i32) {
    %c0_i32 = arith.constant 0 : i32
    %c0_i32_0 = arith.constant 0 : i32
    %c0_i32_1 = arith.constant 0 : i32
    %c0_i32_2 = arith.constant 0 : i32
    return %c0_i32, %c0_i32_0, %c0_i32_1 : i32, i32, i32
  }
  func.func @transform_3(%arg0: i32) -> (i32, i32, i32) {
    %c0_i32 = arith.constant 0 : i32
    %c0_i32_0 = arith.constant 0 : i32
    %c0_i32_1 = arith.constant 0 : i32
    %c0_i32_2 = arith.constant 0 : i32
    return %c0_i32, %c0_i32_0, %c0_i32_1 : i32, i32, i32
  }
  func.func @transform_4(%arg0: i32) -> (i32, i32, i32, i32) {
    %c0_i32 = arith.constant 0 : i32
    %c0_i32_0 = arith.constant 0 : i32
    %c0_i32_1 = arith.constant 0 : i32
    %c0_i32_2 = arith.constant 0 : i32
    return %arg0, %c0_i32, %c0_i32_0, %c0_i32_1 : i32, i32, i32, i32
  }
}

</mosaic_0001>

<bundles_post_ra>
// kernel: tpu_custom_call.1
= control target key start
LH: loop header
LB: loop body
LE: loop exit
PB: predicated region body
PF: predicated region fallthrough
CT: control target
= control target key end

     0   :  { %9 = vsyncpa [#allocation5], 0  ;;  %s7311_s0 = inlined_call_operand.vmem [shape: f32[2,16,16,4], index: 0, kind: input, shape index: {}]   ;;  %s7312_s1 = inlined_call_operand.hbm [shape: f32[2,1152,128], index: 1, kind: input, shape index: {}]   ;;  %s7313_s2 = inlined_call_operand.hbm [shape: f32[2,1,128], index: 2, kind: input, shape index: {}]   ;;  %s7314_s3 = inlined_call_operand.hbm [shape: f32[2,1,128], index: 3, kind: input, shape index: {}]   ;;  %s7315_s4 = inlined_call_operand.hbm [shape: f32[2,8,8,128], index: 4, kind: output, shape index: {}]  }
   0x1   :  { %10 = vsyncpa [#allocation8], 0 }
   0x2   :  { %11 = vsyncpa [#allocation6], 0 }
   0x3   :  { %13 = vsyncpa [#allocation6 + $0x1], 0  ;;  %s5312_s15 = smov 0   ;;  %s5314_s16 = smov 0  }
   0x4   :  { %s5316_s17 = smov 0   ;;  %s5318_s18 = smov 0  }
   0x5 LB: > { %s5333_s19 = sadd.s32 4294967295, %s5274_s18   ;;  %s4976_s20 = sadd.s32 4294967294, %s5274_s18   ;;  %s5274_s18 = sphi %s5318_s18, %s7493_s18   ;;  %s5270_s17 = sphi %s5316_s17, %s7492_s17   ;;  %s5266_s16 = sphi %s5314_s16, %s7491_s16   ;;  %s5262_s15 = sphi %s5312_s15, %s7490_s15  }
   0x6   : > { %s5337_s21 = sadd.s32 1, %s5274_s18   ;;  %s115_s22 = sadd.s32 1, %s5270_s17 }
   0x7   : > { %s112_s23 = ssub.s32 %s5274_s18, %s5337_s21  ;;  %p125_p0 = scmp.ne.s32.totalorder %s5270_s17, %s5266_s16 }
   0x8   : > { %p113_p1 = scmp.eq.s32.totalorder %s112_s23, 0  ;;  %p126_p2 = scmp.eq.s32.totalorder %s5333_s19, 1 }
   0x9   : > { %p131_p3 = scmp.ne.s32.totalorder %s5266_s16, %s5262_s15  ;;  %p132_p4 = scmp.eq.s32.totalorder %s4976_s20, 1 }
   0xa   : > { %s5348_s24 = scalar_select %p113_p1, %s5270_s17, %s115_s22  }
   0xb   : > { %p5350_p5 = por %p126_p2, %p125_p0  ;;  %p5354_p6 = por %p132_p4, %p131_p3 }
   0xc   : > { %p4977_p7 = scmp.ge.s32.totalorder %s5274_s18, 1  ;;  %p139_p8 = scmp.lt.s32.totalorder %s5274_s18, 3 }
   0xd   : > { %p5056_p9 = scmp.eq.s32.totalorder %s5333_s19, 0  ;;  %s164_s30 = sshll.u32 %s7313_s2, 4  ;;  %s165_s30 = int_to_ptr.hbm [resolvable:$true] %s164_s30 }
   0xe   : > { %p5361_p10 = pnand %p4977_p7, %p139_p8  ;;  %s5276_s5 = smov [#allocation7]  }
   0xf   : > { %s166_s6 = sshll.u32 %s5276_s5, 4  ;;  %s150_s10 = sshll.u32 %s7312_s1, 4  ;;  %s167_s6 = int_to_ptr.vmem [resolvable:$true] %s166_s6  ;;  %s151_s10 = int_to_ptr.hbm [resolvable:$true] %s150_s10 }
  0x10   : > { %p5042_p11 = pneg %p5361_p10  ;;  %s5277_s11 = smov 16  }
  0x11   : > { %s5278_s12 = smov 1   ;;  %s5279_s13 = smov [#allocation4]  }
  0x12   : > { %p5372_p12 = pnand %p5056_p9, %p5042_p11  ;;  %s152_s14 = sshll.u32 %s5279_s13, 4  ;;  %s153_s14 = int_to_ptr.vmem [resolvable:$true] %s152_s14 }
  0x13   : > { %s5280_s20 = smov 128   ;;  %s5281_s22 = smov 8  }
  0x14   : > { %5048 = dma.hbm_to_vmem [thread:$0]  (!%p5372_p12), %s165_s30, 32, %s167_s6, [#allocation8], %s5277_s11, %s5277_s11, %s5278_s12  }
  0x15   : > { %5045 = dma.hbm_to_vmem [thread:$0]  (!%p5372_p12), %s151_s10, 36864, %s153_s14, [#allocation5], %s5280_s20, %s5280_s20, %s5281_s22  }
  0x16   : > { %s178_s29 = sshll.u32 %s7314_s3, 4  ;;  %s5282_s5 = smov [#allocation9]   ;;  %s179_s29 = int_to_ptr.hbm [resolvable:$true] %s178_s29 }
  0x17   : > { %s180_s8 = sshll.u32 %s5282_s5, 4  ;;  %204 = sbr.rel (%p5361_p10) target bundleno = 1528 (0x5f8), region = 36  ;;  %s181_s8 = int_to_ptr.vmem [resolvable:$true] %s180_s8 }
  0x18   : > { %5051 = dma.hbm_to_vmem [thread:$0]  (!%p5372_p12), %s179_s29, 32, %s181_s8, [#allocation8], %s5277_s11, %s5277_s11, %s5278_s12  }
  0x1c   : > { %5249 = dma.done.wait (%p5056_p9), [#allocation5], 36864  }
  0x1d   : > { %5251 = vsyncadd (%p5056_p9), [#allocation5], 4294930432 }
  0x1e   : > { %5253 = dma.done.wait (%p5056_p9), [#allocation8], 64  }
  0x1f   : > { %5255 = vsyncadd (%p5056_p9), [#allocation8], 4294967232  ;;  %v5283_v0 = vmov 0.0   ;;  %v1246_v1 = vld [vmem:[#allocation4 + $0x78] sm:$0xff]  ;;  %v1245_v3 = vld [vmem:[#allocation4 + $0x70] sm:$0xff]  ;;  %p241_p13 = scmp.lt.s32.totalorder %s5333_s19, 1 }
  0x20   : > { %246 = vst [vmem:[#allocation2] sm:$0xff] %v5283_v0  ;;  %v1262_v2 = vld [vmem:[#allocation4 + $0xf8] sm:$0xff]  ;;  %1375 = vmatpush.msra.mxu0 %v1246_v1  ;;  %4996 = vmatpush.msra.mxu2 %v1246_v1  ;;  %v1261_v4 = vld [vmem:[#allocation4 + $0xf0] sm:$0xff]  ;;  %v1244_v5 = vld [vmem:[#allocation4 + $0x68] sm:$0xff]  ;;  %vm333_vm0 = vcmask 31744   ;;  %s238_s10 = sand.u32 1, %s5266_s16  }
  0x21   : > { %247 = vst [vmem:[#allocation2 + $0x8] sm:$0xff] %v5283_v0  ;;  %5012 = vmatpush.msra.mxu3 %v1262_v2  ;;  %1488 = vmatpush.msra.mxu1 %v1262_v2  ;;  %v1260_v6 = vld [vmem:[#allocation4 + $0xe8] sm:$0xff]  ;;  %v1243_v7 = vld [vmem:[#allocation4 + $0x60] sm:$0xff]  ;;  %v1242_v9 = vld [vmem:[#allocation4 + $0x58] sm:$0xff]  ;;  %s242_s27 = scalar_select %p241_p13, %s5333_s19, 1 }
  0x22   : > { %248 = vst [vmem:[#allocation2 + $0x10] sm:$0x3] %v5283_v0  ;;  %1376 = vmatpush.msra.mxu0 %v1245_v3  ;;  %4997 = vmatpush.msra.mxu2 %v1245_v3  ;;  %v1259_v8 = vld [vmem:[#allocation4 + $0xe0] sm:$0xff]  ;;  %v1258_v10 = vld [vmem:[#allocation4 + $0xd8] sm:$0xff]  ;;  %v1241_v11 = vld [vmem:[#allocation4 + $0x50] sm:$0xff]  ;;  %s4986_s11 = sshll.u32 %s238_s10, 6 }
  0x23   : > { %249 = vst [vmem:[#allocation2 + $0x18] sm:$0xff] %v5283_v0  ;;  %5013 = vmatpush.msra.mxu3 %v1261_v4  ;;  %1489 = vmatpush.msra.mxu1 %v1261_v4  ;;  %v1257_v12 = vld [vmem:[#allocation4 + $0xd0] sm:$0xff]  ;;  %v1240_v13 = vld [vmem:[#allocation4 + $0x48] sm:$0xff]  ;;  %v1239_v15 = vld [vmem:[#allocation4 + $0x40] sm:$0xff]  ;;  %s4994_s30 = sshll.u32 %s242_s27, 8  ;;  %s7070_s12 = scalar_lea.vmem [#allocation10], %s4986_s11 }
  0x24   : > { %250 = vst [vmem:[#allocation2 + $0x20] sm:$0xff] %v5283_v0  ;;  %1377 = vmatpush.msra.mxu0 %v1244_v5  ;;  %4998 = vmatpush.msra.mxu2 %v1244_v5  ;;  %v1256_v14 = vld [vmem:[#allocation4 + $0xc8] sm:$0xff]  ;;  %v1255_v16 = vld [vmem:[#allocation4 + $0xc0] sm:$0xff]  ;;  %v1238_v17 = vld [vmem:[#allocation4 + $0x38] sm:$0xff]  ;;  %s5456_s9 = scalar_lea.vmem %s7311_s0, %s4994_s30  ;;  %s4995_s13 = sshll.u32 %s5333_s19, 6 }
  0x25   : > { %251 = vst [vmem:[#allocation2 + $0x28] sm:$0x3] %v5283_v0  ;;  %5014 = vmatpush.msra.mxu3 %v1260_v6  ;;  %1490 = vmatpush.msra.mxu1 %v1260_v6  ;;  %v1254_v18 = vld [vmem:[#allocation4 + $0xb8] sm:$0xff]  ;;  %v1237_v19 = vld [vmem:[#allocation4 + $0x30] sm:$0xff]  ;;  %v1236_v21 = vld [vmem:[#allocation4 + $0x28] sm:$0xff]  ;;  %s4879_s22 = scalar_lea.hbm %s7315_s4, %s4995_s13  ;;  %s4880_s23 = sshll.u32 %s7070_s12, 4  ;;  %s4881_s23 = int_to_ptr.vmem [resolvable:$true] %s4880_s23 }
  0x26   : > { %252 = vst [vmem:[#allocation2 + $0x30] sm:$0xff] %v5283_v0  ;;  %1378 = vmatpush.msra.mxu0 %v1243_v7  ;;  %4999 = vmatpush.msra.mxu2 %v1243_v7  ;;  %v1253_v20 = vld [vmem:[#allocation4 + $0xb0] sm:$0xff]  ;;  %v1252_v22 = vld [vmem:[#allocation4 + $0xa8] sm:$0xff]  ;;  %v1235_v23 = vld [vmem:[#allocation4 + $0x20] sm:$0xff]  ;;  %s4882_s28 = sshll.u32 %s4879_s22, 4  ;;  %s4868_s29 = scalar_lea.sflag [#allocation6], %s238_s10  ;;  %s4883_s28 = int_to_ptr.hbm [resolvable:$true] %s4882_s28 }
  0x27   : > { %253 = vst [vmem:[#allocation2 + $0x38] sm:$0xff] %v5283_v0  ;;  %5015 = vmatpush.msra.mxu3 %v1259_v8  ;;  %1491 = vmatpush.msra.mxu1 %v1259_v8  ;;  %v1251_v24 = vld [vmem:[#allocation4 + $0xa0] sm:$0xff]  ;;  %v1234_v25 = vld [vmem:[#allocation4 + $0x18] sm:$0xff]  ;;  %v1233_v27 = vld [vmem:[#allocation4 + $0x10] sm:$0xff]  ;;  %s5218_s5 = sshra.s32 %s4883_s28, 4  ;;  %s5224_s30 = scalar_lea.hbm %s7315_s4, 128  ;;  %s5219_s5 = int_to_ptr.hbm [resolvable:$true] %s5218_s5 }
  0x28   : > { %254 = vst [vmem:[#allocation2 + $0x40] sm:$0x3] %v5283_v0  ;;  %1379 = vmatpush.msra.mxu0 %v1242_v9  ;;  %5000 = vmatpush.msra.mxu2 %v1242_v9  ;;  %v1250_v26 = vld [vmem:[#allocation4 + $0x98] sm:$0xff]  ;;  %v1249_v28 = vld [vmem:[#allocation4 + $0x90] sm:$0xff]  ;;  %v1232_v29 = vld [vmem:[#allocation4 + $0x8] sm:$0xff]  ;;  %s5220_s8 = scalar_lea.hbm %s5219_s5, 64  ;;  %p5225_p3 = scmp.lt.s32.totalorder %s5219_s5, %s7315_s4 }
  0x29   : > { %255 = vst [vmem:[#allocation2 + $0x48] sm:$0xff] %v5283_v0  ;;  %5016 = vmatpush.msra.mxu3 %v1258_v10  ;;  %1492 = vmatpush.msra.mxu1 %v1258_v10  ;;  %v1248_v30 = vld [vmem:[#allocation4 + $0x88] sm:$0xff]  ;;  %v1231_v31 = vld [vmem:[#allocation4] sm:$0xff]  ;;  %v1278_v33 = vld [vmem:[#allocation4 + $0x178] sm:$0xff]  ;;  %p5221_p0 = scmp.ne.s32.totalorder %s5219_s5, %s5220_s8  ;;  %p5226_p4 = scmp.lt.s32.totalorder %s5224_s30, %s5220_s8 }
  0x2a   : > { %256 = vst [vmem:[#allocation2 + $0x50] sm:$0xff] %v5283_v0  ;;  %1380 = vmatpush.msra.mxu0 %v1241_v11  ;;  %5001 = vmatpush.msra.mxu2 %v1241_v11  ;;  %v1247_v32 = vld [vmem:[#allocation4 + $0x80] sm:$0xff]  ;;  %v1294_v34 = vld [vmem:[#allocation4 + $0x1f8] sm:$0xff]  ;;  %v1277_v35 = vld [vmem:[#allocation4 + $0x170] sm:$0xff] }
  0x2b   : > { %257 = vst [vmem:[#allocation2 + $0x58] sm:$0x3] %v5283_v0  ;;  %5017 = vmatpush.msra.mxu3 %v1257_v12  ;;  %1493 = vmatpush.msra.mxu1 %v1257_v12  ;;  %v430_v36 = vld [vmem:[#allocation2 + $0x1] sm:$0xff]  ;;  %v1276_v39 = vld [vmem:[#allocation4 + $0x168] sm:$0xff]  ;;  %v431_v40 = vld [vmem:[#allocation2 + $0x9] sm:$0xff]  ;;  %p5222_p1 = pnand %p5221_p0, %p5350_p5  ;;  %p5227_p7 = por %p5226_p4, %p5225_p3 }
  0x2c   : > { %258 = vst [vmem:[#allocation2 + $0x60] sm:$0xff] %v5283_v0  ;;  %1381 = vmatpush.msra.mxu0 %v1240_v13  ;;  %5002 = vmatpush.msra.mxu2 %v1240_v13  ;;  %v1293_v37 = vld [vmem:[#allocation4 + $0x1f0] sm:$0xff]  ;;  %v1310_v38 = vld [vmem:[#allocation4 + $0x278] sm:$0xff]  ;;  %v1292_v41 = vld [vmem:[#allocation4 + $0x1e8] sm:$0xff] }
  0x2d   : > { %259 = vst [vmem:[#allocation2 + $0x68] sm:$0xff] %v5283_v0  ;;  %5018 = vmatpush.msra.mxu3 %v1256_v14  ;;  %1494 = vmatpush.msra.mxu1 %v1256_v14  ;;  %v1309_v42 = vld [vmem:[#allocation4 + $0x270] sm:$0xff]  ;;  %v314_v43 = vld [vmem:[%s5456_s9 + $0x70] sm:$0xff]  ;;  %v315_v44 = vld [vmem:[%s5456_s9 + $0x78] sm:$0xff]  ;;  %p5223_p2 = pneg %p5222_p1 }
  0x2e   : > { %260 = vst [vmem:[#allocation2 + $0x70] sm:$0x3] %v5283_v0  ;;  %1382 = vmatpush.msra.mxu0 %v1239_v15  ;;  %5003 = vmatpush.msra.mxu2 %v1239_v15  ;;  %v300_v45 = vld [vmem:[%s5456_s9] sm:$0xff]  ;;  %v1275_v47 = vld [vmem:[#allocation4 + $0x160] sm:$0xff]  ;;  %v301_v50 = vld [vmem:[%s5456_s9 + $0x8] sm:$0xff] }
  0x2f   : > { %261 = vst [vmem:[#allocation2 + $0x78] sm:$0xff] %v5283_v0  ;;  %5019 = vmatpush.msra.mxu3 %v1255_v16  ;;  %1495 = vmatpush.msra.mxu1 %v1255_v16  ;;  %v316_v46 = vld [vmem:[%s5456_s9 + $0x80] sm:$0xff]  ;;  %v1291_v48 = vld [vmem:[#allocation4 + $0x1e0] sm:$0xff]  ;;  %v317_v51 = vld [vmem:[%s5456_s9 + $0x88] sm:$0xff]  ;;  %p5228_p8 = pnand %p5227_p7, %p5223_p2 }
  0x30   : > { %262 = vst [vmem:[#allocation2 + $0x80] sm:$0xff] %v5283_v0  ;;  %1383 = vmatpush.msra.mxu0 %v1238_v17  ;;  %5004 = vmatpush.msra.mxu2 %v1238_v17  ;;  %v1308_v49 = vld [vmem:[#allocation4 + $0x268] sm:$0xff]  ;;  %v302_v52 = vld [vmem:[%s5456_s9 + $0x10] sm:$0xff]  ;;  %v303_v56 = vld [vmem:[%s5456_s9 + $0x18] sm:$0xff] }
  0x31   : > { %263 = vst [vmem:[#allocation2 + $0x88] sm:$0x3] %v5283_v0  ;;  %5020 = vmatpush.msra.mxu3 %v1254_v18  ;;  %1496 = vmatpush.msra.mxu1 %v1254_v18  ;;  %v318_v53 = vld [vmem:[%s5456_s9 + $0x90] sm:$0xff]  ;;  %v1307_v61 = vld [vmem:[#allocation4 + $0x260] sm:$0xff]  ;;  %v304_v3 = vld [vmem:[%s5456_s9 + $0x20] sm:$0xff] }
  0x32   : > { %264 = vst [vmem:[#allocation2 + $0x90] sm:$0xff] %v5283_v0  ;;  %1384 = vmatpush.msra.mxu0 %v1237_v19  ;;  %5005 = vmatpush.msra.mxu2 %v1237_v19  ;;  %v1274_v57 = vld [vmem:[#allocation4 + $0x158] sm:$0xff]  ;;  %v319_v62 = vld [vmem:[%s5456_s9 + $0x98] sm:$0xff]  ;;  %v320_v4 = vld [vmem:[%s5456_s9 + $0xa0] sm:$0xff] }
  0x33   : > { %265 = vst [vmem:[#allocation2 + $0x98] sm:$0xff] %v5283_v0  ;;  %5021 = vmatpush.msra.mxu3 %v1253_v20  ;;  %1497 = vmatpush.msra.mxu1 %v1253_v20  ;;  %v1290_v60 = vld [vmem:[#allocation4 + $0x1d8] sm:$0xff]  ;;  %v1273_v5 = vld [vmem:[#allocation4 + $0x150] sm:$0xff]  ;;  %v1272_v14 = vld [vmem:[#allocation4 + $0x148] sm:$0xff] }
  0x34   : > { %266 = vst [vmem:[#allocation2 + $0xa0] sm:$0x3] %v5283_v0  ;;  %1385 = vmatpush.msra.mxu0 %v1236_v21  ;;  %5006 = vmatpush.msra.mxu2 %v1236_v21  ;;  %v1289_v6 = vld [vmem:[#allocation4 + $0x1d0] sm:$0xff]  ;;  %v1306_v7 = vld [vmem:[#allocation4 + $0x258] sm:$0xff]  ;;  %v1288_v15 = vld [vmem:[#allocation4 + $0x1c8] sm:$0xff] }
  0x35   : > { %267 = vst [vmem:[#allocation2 + $0xa8] sm:$0xff] %v5283_v0  ;;  %5022 = vmatpush.msra.mxu3 %v1252_v22  ;;  %1498 = vmatpush.msra.mxu1 %v1252_v22  ;;  %v305_v12 = vld [vmem:[%s5456_s9 + $0x28] sm:$0xff]  ;;  %v306_v21 = vld [vmem:[%s5456_s9 + $0x30] sm:$0xff] }
  0x36   : > { %268 = vst [vmem:[#allocation2 + $0xb0] sm:$0xff] %v5283_v0  ;;  %1386 = vmatpush.msra.mxu0 %v1235_v23  ;;  %5007 = vmatpush.msra.mxu2 %v1235_v23  ;;  %v321_v13 = vld [vmem:[%s5456_s9 + $0xa8] sm:$0xff]  ;;  %v322_v22 = vld [vmem:[%s5456_s9 + $0xb0] sm:$0xff]  ;;  %v1271_v23 = vld [vmem:[#allocation4 + $0x140] sm:$0xff] }
  0x37   : > { %269 = vst [vmem:[#allocation2 + $0xb8] sm:$0x3] %v5283_v0  ;;  %5023 = vmatpush.msra.mxu3 %v1251_v24  ;;  %1499 = vmatpush.msra.mxu1 %v1251_v24  ;;  %v1305_v16 = vld [vmem:[#allocation4 + $0x250] sm:$0xff]  ;;  %v1287_v24 = vld [vmem:[#allocation4 + $0x1c0] sm:$0xff] }
  0x38   : > { %270 = vst [vmem:[#allocation2 + $0xc0] sm:$0xff] %v5283_v0  ;;  %1387 = vmatpush.msra.mxu0 %v1234_v25  ;;  %5008 = vmatpush.msra.mxu2 %v1234_v25  ;;  %v1304_v25 = vld [vmem:[#allocation4 + $0x248] sm:$0xff] }
  0x39   : > { %271 = vst [vmem:[#allocation2 + $0xc8] sm:$0xff] %v5283_v0  ;;  %5024 = vmatpush.msra.mxu3 %v1250_v26  ;;  %1500 = vmatpush.msra.mxu1 %v1250_v26 }
  0x3a   : > { %272 = vst [vmem:[#allocation2 + $0xd0] sm:$0x3] %v5283_v0  ;;  %1388 = vmatpush.msra.mxu0 %v1233_v27  ;;  %5009 = vmatpush.msra.mxu2 %v1233_v27 }
  0x3b   : > { %273 = vst [vmem:[#allocation2 + $0xd8] sm:$0xff] %v5283_v0  ;;  %5025 = vmatpush.msra.mxu3 %v1249_v28  ;;  %1501 = vmatpush.msra.mxu1 %v1249_v28 }
  0x3c   : > { %274 = vst [vmem:[#allocation2 + $0xe0] sm:$0xff] %v5283_v0  ;;  %1389 = vmatpush.msra.mxu0 %v1232_v29  ;;  %5010 = vmatpush.msra.mxu2 %v1232_v29 }
  0x3d   : > { %275 = vst [vmem:[#allocation2 + $0xe8] sm:$0x3] %v5283_v0  ;;  %5026 = vmatpush.msra.mxu3 %v1248_v30  ;;  %1502 = vmatpush.msra.mxu1 %v1248_v30  ;;  %v307_v30 = vld [vmem:[%s5456_s9 + $0x38] sm:$0xff] }
  0x3e   : > { %276 = vst [vmem:[#allocation2 + $0xf0] sm:$0xff] %v5283_v0  ;;  %1390 = vmatpush.msra.mxu0 %v1231_v31  ;;  %5011 = vmatpush.msra.mxu2 %v1231_v31  ;;  %v323_v31 = vld [vmem:[%s5456_s9 + $0xb8] sm:$0xff] }
  0x3f   : > { %277 = vst [vmem:[#allocation2 + $0xf8] sm:$0xff] %v5283_v0  ;;  %5027 = vmatpush.msra.mxu3 %v1247_v32  ;;  %1391 = vmatmul.f32.vlgmr.msra.gmra.mxu0 %v5283_v0 }
  0x40   : > { %278 = vst [vmem:[#allocation2 + $0x100] sm:$0x3] %v5283_v0  ;;  %1601 = vmatpush.msrb.mxu2 %v1278_v33  ;;  %1503 = vmatpush.msra.mxu1 %v1247_v32  ;;  %v1270_v32 = vld [vmem:[#allocation4 + $0x138] sm:$0xff] }
  0x41   : > { %279 = vst [vmem:[#allocation2 + $0x108] sm:$0xff] %v5283_v0  ;;  %1714 = vmatpush.msrb.mxu3 %v1294_v34  ;;  %1827 = vmatpush.msrb.mxu0 %v1310_v38  ;;  %v1286_v33 = vld [vmem:[#allocation4 + $0x1b8] sm:$0xff]  ;;  %v1303_v34 = vld [vmem:[#allocation4 + $0x240] sm:$0xff] }
  0x42   : > { %280 = vst [vmem:[#allocation2 + $0x110] sm:$0xff] %v5283_v0  ;;  %1602 = vmatpush.msrb.mxu2 %v1277_v35  ;;  %1504 = vmatmul.f32.vlgmr.msra.gmra.mxu1 %v430_v36 }
  0x43   : > { %281 = vst [vmem:[#allocation2 + $0x118] sm:$0x3] %v5283_v0  ;;  %1715 = vmatpush.msrb.mxu3 %v1293_v37  ;;  %1828 = vmatpush.msrb.mxu0 %v1309_v42  ;;  %v1285_v42 = vld [vmem:[#allocation4 + $0x1b0] sm:$0xff] }
  0x44   : > { %282 = vst [vmem:[#allocation2 + $0x120] sm:$0xff] %v5283_v0  ;;  %1603 = vmatpush.msrb.mxu2 %v1276_v39  ;;  %v308_v39 = vld [vmem:[%s5456_s9 + $0x40] sm:$0xff] }
  0x45   : > { %283 = vst [vmem:[#allocation2 + $0x128] sm:$0xff] %v5283_v0  ;;  %1716 = vmatpush.msrb.mxu3 %v1292_v41  ;;  %1829 = vmatpush.msrb.mxu0 %v1308_v49  ;;  %v1269_v41 = vld [vmem:[#allocation4 + $0x130] sm:$0xff] }
  0x46   : > { %284 = vst [vmem:[#allocation2 + $0x130] sm:$0x3] %v5283_v0  ;;  %1604 = vmatpush.msrb.mxu2 %v1275_v47  ;;  %v325_v49 = vld [vmem:[%s5456_s9 + $0xc8] sm:$0xff] }
  0x47   : > { %285 = vst [vmem:[#allocation2 + $0x138] sm:$0xff] %v5283_v0  ;;  %1394 = vmatmul.f32.gmra.mxu0 %v5283_v0  ;;  %1717 = vmatpush.msrb.mxu3 %v1291_v48  ;;  %v309_v48 = vld [vmem:[%s5456_s9 + $0x48] sm:$0xff] }
  0x48   : > { %286 = vst [vmem:[#allocation2 + $0x140] sm:$0xff] %v5283_v0  ;;  %1605 = vmatpush.msrb.mxu2 %v1274_v57  ;;  %1830 = vmatpush.msrb.mxu0 %v1307_v61  ;;  %v310_v57 = vld [vmem:[%s5456_s9 + $0x50] sm:$0xff]  ;;  %v1267_v61 = vld [vmem:[#allocation4 + $0x120] sm:$0xff] }
  0x49   : > { %287 = vst [vmem:[#allocation2 + $0x148] sm:$0x3] %v5283_v0  ;;  %1718 = vmatpush.msrb.mxu3 %v1290_v60  ;;  %v326_v60 = vld [vmem:[%s5456_s9 + $0xd0] sm:$0xff] }
  0x4a   : > { %288 = vst [vmem:[#allocation2 + $0x150] sm:$0xff] %v5283_v0  ;;  %1507 = vmatmul.f32.gmra.mxu1 %v431_v40  ;;  %1606 = vmatpush.msrb.mxu2 %v1273_v5  ;;  %v324_v40 = vld [vmem:[%s5456_s9 + $0xc0] sm:$0xff] }
  0x4b   : > { %289 = vst [vmem:[#allocation2 + $0x158] sm:$0xff] %v5283_v0  ;;  %1719 = vmatpush.msrb.mxu3 %v1289_v6  ;;  %1831 = vmatpush.msrb.mxu0 %v1306_v7  ;;  %v311_v6 = vld [vmem:[%s5456_s9 + $0x58] sm:$0xff] }
  0x4c   : > { %290 = vst [vmem:[#allocation2 + $0x160] sm:$0x3] %v5283_v0  ;;  %1607 = vmatpush.msrb.mxu2 %v1272_v14  ;;  %v327_v7 = vld [vmem:[%s5456_s9 + $0xd8] sm:$0xff] }
  0x4d   : > { %291 = vst [vmem:[#allocation2 + $0x168] sm:$0xff] %v5283_v0  ;;  %1720 = vmatpush.msrb.mxu3 %v1288_v15  ;;  %1832 = vmatpush.msrb.mxu0 %v1305_v16 }
  0x4e   : > { %292 = vst [vmem:[#allocation2 + $0x170] sm:$0xff] %v5283_v0  ;;  %1608 = vmatpush.msrb.mxu2 %v1271_v23  ;;  %v1298_v23 = vld [vmem:[#allocation4 + $0x218] sm:$0xff] }
  0x4f   : > { %293 = vst [vmem:[#allocation2 + $0x178] sm:$0x3] %v5283_v0  ;;  %1721 = vmatpush.msrb.mxu3 %v1287_v24  ;;  %1833 = vmatpush.msrb.mxu0 %v1304_v25  ;;  %v1326_v24 = vld [vmem:[#allocation4 + $0x2f8] sm:$0xff]  ;;  %v1325_v25 = vld [vmem:[#allocation4 + $0x2f0] sm:$0xff] }
  0x50   : > { %294 = vst [vmem:[#allocation2 + $0x180] sm:$0xff] %v5283_v0  ;;  %1609 = vmatpush.msrb.mxu2 %v1270_v32  ;;  %1940 = vmatpush.msrb.mxu1 %v1326_v24  ;;  %v313_v32 = vld [vmem:[%s5456_s9 + $0x68] sm:$0xff] }
  0x51   : > { %295 = vst [vmem:[#allocation2 + $0x188] sm:$0xff] %v5283_v0  ;;  %1722 = vmatpush.msrb.mxu3 %v1286_v33  ;;  %1834 = vmatpush.msrb.mxu0 %v1303_v34  ;;  %v329_v33 = vld [vmem:[%s5456_s9 + $0xe8] sm:$0xff]  ;;  %v1264_v34 = vld [vmem:[#allocation4 + $0x108] sm:$0xff] }
  0x52   : > { %296 = vst [vmem:[#allocation2 + $0x190] sm:$0x3] %v5283_v0  ;;  %1610 = vmatpush.msrb.mxu2 %v1269_v41  ;;  %1941 = vmatpush.msrb.mxu1 %v1325_v25  ;;  %v1322_v41 = vld [vmem:[#allocation4 + $0x2d8] sm:$0xff] }
  0x53   : > { %297 = vst [vmem:[#allocation2 + $0x198] sm:$0xff] %v5283_v0  ;;  %1723 = vmatpush.msrb.mxu3 %v1285_v42 }
  0x54   : > { %298 = vst [vmem:[#allocation2 + $0x1a0] sm:$0xff] %v5283_v0 }
  0x55   : > { %299 = vst [vmem:[#allocation2 + $0x1a8] sm:$0x3] %v5283_v0 }
  0x56   : > { %348 = vst.msk [vmem:[#allocation2 + $0xc1] sm:$0xff] %vm333_vm0, %v314_v43  ;;  %v1302_v43 = vld [vmem:[#allocation4 + $0x238] sm:$0xff] }
  0x57   : > { %349 = vst.msk [vmem:[#allocation2 + $0xc9] sm:$0xff] %vm333_vm0, %v315_v44  ;;  %1835 = vmatpush.msrb.mxu0 %v1302_v43 }
  0x58   : > { %334 = vst.msk [vmem:[#allocation2 + $0x19] sm:$0xff] %vm333_vm0, %v300_v45 }
  0x59   : > { %350 = vst.msk [vmem:[#allocation2 + $0xd9] sm:$0xff] %vm333_vm0, %v316_v46 }
  0x5a   : > { %335 = vst.msk [vmem:[#allocation2 + $0x21] sm:$0xff] %vm333_vm0, %v301_v50  ;;  %v1268_v50 = vld [vmem:[#allocation4 + $0x128] sm:$0xff] }
  0x5b   : > { %351 = vst.msk [vmem:[#allocation2 + $0xe1] sm:$0xff] %vm333_vm0, %v317_v51  ;;  %1611 = vmatpush.msrb.mxu2 %v1268_v50  ;;  %v1284_v51 = vld [vmem:[#allocation4 + $0x1a8] sm:$0xff] }
  0x5c   : > { %336 = vst.msk [vmem:[#allocation2 + $0x31] sm:$0xff] %vm333_vm0, %v302_v52  ;;  %v1301_v52 = vld [vmem:[#allocation4 + $0x230] sm:$0xff]  ;;  %1724 = vmatpush.msrb.mxu3 %v1284_v51  ;;  %v1320_v50 = vld [vmem:[#allocation4 + $0x2c8] sm:$0xff]  ;;  %v1279_v51 = vld [vmem:[#allocation4 + $0x180] sm:$0xff] }
  0x5d   : > { %v382_v54 = vld [vmem:[#allocation2 + $0xc0] sm:$0xff]  ;;  %352 = vst.msk [vmem:[#allocation2 + $0xf1] sm:$0xff] %vm333_vm0, %v318_v53  ;;  %1836 = vmatpush.msrb.mxu0 %v1301_v52  ;;  %1612 = vmatpush.msrb.mxu2 %v1267_v61  ;;  %v1296_v52 = vld [vmem:[#allocation4 + $0x208] sm:$0xff] }
  0x5e   : > { %v446_v55 = vld [vmem:[#allocation2 + $0xc1] sm:$0xff]  ;;  %1439 = vmatmul.f32.vlgmr.msra.gmra.mxu2 %v382_v54  ;;  %337 = vst.msk [vmem:[#allocation2 + $0x39] sm:$0xff] %vm333_vm0, %v303_v56  ;;  %v447_v0 = vld [vmem:[#allocation2 + $0xc9] sm:$0xff] }
  0x5f   : > { %1552 = vmatmul.f32.vlgmr.msra.gmra.mxu3 %v446_v55  ;;  %v5481_v58 = vld [vmem:[#allocation2 + $0x18] sm:$0xff]  ;;  %353 = vst.msk [vmem:[#allocation2 + $0xf9] sm:$0xff] %vm333_vm0, %v319_v62  ;;  %v383_v63 = vld [vmem:[#allocation2 + $0xc8] sm:$0xff]  ;;  %v1283_v62 = vld [vmem:[#allocation4 + $0x1a0] sm:$0xff] }
  0x60   : > { %v5483_v59 = vld [vmem:[#allocation2 + $0x19] sm:$0xff]  ;;  %1397 = vmatmul.f32.gmra.mxu0 %v5481_v58  ;;  %338 = vst.msk [vmem:[#allocation2 + $0x49] sm:$0xff] %vm333_vm0, %v304_v3  ;;  %1725 = vmatpush.msrb.mxu3 %v1283_v62 }
  0x61   : > { %1510 = vmatmul.f32.gmra.mxu1 %v5483_v59  ;;  %v5489_v1 = vld [vmem:[#allocation2 + $0x20] sm:$0xff]  ;;  %354 = vst.msk [vmem:[#allocation2 + $0x109] sm:$0xff] %vm333_vm0, %v320_v4  ;;  %v384_v8 = vld [vmem:[#allocation2 + $0xd8] sm:$0xff] }
  0x62   : > { %v5491_v2 = vld [vmem:[#allocation2 + $0x21] sm:$0xff]  ;;  %v448_v9 = vld [vmem:[#allocation2 + $0xd9] sm:$0xff]  ;;  %339 = vst.msk [vmem:[#allocation2 + $0x51] sm:$0xff] %vm333_vm0, %v305_v12  ;;  %v1299_v12 = vld [vmem:[#allocation4 + $0x220] sm:$0xff] }
  0x63   : > { %v5499_v10 = vld [vmem:[#allocation2 + $0x30] sm:$0xff]  ;;  %355 = vst.msk [vmem:[#allocation2 + $0x111] sm:$0xff] %vm333_vm0, %v321_v13  ;;  %v385_v17 = vld [vmem:[#allocation2 + $0xe0] sm:$0xff] }
  0x64   : > { %v5501_v11 = vld [vmem:[#allocation2 + $0x31] sm:$0xff]  ;;  %v449_v18 = vld [vmem:[#allocation2 + $0xe1] sm:$0xff]  ;;  %340 = vst.msk [vmem:[#allocation2 + $0x61] sm:$0xff] %vm333_vm0, %v306_v21 }
  0x65   : > { %v5509_v19 = vld [vmem:[#allocation2 + $0x38] sm:$0xff]  ;;  %356 = vst.msk [vmem:[#allocation2 + $0x121] sm:$0xff] %vm333_vm0, %v322_v22  ;;  %v386_v26 = vld [vmem:[#allocation2 + $0xf0] sm:$0xff]  ;;  %v1265_v21 = vld [vmem:[#allocation4 + $0x110] sm:$0xff] }
  0x66   : > { %1442 = vmatmul.f32.gmra.mxu2 %v383_v63  ;;  %v5511_v20 = vld [vmem:[#allocation2 + $0x39] sm:$0xff]  ;;  %v450_v27 = vld [vmem:[#allocation2 + $0xf1] sm:$0xff]  ;;  %341 = vst.msk [vmem:[#allocation2 + $0x69] sm:$0xff] %vm333_vm0, %v307_v30 }
  0x67   : > { %1555 = vmatmul.f32.gmra.mxu3 %v447_v0  ;;  %v5519_v28 = vld [vmem:[#allocation2 + $0x48] sm:$0xff]  ;;  %357 = vst.msk [vmem:[#allocation2 + $0x129] sm:$0xff] %vm333_vm0, %v323_v31  ;;  %v387_v35 = vld [vmem:[#allocation2 + $0xf8] sm:$0xff]  ;;  %v1281_v22 = vld [vmem:[#allocation4 + $0x190] sm:$0xff] }
  0x68   : > { %1400 = vmatmul.f32.gmra.mxu0 %v5489_v1  ;;  %v5521_v29 = vld [vmem:[#allocation2 + $0x49] sm:$0xff]  ;;  %v451_v36 = vld [vmem:[#allocation2 + $0xf9] sm:$0xff]  ;;  %342 = vst.msk [vmem:[#allocation2 + $0x79] sm:$0xff] %vm333_vm0, %v308_v39 }
  0x69   : > { %1513 = vmatmul.f32.gmra.mxu1 %v5491_v2  ;;  %v5529_v37 = vld [vmem:[#allocation2 + $0x50] sm:$0xff]  ;;  %358 = vst.msk [vmem:[#allocation2 + $0x139] sm:$0xff] %vm333_vm0, %v324_v40  ;;  %v388_v44 = vld [vmem:[#allocation2 + $0x108] sm:$0xff]  ;;  %v1300_v63 = vld [vmem:[#allocation4 + $0x228] sm:$0xff] }
  0x6a   : > { %v5531_v38 = vld [vmem:[#allocation2 + $0x51] sm:$0xff]  ;;  %v452_v45 = vld [vmem:[#allocation2 + $0x109] sm:$0xff]  ;;  %343 = vst.msk [vmem:[#allocation2 + $0x81] sm:$0xff] %vm333_vm0, %v309_v48  ;;  %1837 = vmatpush.msrb.mxu0 %v1300_v63  ;;  %v1297_v39 = vld [vmem:[#allocation4 + $0x210] sm:$0xff] }
  0x6b   : > { %v5539_v46 = vld [vmem:[#allocation2 + $0x60] sm:$0xff]  ;;  %359 = vst.msk [vmem:[#allocation2 + $0x141] sm:$0xff] %vm333_vm0, %v325_v49  ;;  %v389_v53 = vld [vmem:[#allocation2 + $0x110] sm:$0xff] }
  0x6c   : > { %v5541_v47 = vld [vmem:[#allocation2 + $0x61] sm:$0xff]  ;;  %v453_v54 = vld [vmem:[#allocation2 + $0x111] sm:$0xff]  ;;  %344 = vst.msk [vmem:[#allocation2 + $0x91] sm:$0xff] %vm333_vm0, %v310_v57  ;;  %1838 = vmatpush.msrb.mxu0 %v1299_v12 }
  0x6d   : > { %v5549_v55 = vld [vmem:[#allocation2 + $0x68] sm:$0xff]  ;;  %360 = vst.msk [vmem:[#allocation2 + $0x151] sm:$0xff] %vm333_vm0, %v326_v60  ;;  %v390_v0 = vld [vmem:[#allocation2 + $0x120] sm:$0xff]  ;;  %v1323_v40 = vld [vmem:[#allocation4 + $0x2e0] sm:$0xff] }
  0x6e   : > { %1445 = vmatmul.f32.gmra.mxu2 %v384_v8  ;;  %v5551_v56 = vld [vmem:[#allocation2 + $0x69] sm:$0xff]  ;;  %v454_v3 = vld [vmem:[#allocation2 + $0x121] sm:$0xff]  ;;  %345 = vst.msk [vmem:[#allocation2 + $0x99] sm:$0xff] %vm333_vm0, %v311_v6  ;;  %1839 = vmatpush.msrb.mxu0 %v1298_v23  ;;  %v1316_v6 = vld [vmem:[#allocation4 + $0x2a8] sm:$0xff] }
  0x6f   : > { %1558 = vmatmul.f32.gmra.mxu3 %v448_v9  ;;  %v5559_v4 = vld [vmem:[#allocation2 + $0x78] sm:$0xff]  ;;  %v1266_v8 = vld [vmem:[#allocation4 + $0x118] sm:$0xff]  ;;  %361 = vst.msk [vmem:[#allocation2 + $0x159] sm:$0xff] %vm333_vm0, %v327_v7  ;;  %v1263_v49 = vld [vmem:[#allocation4 + $0x100] sm:$0xff] }
  0x70   : > { %1403 = vmatmul.f32.gmra.mxu0 %v5499_v10  ;;  %v5561_v5 = vld [vmem:[#allocation2 + $0x79] sm:$0xff]  ;;  %1613 = vmatpush.msrb.mxu2 %v1266_v8  ;;  %v1282_v9 = vld [vmem:[#allocation4 + $0x198] sm:$0xff]  ;;  %347 = vst.msk [vmem:[#allocation2 + $0xb1] sm:$0xff] %vm333_vm0, %v313_v32  ;;  %v1315_v8 = vld [vmem:[#allocation4 + $0x2a0] sm:$0xff] }
  0x71   : > { %1516 = vmatmul.f32.gmra.mxu1 %v5501_v11  ;;  %1726 = vmatpush.msrb.mxu3 %v1282_v9  ;;  %v391_v13 = vld [vmem:[#allocation2 + $0x128] sm:$0xff]  ;;  %v5569_v15 = vld [vmem:[#allocation2 + $0x80] sm:$0xff]  ;;  %363 = vst.msk [vmem:[#allocation2 + $0x171] sm:$0xff] %vm333_vm0, %v329_v33  ;;  %v1311_v23 = vld [vmem:[#allocation4 + $0x280] sm:$0xff] }
  0x72   : > { %v455_v14 = vld [vmem:[#allocation2 + $0x129] sm:$0xff]  ;;  %v5571_v16 = vld [vmem:[#allocation2 + $0x81] sm:$0xff]  ;;  %1614 = vmatpush.msrb.mxu2 %v1265_v21  ;;  %1840 = vmatpush.msrb.mxu0 %v1297_v39  ;;  %v1312_v21 = vld [vmem:[#allocation4 + $0x288] sm:$0xff] }
  0x73   : > { %1727 = vmatpush.msrb.mxu3 %v1281_v22  ;;  %v5579_v30 = vld [vmem:[#allocation2 + $0x90] sm:$0xff]  ;;  %v393_v42 = vld [vmem:[#allocation2 + $0x140] sm:$0xff]  ;;  %v1318_v57 = vld [vmem:[#allocation4 + $0x2b8] sm:$0xff] }
  0x74   : > { %v5581_v31 = vld [vmem:[#allocation2 + $0x91] sm:$0xff]  ;;  %1615 = vmatpush.msrb.mxu2 %v1264_v34  ;;  %v457_v43 = vld [vmem:[#allocation2 + $0x141] sm:$0xff]  ;;  %1841 = vmatpush.msrb.mxu0 %v1296_v52 }
  0x75   : > { %v5591_v48 = vld [vmem:[#allocation2 + $0x99] sm:$0xff]  ;;  %v394_v60 = vld [vmem:[#allocation2 + $0x150] sm:$0xff]  ;;  %v1358_v7 = vld [vmem:[#allocation4 + $0x3f8] sm:$0xff] }
  0x76   : > { %1448 = vmatmul.f32.gmra.mxu2 %v385_v17  ;;  %v312_v17 = vld [vmem:[%s5456_s9 + $0x60] sm:$0xff]  ;;  %v1317_v62 = vld [vmem:[#allocation4 + $0x2b0] sm:$0xff]  ;;  %v1314_v9 = vld [vmem:[#allocation4 + $0x298] sm:$0xff] }
  0x77   : > { %1561 = vmatmul.f32.gmra.mxu3 %v449_v18  ;;  %v328_v18 = vld [vmem:[%s5456_s9 + $0xe0] sm:$0xff]  ;;  %346 = vst.msk [vmem:[#allocation2 + $0xa9] sm:$0xff] %vm333_vm0, %v312_v17  ;;  %1616 = vmatpush.msrb.mxu2 %v1263_v49  ;;  %v1374_v22 = vld [vmem:[#allocation4 + $0x478] sm:$0xff]  ;;  %v1341_v33 = vld [vmem:[#allocation4 + $0x370] sm:$0xff] }
  0x78   : > { %1406 = vmatmul.f32.gmra.mxu0 %v5509_v19  ;;  %362 = vst.msk [vmem:[#allocation2 + $0x169] sm:$0xff] %vm333_vm0, %v328_v18  ;;  %v458_v61 = vld [vmem:[#allocation2 + $0x151] sm:$0xff]  ;;  %v686_v32 = vld [vmem:[#allocation2 + $0x1a] sm:$0xff] }
  0x79   : > { %1519 = vmatmul.f32.gmra.mxu1 %v5511_v20  ;;  %v395_v12 = vld [vmem:[#allocation2 + $0x158] sm:$0xff]  ;;  %v1357_v34 = vld [vmem:[#allocation4 + $0x3f0] sm:$0xff] }
  0x7a   : > { %v5603_v18 = vld [vmem:[#allocation2 + $0xb1] sm:$0xff] }
  0x7e   : > { %1451 = vmatmul.f32.gmra.mxu2 %v386_v26  ;;  %v392_v26 = vld [vmem:[#allocation2 + $0x138] sm:$0xff]  ;;  %v5595_v63 = vld [vmem:[#allocation2 + $0xa8] sm:$0xff]  ;;  %v5601_v17 = vld [vmem:[#allocation2 + $0xb0] sm:$0xff] }
  0x7f   : > { %1564 = vmatmul.f32.gmra.mxu3 %v450_v27  ;;  %v456_v27 = vld [vmem:[#allocation2 + $0x139] sm:$0xff] }
  0x80   : > { %1409 = vmatmul.f32.gmra.mxu0 %v5519_v28 }
  0x81   : > { %1522 = vmatmul.f32.gmra.mxu1 %v5521_v29 }
  0x86   : > { %1454 = vmatmul.f32.gmra.mxu2 %v387_v35  ;;  %v1324_v35 = vld [vmem:[#allocation4 + $0x2e8] sm:$0xff] }
  0x87   : > { %1567 = vmatmul.f32.gmra.mxu3 %v451_v36  ;;  %v1280_v36 = vld [vmem:[#allocation4 + $0x188] sm:$0xff]  ;;  %1942 = vmatpush.msrb.mxu1 %v1324_v35  ;;  %v397_v35 = vld [vmem:[#allocation2 + $0x170] sm:$0xff] }
  0x88   : > { %1412 = vmatmul.f32.gmra.mxu0 %v5529_v37  ;;  %1728 = vmatpush.msrb.mxu3 %v1280_v36  ;;  %v461_v36 = vld [vmem:[#allocation2 + $0x171] sm:$0xff] }
  0x89   : > { %1525 = vmatmul.f32.gmra.mxu1 %v5531_v38 }
  0x8a   : > { %1943 = vmatpush.msrb.mxu1 %v1323_v40  ;;  %1729 = vmatpush.msrb.mxu3 %v1279_v51  ;;  %v1356_v51 = vld [vmem:[#allocation4 + $0x3e8] sm:$0xff] }
  0x8c   : > { %1944 = vmatpush.msrb.mxu1 %v1322_v41  ;;  %2166 = vmatpush.msra.mxu3 %v1358_v7  ;;  %v687_v41 = vld [vmem:[#allocation2 + $0x22] sm:$0xff] }
  0x8e   : > { %1457 = vmatmul.f32.gmra.mxu2 %v388_v44  ;;  %v1321_v44 = vld [vmem:[#allocation4 + $0x2d0] sm:$0xff]  ;;  %2167 = vmatpush.msra.mxu3 %v1357_v34  ;;  %v1338_v34 = vld [vmem:[#allocation4 + $0x358] sm:$0xff] }
  0x8f   : > { %1570 = vmatmul.f32.gmra.mxu3 %v452_v45  ;;  %v5589_v45 = vld [vmem:[#allocation2 + $0x98] sm:$0xff]  ;;  %1945 = vmatpush.msrb.mxu1 %v1321_v44 }
  0x90   : > { %1415 = vmatmul.f32.gmra.mxu0 %v5539_v46  ;;  %2168 = vmatpush.msra.mxu3 %v1356_v51 }
  0x91   : > { %1528 = vmatmul.f32.gmra.mxu1 %v5541_v47 }
  0x92   : > { %1946 = vmatpush.msrb.mxu1 %v1320_v50  ;;  %v1340_v50 = vld [vmem:[#allocation4 + $0x368] sm:$0xff] }
  0x96   : > { %1460 = vmatmul.f32.gmra.mxu2 %v389_v53  ;;  %v1319_v53 = vld [vmem:[#allocation4 + $0x2c0] sm:$0xff] }
  0x97   : > { %1573 = vmatmul.f32.gmra.mxu3 %v453_v54  ;;  %v1295_v54 = vld [vmem:[#allocation4 + $0x200] sm:$0xff]  ;;  %1947 = vmatpush.msrb.mxu1 %v1319_v53 }
  0x98   : > { %1418 = vmatmul.f32.gmra.mxu0 %v5549_v55 }
  0x99   : > { %1531 = vmatmul.f32.gmra.mxu1 %v5551_v56  ;;  %1842 = vmatpush.msrb.mxu0 %v1295_v54  ;;  %v495_v54 = vld [vmem:[#allocation2 + $0xa] sm:$0xff] }
  0x9a   : > { %1948 = vmatpush.msrb.mxu1 %v1318_v57 }
  0x9b   : > { %2279 = vmatpush.msra.mxu0 %v1374_v22  ;;  %v691_v22 = vld [vmem:[#allocation2 + $0x52] sm:$0xff] }
  0x9c   : > { %1949 = vmatpush.msrb.mxu1 %v1317_v62 }
  0x9e   : > { %1463 = vmatmul.f32.gmra.mxu2 %v390_v0  ;;  %v5597_v0 = vld [vmem:[#allocation2 + $0xa9] sm:$0xff]  ;;  %1950 = vmatpush.msrb.mxu1 %v1316_v6 }
  0x9f   : > { %1576 = vmatmul.f32.gmra.mxu3 %v454_v3  ;;  %v1342_v3 = vld [vmem:[#allocation4 + $0x378] sm:$0xff] }
  0xa0   : > { %1421 = vmatmul.f32.gmra.mxu0 %v5559_v4  ;;  %2053 = vmatpush.msra.mxu2 %v1342_v3 }
  0xa1   : > { %1534 = vmatmul.f32.gmra.mxu1 %v5561_v5 }
  0xa2   : > { %1951 = vmatpush.msrb.mxu1 %v1315_v8  ;;  %2054 = vmatpush.msra.mxu2 %v1341_v33  ;;  %v690_v8 = vld [vmem:[#allocation2 + $0x4a] sm:$0xff]  ;;  %v692_v33 = vld [vmem:[#allocation2 + $0x62] sm:$0xff] }
  0xa4   : > { %1952 = vmatpush.msrb.mxu1 %v1314_v9  ;;  %2055 = vmatpush.msra.mxu2 %v1340_v50  ;;  %v1339_v9 = vld [vmem:[#allocation4 + $0x360] sm:$0xff] }
  0xa6   : > { %1466 = vmatmul.f32.gmra.mxu2 %v391_v13  ;;  %v459_v13 = vld [vmem:[#allocation2 + $0x159] sm:$0xff] }
  0xa7   : > { %1579 = vmatmul.f32.gmra.mxu3 %v455_v14  ;;  %v1313_v14 = vld [vmem:[#allocation4 + $0x290] sm:$0xff]  ;;  %2056 = vmatpush.msra.mxu2 %v1339_v9 }
  0xa8   : > { %1424 = vmatmul.f32.gmra.mxu0 %v5569_v15  ;;  %1953 = vmatpush.msrb.mxu1 %v1313_v14  ;;  %v695_v9 = vld [vmem:[#allocation2 + $0x82] sm:$0xff] }
  0xa9   : > { %1537 = vmatmul.f32.gmra.mxu1 %v5571_v16  ;;  %2057 = vmatpush.msra.mxu2 %v1338_v34 }
  0xaa   : > { %1954 = vmatpush.msrb.mxu1 %v1312_v21 }
  0xac   : > { %1955 = vmatpush.msrb.mxu1 %v1311_v23 }
  0xae   : > { %1469 = vmatmul.f32.gmra.mxu2 %v392_v26  ;;  %v396_v26 = vld [vmem:[#allocation2 + $0x168] sm:$0xff] }
  0xaf   : > { %1582 = vmatmul.f32.gmra.mxu3 %v456_v27  ;;  %v460_v27 = vld [vmem:[#allocation2 + $0x169] sm:$0xff] }
  0xb0   : > { %1427 = vmatmul.f32.gmra.mxu0 %v5579_v30 }
  0xb1   : > { %1540 = vmatmul.f32.gmra.mxu1 %v5581_v31 }
  0xb6   : > { %1472 = vmatmul.f32.gmra.mxu2 %v393_v42  ;;  %v1373_v42 = vld [vmem:[#allocation4 + $0x470] sm:$0xff] }
  0xb7   : > { %1585 = vmatmul.f32.gmra.mxu3 %v457_v43  ;;  %2280 = vmatpush.msra.mxu0 %v1373_v42  ;;  %v494_v43 = vld [vmem:[#allocation2 + $0x2] sm:$0xff] }
  0xb8   : > { %1430 = vmatmul.f32.gmra.mxu0 %v5589_v45 }
  0xb9   : > { %1543 = vmatmul.f32.gmra.mxu1 %v5591_v48 }
  0xbc   : > { %v5607_v24 = vpop.f32.mrf.mxu0 }
  0xbe   : > { %1475 = vmatmul.f32.gmra.mxu2 %v394_v60 }
  0xbf   : > { %1588 = vmatmul.f32.gmra.mxu3 %v458_v61  ;;  %v5609_v25 = vpop.f32.mrf.mxu1  ;;  %v689_v61 = vld [vmem:[#allocation2 + $0x3a] sm:$0xff] }
  0xc0   : > { %1433 = vmatmul.f32.gmra.mxu0 %v5595_v63 }
  0xc1   : > { %1546 = vmatmul.f32.gmra.mxu1 %v5597_v0 }
  0xc4   : > { %v5612_v39 = vpop.f32.mrf.mxu0 }
  0xc6   : > { %1478 = vmatmul.f32.gmra.mxu2 %v395_v12  ;;  %v1355_v12 = vld [vmem:[#allocation4 + $0x3e0] sm:$0xff] }
  0xc7   : > { %1591 = vmatmul.f32.gmra.mxu3 %v459_v13  ;;  %v5614_v40 = vpop.f32.mrf.mxu1 }
  0xc8   : > { %1436 = vmatmul.f32.gmra.mxu0 %v5601_v17  ;;  %2169 = vmatpush.msra.mxu3 %v1355_v12 }
  0xc9   : > { %1549 = vmatmul.f32.gmra.mxu1 %v5603_v18 }
  0xce   : > { %1481 = vmatmul.f32.gmra.mxu2 %v396_v26 }
  0xcf   : > { %1594 = vmatmul.f32.gmra.mxu3 %v460_v27 }
  0xd0   : > { %1843 = vmatmul.f32.vlgmr.msrb.gmra.mxu0 %v5483_v59  ;;  %v688_v59 = vld [vmem:[#allocation2 + $0x32] sm:$0xff] }
  0xd1   : > { %1956 = vmatmul.f32.vlgmr.msrb.gmra.mxu1 %v686_v32 }
  0xd6   : > { %1484 = vmatmul.f32.gmra.mxu2 %v397_v35  ;;  %v1354_v35 = vld [vmem:[#allocation4 + $0x3d8] sm:$0xff] }
  0xd7   : > { %1597 = vmatmul.f32.gmra.mxu3 %v461_v36 }
  0xd8   : > { %1846 = vmatmul.f32.gmra.mxu0 %v5491_v2  ;;  %2170 = vmatpush.msra.mxu3 %v1354_v35  ;;  %v697_v35 = vld [vmem:[#allocation2 + $0x9a] sm:$0xff] }
  0xd9   : > { %1959 = vmatmul.f32.gmra.mxu1 %v687_v41 }
  0xdd   : > { %v5617_v44 = vpop.f32.mrf.mxu0 }
  0xde   : > { %v5619_v49 = vpop.f32.mrf.mxu1  ;;  %1617 = vmatmul.f32.vlgmr.msrb.gmra.mxu2 %v494_v43  ;;  %v693_v43 = vld [vmem:[#allocation2 + $0x6a] sm:$0xff] }
  0xdf   : > { %1730 = vmatmul.f32.vlgmr.msrb.gmra.mxu3 %v5481_v58  ;;  %v1372_v58 = vld [vmem:[#allocation4 + $0x468] sm:$0xff] }
  0xe0   : > { %1849 = vmatmul.f32.gmra.mxu0 %v5501_v11 }
  0xe1   : > { %1962 = vmatmul.f32.gmra.mxu1 %v688_v59  ;;  %v1440_v52 = vpop.f32.mrf.mxu2  ;;  %2281 = vmatpush.msra.mxu0 %v1372_v58 }
  0xe2   : > { %v1553_v53 = vpop.f32.mrf.mxu3 }
  0xe3   : > { %v5623_v2 = vadd.f32 %v1553_v53, %v1440_v52  ;;  %v694_v53 = vld [vmem:[#allocation2 + $0x7a] sm:$0xff] }
  0xe5   : > { %v5625_v57 = vpop.f32.mrf.mxu0 }
  0xe6   : > { %v5627_v60 = vpop.f32.mrf.mxu1  ;;  %1620 = vmatmul.f32.gmra.mxu2 %v495_v54  ;;  %v1337_v54 = vld [vmem:[#allocation4 + $0x350] sm:$0xff] }
  0xe7   : > { %1733 = vmatmul.f32.gmra.mxu3 %v5489_v1  ;;  %2058 = vmatpush.msra.mxu2 %v1337_v54 }
  0xe8   : > { %1852 = vmatmul.f32.gmra.mxu0 %v5511_v20 }
  0xe9   : > { %1965 = vmatmul.f32.gmra.mxu1 %v689_v61  ;;  %v1443_v11 = vpop.f32.mrf.mxu2 }
  0xea   : > { %v1556_v62 = vpop.f32.mrf.mxu3 }
  0xeb   : > { %v5631_v3 = vadd.f32 %v1556_v62, %v1443_v11 }
  0xed   : > { %v5633_v6 = vpop.f32.mrf.mxu0 }
  0xee   : > { %v5635_v7 = vpop.f32.mrf.mxu1  ;;  %1623 = vmatmul.f32.gmra.mxu2 %v686_v32 }
  0xef   : > { %1736 = vmatmul.f32.gmra.mxu3 %v5499_v10  ;;  %v1371_v10 = vld [vmem:[#allocation4 + $0x460] sm:$0xff] }
  0xf0   : > { %1855 = vmatmul.f32.gmra.mxu0 %v5521_v29 }
  0xf1   : > { %1968 = vmatmul.f32.gmra.mxu1 %v690_v8  ;;  %v1446_v1 = vpop.f32.mrf.mxu2  ;;  %2282 = vmatpush.msra.mxu0 %v1371_v10  ;;  %v696_v10 = vld [vmem:[#allocation2 + $0x92] sm:$0xff] }
  0xf2   : > { %v1559_v20 = vpop.f32.mrf.mxu3 }
  0xf3   : > { %v5639_v13 = vadd.f32 %v1559_v20, %v1446_v1 }
  0xf5   : > { %v5641_v14 = vpop.f32.mrf.mxu0 }
  0xf6   : > { %v5643_v21 = vpop.f32.mrf.mxu1  ;;  %1626 = vmatmul.f32.gmra.mxu2 %v687_v41 }
  0xf7   : > { %1739 = vmatmul.f32.gmra.mxu3 %v5509_v19 }
  0xf8   : > { %1858 = vmatmul.f32.gmra.mxu0 %v5531_v38 }
  0xf9   : > { %1971 = vmatmul.f32.gmra.mxu1 %v691_v22  ;;  %v1449_v23 = vpop.f32.mrf.mxu2 }
  0xfa   : > { %v1562_v29 = vpop.f32.mrf.mxu3 }
  0xfb   : > { %v5647_v26 = vadd.f32 %v1562_v29, %v1449_v23  ;;  %v1352_v23 = vld [vmem:[#allocation4 + $0x3c8] sm:$0xff] }
  0xfd   : > { %v5649_v27 = vpop.f32.mrf.mxu0 }
  0xfe   : > { %v5651_v32 = vpop.f32.mrf.mxu1  ;;  %1629 = vmatmul.f32.gmra.mxu2 %v688_v59 }
  0xff   : > { %1742 = vmatmul.f32.gmra.mxu3 %v5519_v28  ;;  %v1370_v28 = vld [vmem:[#allocation4 + $0x458] sm:$0xff] }
 0x100   : > { %1861 = vmatmul.f32.gmra.mxu0 %v5541_v47 }
 0x101   : > { %1974 = vmatmul.f32.gmra.mxu1 %v692_v33  ;;  %v1452_v19 = vpop.f32.mrf.mxu2  ;;  %2283 = vmatpush.msra.mxu0 %v1370_v28 }
 0x102   : > { %v1565_v38 = vpop.f32.mrf.mxu3 }
 0x103   : > { %v5655_v36 = vadd.f32 %v1565_v38, %v1452_v19 }
 0x105   : > { %v5657_v41 = vpop.f32.mrf.mxu0 }
 0x106   : > { %v5659_v42 = vpop.f32.mrf.mxu1  ;;  %1632 = vmatmul.f32.gmra.mxu2 %v689_v61  ;;  %v1353_v61 = vld [vmem:[#allocation4 + $0x3d0] sm:$0xff] }
 0x107   : > { %1745 = vmatmul.f32.gmra.mxu3 %v5529_v37 }
 0x108   : > { %1864 = vmatmul.f32.gmra.mxu0 %v5551_v56  ;;  %2171 = vmatpush.msra.mxu3 %v1353_v61 }
 0x109   : > { %1977 = vmatmul.f32.gmra.mxu1 %v693_v43  ;;  %v1455_v59 = vpop.f32.mrf.mxu2 }
 0x10a   : > { %v1568_v47 = vpop.f32.mrf.mxu3  ;;  %2172 = vmatpush.msra.mxu3 %v1352_v23  ;;  %v5718_v23 = vld [vmem:[#allocation2 + $0xc2] sm:$0xff] }
 0x10b   : > { %v5663_v50 = vadd.f32 %v1568_v47, %v1455_v59  ;;  %v698_v59 = vld [vmem:[#allocation2 + $0xaa] sm:$0xff]  ;;  %7358 = vst [vmem:[#allocation17_spill] sm:$0xff] %v5718_v23 }
 0x10c   : > { %v1351_v47 = vld [vmem:[#allocation4 + $0x3c0] sm:$0xff] }
 0x10d   : > { %v5665_v51 = vpop.f32.mrf.mxu0  ;;  %2173 = vmatpush.msra.mxu3 %v1351_v47 }
 0x10e   : > { %v5667_v52 = vpop.f32.mrf.mxu1  ;;  %1635 = vmatmul.f32.gmra.mxu2 %v690_v8 }
 0x10f   : > { %1748 = vmatmul.f32.gmra.mxu3 %v5539_v46  ;;  %v1369_v46 = vld [vmem:[#allocation4 + $0x450] sm:$0xff] }
 0x110   : > { %1867 = vmatmul.f32.gmra.mxu0 %v5561_v5 }
 0x111   : > { %1980 = vmatmul.f32.gmra.mxu1 %v694_v53  ;;  %v1458_v37 = vpop.f32.mrf.mxu2  ;;  %2284 = vmatpush.msra.mxu0 %v1369_v46 }
 0x112   : > { %v1571_v56 = vpop.f32.mrf.mxu3 }
 0x113   : > { %v5671_v58 = vadd.f32 %v1571_v56, %v1458_v37  ;;  %v5707_v56 = vld [vmem:[#allocation2 + $0xb2] sm:$0xff] }
 0x115   : > { %v5673_v11 = vpop.f32.mrf.mxu0 }
 0x116   : > { %v5675_v62 = vpop.f32.mrf.mxu1  ;;  %1638 = vmatmul.f32.gmra.mxu2 %v691_v22  ;;  %v1336_v22 = vld [vmem:[#allocation4 + $0x348] sm:$0xff] }
 0x117   : > { %1751 = vmatmul.f32.gmra.mxu3 %v5549_v55  ;;  %2059 = vmatpush.msra.mxu2 %v1336_v22  ;;  %v636_v22 = vld [vmem:[#allocation2 + $0xc1] sm:$0xff] }
 0x118   : > { %1870 = vmatmul.f32.gmra.mxu0 %v5571_v16 }
 0x119   : > { %1983 = vmatmul.f32.gmra.mxu1 %v695_v9  ;;  %v1461_v8 = vpop.f32.mrf.mxu2 }
 0x11a   : > { %v1574_v5 = vpop.f32.mrf.mxu3 }
 0x11b   : > { %v5679_v12 = vadd.f32 %v1574_v5, %v1461_v8 }
 0x11d   : > { %v5681_v1 = vpop.f32.mrf.mxu0 }
 0x11e   : > { %v5683_v20 = vpop.f32.mrf.mxu1  ;;  %1641 = vmatmul.f32.gmra.mxu2 %v692_v33 }
 0x11f   : > { %1754 = vmatmul.f32.gmra.mxu3 %v5559_v4  ;;  %v1368_v4 = vld [vmem:[#allocation4 + $0x448] sm:$0xff] }
 0x120   : > { %1873 = vmatmul.f32.gmra.mxu0 %v5581_v31 }
 0x121   : > { %1986 = vmatmul.f32.gmra.mxu1 %v696_v10  ;;  %v1464_v55 = vpop.f32.mrf.mxu2  ;;  %2285 = vmatpush.msra.mxu0 %v1368_v4 }
 0x122   : > { %v1577_v16 = vpop.f32.mrf.mxu3 }
 0x123   : > { %v5687_v29 = vadd.f32 %v1577_v16, %v1464_v55 }
 0x125   : > { %v5689_v34 = vpop.f32.mrf.mxu0 }
 0x126   : > { %1644 = vmatmul.f32.gmra.mxu2 %v693_v43  ;;  %v5692_v33 = vpop.f32.mrf.mxu1  ;;  %v1335_v43 = vld [vmem:[#allocation4 + $0x340] sm:$0xff] }
 0x127   : > { %1757 = vmatmul.f32.gmra.mxu3 %v5569_v15  ;;  %2060 = vmatpush.msra.mxu2 %v1335_v43  ;;  %v5728_v43 = vld [vmem:[#allocation2 + $0xca] sm:$0xff] }
 0x128   : > { %1876 = vmatmul.f32.gmra.mxu0 %v5591_v48  ;;  %7360 = vst [vmem:[#allocation19_spill] sm:$0xff] %v5728_v43 }
 0x129   : > { %1989 = vmatmul.f32.gmra.mxu1 %v697_v35  ;;  %v1467_v19 = vpop.f32.mrf.mxu2 }
 0x12a   : > { %v1580_v31 = vpop.f32.mrf.mxu3 }
 0x12b   : > { %v5695_v38 = vadd.f32 %v1580_v31, %v1467_v19  ;;  %v637_v31 = vld [vmem:[#allocation2 + $0xc9] sm:$0xff] }
 0x12d   : > { %7355 = vst [vmem:[#allocation14_spill] sm:$0xff] %v5695_v38  ;;  %v5697_v28 = vpop.f32.mrf.mxu0  ;;  %v576_v38 = vld [vmem:[#allocation2 + $0xf0] sm:$0xff] }
 0x12e   : > { %1647 = vmatmul.f32.gmra.mxu2 %v694_v53  ;;  %v5701_v15 = vpop.f32.mrf.mxu1 }
 0x12f   : > { %1760 = vmatmul.f32.gmra.mxu3 %v5579_v30  ;;  %v1367_v30 = vld [vmem:[#allocation4 + $0x440] sm:$0xff] }
 0x130   : > { %1879 = vmatmul.f32.gmra.mxu0 %v5597_v0 }
 0x131   : > { %1992 = vmatmul.f32.gmra.mxu1 %v698_v59  ;;  %v1470_v48 = vpop.f32.mrf.mxu2  ;;  %2286 = vmatpush.msra.mxu0 %v1367_v30  ;;  %v572_v30 = vld [vmem:[#allocation2 + $0xc0] sm:$0xff] }
 0x132   : > { %v1583_v54 = vpop.f32.mrf.mxu3 }
 0x133   : > { %v5703_v61 = vadd.f32 %v1583_v54, %v1470_v48 }
 0x135   : > { %7356 = vst [vmem:[#allocation15_spill] sm:$0xff] %v5703_v61  ;;  %v5705_v37 = vpop.f32.mrf.mxu0 }
 0x136   : > { %1650 = vmatmul.f32.gmra.mxu2 %v695_v9  ;;  %v5714_v8 = vpop.f32.mrf.mxu1  ;;  %v1350_v9 = vld [vmem:[#allocation4 + $0x3b8] sm:$0xff] }
 0x137   : > { %1763 = vmatmul.f32.gmra.mxu3 %v5589_v45  ;;  %v1334_v45 = vld [vmem:[#allocation4 + $0x338] sm:$0xff] }
 0x138   : > { %1882 = vmatmul.f32.gmra.mxu0 %v5603_v18  ;;  %2061 = vmatpush.msra.mxu2 %v1334_v45  ;;  %v1349_v45 = vld [vmem:[#allocation4 + $0x3b0] sm:$0xff] }
 0x139   : > { %1995 = vmatmul.f32.gmra.mxu1 %v5707_v56  ;;  %v1473_v0 = vpop.f32.mrf.mxu2  ;;  %2174 = vmatpush.msra.mxu3 %v1350_v9 }
 0x13a   : > { %v1586_v53 = vpop.f32.mrf.mxu3 }
 0x13b   : > { %v5712_v46 = vadd.f32 %v1586_v53, %v1473_v0  ;;  %v638_v53 = vld [vmem:[#allocation2 + $0xd9] sm:$0xff]  ;;  %2175 = vmatpush.msra.mxu3 %v1349_v45 }
 0x13d   : > { %7357 = vst [vmem:[#allocation16_spill] sm:$0xff] %v5712_v46  ;;  %v5716_v5 = vpop.f32.mrf.mxu0 }
 0x13e   : > { %1653 = vmatmul.f32.gmra.mxu2 %v696_v10  ;;  %v5724_v4 = vpop.f32.mrf.mxu1  ;;  %v1366_v10 = vld [vmem:[#allocation4 + $0x438] sm:$0xff] }
 0x13f   : > { %1766 = vmatmul.f32.gmra.mxu3 %v5595_v63  ;;  %v3408_v63 = vld [vmem:[#allocation4 + $0x4f8] sm:$0xff]  ;;  %2287 = vmatpush.msra.mxu0 %v1366_v10 }
 0x140   : > { %1885 = vmatmul.f32.gmra.mxu0 %v636_v22  ;;  %3537 = vmatpush.msra.mxu1 %v3408_v63  ;;  %v5734_v22 = vld [vmem:[#allocation2 + $0xda] sm:$0xff] }
 0x141   : > { %1998 = vmatmul.f32.gmra.mxu1 %v5718_v23  ;;  %v1476_v18 = vpop.f32.mrf.mxu2  ;;  %v639_v10 = vld [vmem:[#allocation2 + $0xe1] sm:$0xff] }
 0x142   : > { %v1589_v55 = vpop.f32.mrf.mxu3 }
 0x143   : > { %v5722_v16 = vadd.f32 %v1589_v55, %v1476_v18 }
 0x145   : > { %7359 = vst [vmem:[#allocation18_spill] sm:$0xff] %v5722_v16  ;;  %v5726_v19 = vpop.f32.mrf.mxu0  ;;  %v575_v16 = vld [vmem:[#allocation2 + $0xe0] sm:$0xff] }
 0x146   : > { %1656 = vmatmul.f32.gmra.mxu2 %v697_v35  ;;  %v5736_v35 = vpop.f32.mrf.mxu1 }
 0x147   : > { %1769 = vmatmul.f32.gmra.mxu3 %v5601_v17  ;;  %v1333_v17 = vld [vmem:[#allocation4 + $0x330] sm:$0xff] }
 0x148   : > { %1888 = vmatmul.f32.gmra.mxu0 %v637_v31  ;;  %2062 = vmatpush.msra.mxu2 %v1333_v17  ;;  %v573_v31 = vld [vmem:[#allocation2 + $0xc8] sm:$0xff] }
 0x149   : > { %2001 = vmatmul.f32.gmra.mxu1 %v5728_v43  ;;  %v1479_v47 = vpop.f32.mrf.mxu2 }
 0x14a   : > { %v1592_v48 = vpop.f32.mrf.mxu3 }
 0x14b   : > { %v5732_v54 = vadd.f32 %v1592_v48, %v1479_v47  ;;  %v5741_v47 = vld [vmem:[#allocation2 + $0xe2] sm:$0xff] }
 0x14c   : > { %v3407_v48 = vld [vmem:[#allocation4 + $0x4f0] sm:$0xff] }
 0x14d   : > { %7361 = vst [vmem:[#allocation20_spill] sm:$0xff] %v5732_v54  ;;  %v1844_v0 = vpop.f32.mrf.mxu0  ;;  %3538 = vmatpush.msra.mxu1 %v3407_v48  ;;  %v5749_v54 = vld [vmem:[#allocation2 + $0xf2] sm:$0xff] }
 0x14e   : > { %1659 = vmatmul.f32.gmra.mxu2 %v698_v59  ;;  %v1957_v59 = vpop.f32.mrf.mxu1 }
 0x14f   : > { %1772 = vmatmul.f32.gmra.mxu3 %v572_v30  ;;  %v1365_v30 = vld [vmem:[#allocation4 + $0x430] sm:$0xff] }
 0x150   : > { %1891 = vmatmul.f32.gmra.mxu0 %v638_v53 }
 0x151   : > { %2004 = vmatmul.f32.gmra.mxu1 %v5734_v22  ;;  %v1482_v9 = vpop.f32.mrf.mxu2  ;;  %2288 = vmatpush.msra.mxu0 %v1365_v30  ;;  %v1348_v30 = vld [vmem:[#allocation4 + $0x3a8] sm:$0xff] }
 0x152   : > { %v1595_v18 = vpop.f32.mrf.mxu3  ;;  %2176 = vmatpush.msra.mxu3 %v1348_v30 }
 0x153   : > { %v5739_v55 = vadd.f32 %v1595_v18, %v1482_v9  ;;  %v574_v9 = vld [vmem:[#allocation2 + $0xd8] sm:$0xff] }
 0x155   : > { %7362 = vst [vmem:[#allocation21_spill] sm:$0xff] %v5739_v55  ;;  %v1847_v63 = vpop.f32.mrf.mxu0  ;;  %v640_v55 = vld [vmem:[#allocation2 + $0xf1] sm:$0xff] }
 0x156   : > { %1662 = vmatmul.f32.gmra.mxu2 %v5707_v56  ;;  %v1960_v48 = vpop.f32.mrf.mxu1 }
 0x157   : > { %1775 = vmatmul.f32.gmra.mxu3 %v573_v31  ;;  %v1332_v31 = vld [vmem:[#allocation4 + $0x328] sm:$0xff] }
 0x158   : > { %1894 = vmatmul.f32.gmra.mxu0 %v639_v10  ;;  %2063 = vmatpush.msra.mxu2 %v1332_v31  ;;  %v1506_v10 = vadd.f32 %v5609_v25, %v5607_v24  ;;  %v3406_v25 = vld [vmem:[#allocation4 + $0x4e8] sm:$0xff] }
 0x159   : > { %2007 = vmatmul.f32.gmra.mxu1 %v5741_v47  ;;  %v1485_v53 = vpop.f32.mrf.mxu2 }
 0x15a   : > { %v1598_v17 = vpop.f32.mrf.mxu3  ;;  %3539 = vmatpush.msra.mxu1 %v3406_v25 }
 0x15b   : > { %v5745_v45 = vadd.f32 %v1598_v17, %v1485_v53 }
 0x15d   : > { %7363 = vst [vmem:[#allocation22_spill] sm:$0xff] %v5745_v45  ;;  %v5747_v18 = vpop.f32.mrf.mxu0 }
 0x15e   : > { %1665 = vmatmul.f32.gmra.mxu2 %v5718_v23  ;;  %v641_v23 = vld [vmem:[#allocation2 + $0xf9] sm:$0xff] }
 0x15f   : > { %1778 = vmatmul.f32.gmra.mxu3 %v574_v9  ;;  %v5757_v9 = vld [vmem:[#allocation2 + $0xfa] sm:$0xff] }
 0x160   : > { %1897 = vmatmul.f32.gmra.mxu0 %v640_v55  ;;  %v1509_v55 = vadd.f32 %v5614_v40, %v5612_v39  ;;  %v1331_v40 = vld [vmem:[#allocation4 + $0x320] sm:$0xff] }
 0x161   : > { %2010 = vmatmul.f32.gmra.mxu1 %v5749_v54  ;;  %v1618_v53 = vpop.f32.mrf.mxu2  ;;  %2064 = vmatpush.msra.mxu2 %v1331_v40 }
 0x162   : > { %v1731_v17 = vpop.f32.mrf.mxu3  ;;  %v1619_v45 = vadd.f32 %v1618_v53, %v1506_v10 }
 0x164   : > { %v1732_v46 = vadd.f32 %v1731_v17, %v1619_v45  ;;  %v1364_v45 = vld [vmem:[#allocation4 + $0x428] sm:$0xff]  ;;  %v1963_v17 = vpop.f32.mrf.mxu1 }
 0x165   : > { %v5755_v61 = vpop.f32.mrf.mxu0  ;;  %2289 = vmatpush.msra.mxu0 %v1364_v45 }
 0x166   : > { %1668 = vmatmul.f32.gmra.mxu2 %v5728_v43  ;;  %v1845_v24 = vadd.f32 %v1844_v0, %v1732_v46  ;;  %v642_v46 = vld [vmem:[#allocation2 + $0x109] sm:$0xff] }
 0x167   : > { %1781 = vmatmul.f32.gmra.mxu3 %v575_v16  ;;  %v5767_v0 = vld [vmem:[#allocation2 + $0x10a] sm:$0xff] }
 0x168   : > { %v5762_v31 = vadd.f32 %v1957_v59, %v1845_v24  ;;  %1900 = vmatmul.f32.gmra.mxu0 %v641_v23  ;;  %v1512_v23 = vadd.f32 %v5619_v49, %v5617_v44  ;;  %v1347_v24 = vld [vmem:[#allocation4 + $0x3a0] sm:$0xff] }
 0x169   : > { %2013 = vmatmul.f32.gmra.mxu1 %v5757_v9  ;;  %v1621_v10 = vpop.f32.mrf.mxu2  ;;  %2177 = vmatpush.msra.mxu3 %v1347_v24  ;;  %v3405_v49 = vld [vmem:[#allocation4 + $0x4e0] sm:$0xff] }
 0x16a   : > { %v1734_v30 = vpop.f32.mrf.mxu3  ;;  %v1622_v53 = vadd.f32 %v1621_v10, %v1509_v55  ;;  %v577_v10 = vld [vmem:[#allocation2 + $0xf8] sm:$0xff]  ;;  %3540 = vmatpush.msra.mxu1 %v3405_v49 }
 0x16c   : > { %v1735_v43 = vadd.f32 %v1734_v30, %v1622_v53  ;;  %v1966_v53 = vpop.f32.mrf.mxu1 }
 0x16d   : > { %v5765_v16 = vpop.f32.mrf.mxu0 }
 0x16e   : > { %1671 = vmatmul.f32.gmra.mxu2 %v5734_v22  ;;  %v1848_v39 = vadd.f32 %v1847_v63, %v1735_v43  ;;  %v643_v43 = vld [vmem:[#allocation2 + $0x111] sm:$0xff] }
 0x16f   : > { %1784 = vmatmul.f32.gmra.mxu3 %v576_v38  ;;  %v5777_v63 = vld [vmem:[#allocation2 + $0x112] sm:$0xff] }
 0x170   : > { %v5772_v59 = vadd.f32 %v1960_v48, %v1848_v39  ;;  %1903 = vmatmul.f32.gmra.mxu0 %v642_v46  ;;  %v1515_v48 = vadd.f32 %v5627_v60, %v5625_v57  ;;  %v1363_v39 = vld [vmem:[#allocation4 + $0x420] sm:$0xff] }
 0x171   : > { %2016 = vmatmul.f32.gmra.mxu1 %v5767_v0  ;;  %v1624_v25 = vpop.f32.mrf.mxu2  ;;  %2290 = vmatpush.msra.mxu0 %v1363_v39 }
 0x172   : > { %v1737_v55 = vpop.f32.mrf.mxu3  ;;  %v1625_v45 = vadd.f32 %v1624_v25, %v1512_v23  ;;  %v578_v25 = vld [vmem:[#allocation2 + $0x108] sm:$0xff] }
 0x174   : > { %v1738_v30 = vadd.f32 %v1737_v55, %v1625_v45  ;;  %v1969_v60 = vpop.f32.mrf.mxu1 }
 0x175   : > { %v5775_v38 = vpop.f32.mrf.mxu0 }
 0x176   : > { %1674 = vmatmul.f32.gmra.mxu2 %v5741_v47  ;;  %v1851_v44 = vadd.f32 %v5747_v18, %v1738_v30  ;;  %v644_v18 = vld [vmem:[#allocation2 + $0x121] sm:$0xff]  ;;  %v1518_v30 = vadd.f32 %v5635_v7, %v5633_v6 }
 0x177   : > { %1787 = vmatmul.f32.gmra.mxu3 %v577_v10  ;;  %v5788_v10 = vld [vmem:[#allocation2 + $0x122] sm:$0xff] }
 0x178   : > { %v5783_v46 = vadd.f32 %v1963_v17, %v1851_v44  ;;  %1906 = vmatmul.f32.gmra.mxu0 %v643_v43  ;;  %v1330_v17 = vld [vmem:[#allocation4 + $0x318] sm:$0xff] }
 0x179   : > { %2019 = vmatmul.f32.gmra.mxu1 %v5777_v63  ;;  %v1627_v40 = vpop.f32.mrf.mxu2  ;;  %2065 = vmatpush.msra.mxu2 %v1330_v17  ;;  %v1346_v44 = vld [vmem:[#allocation4 + $0x398] sm:$0xff] }
 0x17a   : > { %v1740_v23 = vpop.f32.mrf.mxu3  ;;  %v1628_v24 = vadd.f32 %v1627_v40, %v1515_v48  ;;  %2178 = vmatpush.msra.mxu3 %v1346_v44  ;;  %v579_v40 = vld [vmem:[#allocation2 + $0x110] sm:$0xff]  ;;  %v3404_v7 = vld [vmem:[#allocation4 + $0x4d8] sm:$0xff] }
 0x17b   : > { %3541 = vmatpush.msra.mxu1 %v3404_v7 }
 0x17c   : > { %v1741_v55 = vadd.f32 %v1740_v23, %v1628_v24 }
 0x17d   : > { %v5786_v45 = vpop.f32.mrf.mxu0 }
 0x17e   : > { %1677 = vmatmul.f32.gmra.mxu2 %v5749_v54  ;;  %v1854_v57 = vadd.f32 %v5755_v61, %v1741_v55  ;;  %v645_v61 = vld [vmem:[#allocation2 + $0x129] sm:$0xff] }
 0x17f   : > { %1790 = vmatmul.f32.gmra.mxu3 %v578_v25  ;;  %v5799_v25 = vld [vmem:[#allocation2 + $0x12a] sm:$0xff] }
 0x180   : > { %v5794_v43 = vadd.f32 %v1966_v53, %v1854_v57  ;;  %1909 = vmatmul.f32.gmra.mxu0 %v644_v18  ;;  %v1521_v53 = vadd.f32 %v5643_v21, %v5641_v14  ;;  %v1972_v18 = vpop.f32.mrf.mxu1  ;;  %v1362_v57 = vld [vmem:[#allocation4 + $0x418] sm:$0xff]  ;;  %v1329_v21 = vld [vmem:[#allocation4 + $0x310] sm:$0xff] }
 0x181   : > { %2022 = vmatmul.f32.gmra.mxu1 %v5788_v10  ;;  %v1630_v49 = vpop.f32.mrf.mxu2  ;;  %2291 = vmatpush.msra.mxu0 %v1362_v57  ;;  %v581_v57 = vld [vmem:[#allocation2 + $0x128] sm:$0xff] }
 0x182   : > { %v1743_v48 = vpop.f32.mrf.mxu3  ;;  %v1631_v39 = vadd.f32 %v1630_v49, %v1518_v30  ;;  %v580_v49 = vld [vmem:[#allocation2 + $0x120] sm:$0xff]  ;;  %2066 = vmatpush.msra.mxu2 %v1329_v21 }
 0x184   : > { %v1744_v23 = vadd.f32 %v1743_v48, %v1631_v39 }
 0x185   : > { %v5797_v24 = vpop.f32.mrf.mxu0 }
 0x186   : > { %1680 = vmatmul.f32.gmra.mxu2 %v5757_v9  ;;  %v1857_v6 = vadd.f32 %v5765_v16, %v1744_v23  ;;  %v646_v16 = vld [vmem:[#allocation2 + $0x139] sm:$0xff] }
 0x187   : > { %1793 = vmatmul.f32.gmra.mxu3 %v579_v40  ;;  %v5810_v40 = vld [vmem:[#allocation2 + $0x13a] sm:$0xff] }
 0x188   : > { %v5805_v55 = vadd.f32 %v1969_v60, %v1857_v6  ;;  %1912 = vmatmul.f32.gmra.mxu0 %v645_v61  ;;  %v1524_v60 = vadd.f32 %v5651_v32, %v5649_v27  ;;  %v1345_v61 = vld [vmem:[#allocation4 + $0x390] sm:$0xff] }
 0x189   : > { %2025 = vmatmul.f32.gmra.mxu1 %v5799_v25  ;;  %v1633_v17 = vpop.f32.mrf.mxu2  ;;  %2179 = vmatpush.msra.mxu3 %v1345_v61  ;;  %v3403_v32 = vld [vmem:[#allocation4 + $0x4d0] sm:$0xff]  ;;  %v582_v61 = vld [vmem:[#allocation2 + $0x138] sm:$0xff] }
 0x18a   : > { %v1746_v30 = vpop.f32.mrf.mxu3  ;;  %v1634_v44 = vadd.f32 %v1633_v17, %v1521_v53  ;;  %v1975_v17 = vpop.f32.mrf.mxu1  ;;  %3542 = vmatpush.msra.mxu1 %v3403_v32 }
 0x18c   : > { %v1747_v48 = vadd.f32 %v1746_v30, %v1634_v44 }
 0x18d   : > { %v5808_v39 = vpop.f32.mrf.mxu0 }
 0x18e   : > { %1683 = vmatmul.f32.gmra.mxu2 %v5767_v0  ;;  %v1860_v14 = vadd.f32 %v5775_v38, %v1747_v48  ;;  %v647_v38 = vld [vmem:[#allocation2 + $0x141] sm:$0xff] }
 0x18f   : > { %1796 = vmatmul.f32.gmra.mxu3 %v580_v49  ;;  %v5821_v49 = vld [vmem:[#allocation2 + $0x142] sm:$0xff] }
 0x190   : > { %v5816_v23 = vadd.f32 %v1972_v18, %v1860_v14  ;;  %1915 = vmatmul.f32.gmra.mxu0 %v646_v16  ;;  %v1527_v18 = vadd.f32 %v5659_v42, %v5657_v41  ;;  %v1361_v16 = vld [vmem:[#allocation4 + $0x410] sm:$0xff]  ;;  %v1328_v42 = vld [vmem:[#allocation4 + $0x308] sm:$0xff] }
 0x191   : > { %2028 = vmatmul.f32.gmra.mxu1 %v5810_v40  ;;  %v1636_v6 = vpop.f32.mrf.mxu2  ;;  %2292 = vmatpush.msra.mxu0 %v1361_v16  ;;  %v583_v16 = vld [vmem:[#allocation2 + $0x140] sm:$0xff] }
 0x192   : > { %v1749_v7 = vpop.f32.mrf.mxu3  ;;  %v1637_v53 = vadd.f32 %v1636_v6, %v1524_v60  ;;  %2067 = vmatpush.msra.mxu2 %v1328_v42 }
 0x194   : > { %v1750_v30 = vadd.f32 %v1749_v7, %v1637_v53  ;;  %v1978_v7 = vpop.f32.mrf.mxu1 }
 0x195   : > { %v5819_v44 = vpop.f32.mrf.mxu0 }
 0x196   : > { %1686 = vmatmul.f32.gmra.mxu2 %v5777_v63  ;;  %v1863_v27 = vadd.f32 %v5786_v45, %v1750_v30  ;;  %v648_v45 = vld [vmem:[#allocation2 + $0x151] sm:$0xff] }
 0x197   : > { %1799 = vmatmul.f32.gmra.mxu3 %v581_v57  ;;  %v5832_v57 = vld [vmem:[#allocation2 + $0x152] sm:$0xff] }
 0x198   : > { %v5827_v48 = vadd.f32 %v1975_v17, %v1863_v27  ;;  %1918 = vmatmul.f32.gmra.mxu0 %v647_v38  ;;  %v1530_v17 = vadd.f32 %v5667_v52, %v5665_v51  ;;  %v1344_v38 = vld [vmem:[#allocation4 + $0x388] sm:$0xff] }
 0x199   : > { %2031 = vmatmul.f32.gmra.mxu1 %v5821_v49  ;;  %v1639_v14 = vpop.f32.mrf.mxu2  ;;  %2180 = vmatpush.msra.mxu3 %v1344_v38  ;;  %v3402_v52 = vld [vmem:[#allocation4 + $0x4c8] sm:$0xff] }
 0x19a   : > { %v1752_v21 = vpop.f32.mrf.mxu3  ;;  %v1640_v60 = vadd.f32 %v1639_v14, %v1527_v18  ;;  %3543 = vmatpush.msra.mxu1 %v3402_v52 }
 0x19c   : > { %v1753_v6 = vadd.f32 %v1752_v21, %v1640_v60  ;;  %v5843_v60 = vld [vmem:[#allocation2 + $0x15a] sm:$0xff] }
 0x19d   : > { %v5830_v53 = vpop.f32.mrf.mxu0 }
 0x19e   : > { %1689 = vmatmul.f32.gmra.mxu2 %v5788_v10  ;;  %v1866_v41 = vadd.f32 %v5797_v24, %v1753_v6  ;;  %v649_v24 = vld [vmem:[#allocation2 + $0x159] sm:$0xff]  ;;  %v1533_v6 = vadd.f32 %v5675_v62, %v5673_v11  ;;  %v1327_v62 = vld [vmem:[#allocation4 + $0x300] sm:$0xff] }
 0x19f   : > { %1802 = vmatmul.f32.gmra.mxu3 %v582_v61  ;;  %v330_v61 = vld [vmem:[%s5456_s9 + $0xf0] sm:$0xff]  ;;  %2068 = vmatpush.msra.mxu2 %v1327_v62 }
 0x1a0   : > { %v5838_v30 = vadd.f32 %v1978_v7, %v1866_v41  ;;  %1921 = vmatmul.f32.gmra.mxu0 %v648_v45  ;;  %364 = vst.msk [vmem:[#allocation2 + $0x181] sm:$0xff] %vm333_vm0, %v330_v61  ;;  %v1360_v7 = vld [vmem:[#allocation4 + $0x408] sm:$0xff] }
 0x1a1   : > { %2034 = vmatmul.f32.gmra.mxu1 %v5832_v57  ;;  %v1642_v27 = vpop.f32.mrf.mxu2  ;;  %2293 = vmatpush.msra.mxu0 %v1360_v7 }
 0x1a2   : > { %v1755_v32 = vpop.f32.mrf.mxu3  ;;  %v1643_v18 = vadd.f32 %v1642_v27, %v1530_v17  ;;  %v584_v17 = vld [vmem:[#allocation2 + $0x150] sm:$0xff] }
 0x1a3   : > { %v650_v27 = vld [vmem:[#allocation2 + $0x169] sm:$0xff] }
 0x1a4   : > { %v1756_v14 = vadd.f32 %v1755_v32, %v1643_v18  ;;  %v5854_v32 = vld [vmem:[#allocation2 + $0x16a] sm:$0xff] }
 0x1a5   : > { %v5841_v21 = vpop.f32.mrf.mxu0  ;;  %v331_v18 = vld [vmem:[%s5456_s9 + $0xf8] sm:$0xff] }
 0x1a6   : > { %1692 = vmatmul.f32.gmra.mxu2 %v5799_v25  ;;  %v5848_v51 = vadd.f32 %v5808_v39, %v1756_v14  ;;  %365 = vst.msk [vmem:[#allocation2 + $0x189] sm:$0xff] %vm333_vm0, %v331_v18  ;;  %v1343_v14 = vld [vmem:[#allocation4 + $0x380] sm:$0xff]  ;;  %v586_v18 = vld [vmem:[#allocation2 + $0x168] sm:$0xff] }
 0x1a7   : > { %1805 = vmatmul.f32.gmra.mxu3 %v583_v16  ;;  %v1536_v16 = vadd.f32 %v5683_v20, %v5681_v1  ;;  %v3401_v1 = vld [vmem:[#allocation4 + $0x4c0] sm:$0xff]  ;;  %v1539_v20 = vadd.f32 %v5692_v33, %v5689_v34  ;;  %v1542_v34 = vadd.f32 %v5701_v15, %v5697_v28  ;;  %v1545_v28 = vadd.f32 %v5714_v8, %v5705_v37 }
 0x1a8   : > { %1924 = vmatmul.f32.gmra.mxu0 %v649_v24  ;;  %2181 = vmatpush.msra.mxu3 %v1343_v14 }
 0x1a9   : > { %2037 = vmatmul.f32.gmra.mxu1 %v5843_v60  ;;  %v1645_v45 = vpop.f32.mrf.mxu2 }
 0x1aa   : > { %v1758_v41 = vpop.f32.mrf.mxu3  ;;  %v1646_v42 = vadd.f32 %v1645_v45, %v1533_v6  ;;  %v715_v45 = vld [vmem:[#allocation2 + $0x172] sm:$0xff]  ;;  %3544 = vmatpush.msra.mxu1 %v3401_v1 }
 0x1ac   : > { %v1759_v38 = vadd.f32 %v1758_v41, %v1646_v42  ;;  %v1359_v42 = vld [vmem:[#allocation4 + $0x400] sm:$0xff] }
 0x1ad   : > { %v1880_v39 = vpop.f32.mrf.mxu0  ;;  %2294 = vmatpush.msra.mxu0 %v1359_v42  ;;  %v716_v14 = vld [vmem:[#allocation2 + $0x182] sm:$0xff]  ;;  %v717_v1 = vld [vmem:[#allocation2 + $0x18a] sm:$0xff] }
 0x1ae   : > { %1695 = vmatmul.f32.gmra.mxu2 %v5810_v40  ;;  %v5859_v11 = vadd.f32 %v5819_v44, %v1759_v38  ;;  %v585_v40 = vld [vmem:[#allocation2 + $0x158] sm:$0xff] }
 0x1af   : > { %1808 = vmatmul.f32.gmra.mxu3 %v584_v17  ;;  %v651_v44 = vld [vmem:[#allocation2 + $0x171] sm:$0xff] }
 0x1b0   : > { %1927 = vmatmul.f32.gmra.mxu0 %v650_v27 }
 0x1b1   : > { %2040 = vmatmul.f32.gmra.mxu1 %v5854_v32  ;;  %v1648_v24 = vpop.f32.mrf.mxu2 }
 0x1b2   : > { %v1761_v61 = vpop.f32.mrf.mxu3  ;;  %v1649_v52 = vadd.f32 %v1648_v24, %v1536_v16 }
 0x1b4   : > { %v1762_v6 = vadd.f32 %v1761_v61, %v1649_v52  ;;  %v587_v52 = vld [vmem:[#allocation2 + $0x170] sm:$0xff] }
 0x1b5   : > { %v1883_v7 = vpop.f32.mrf.mxu0 }
 0x1b6   : > { %1698 = vmatmul.f32.gmra.mxu2 %v5821_v49  ;;  %v5867_v41 = vadd.f32 %v5830_v53, %v1762_v6  ;;  %v652_v49 = vld [vmem:[#allocation2 + $0x181] sm:$0xff] }
 0x1b7   : > { %1811 = vmatmul.f32.gmra.mxu3 %v585_v40 }
 0x1b8   : > { %1930 = vmatmul.f32.gmra.mxu0 %v651_v44  ;;  %v653_v44 = vld [vmem:[#allocation2 + $0x189] sm:$0xff] }
 0x1b9   : > { %2043 = vmatmul.f32.gmra.mxu1 %v715_v45  ;;  %v1651_v17 = vpop.f32.mrf.mxu2 }
 0x1ba   : > { %v1764_v38 = vpop.f32.mrf.mxu3  ;;  %v1652_v27 = vadd.f32 %v1651_v17, %v1539_v20  ;;  %v588_v17 = vld [vmem:[#allocation2 + $0x180] sm:$0xff] }
 0x1bc   : > { %v1765_v62 = vadd.f32 %v1764_v38, %v1652_v27 }
 0x1bd   : > { %v1886_v16 = vpop.f32.mrf.mxu0 }
 0x1be   : > { %1701 = vmatmul.f32.gmra.mxu2 %v5832_v57  ;;  %v5873_v53 = vadd.f32 %v5841_v21, %v1765_v62  ;;  %v3400_v21 = vld [vmem:[#allocation4 + $0x4b8] sm:$0xff] }
 0x1bf   : > { %1814 = vmatmul.f32.gmra.mxu3 %v586_v18  ;;  %3545 = vmatpush.msra.mxu1 %v3400_v21  ;;  %v879_v18 = vld [vmem:[#allocation2 + $0x32] sm:$0xff]  ;;  %v881_v21 = vld [vmem:[#allocation2 + $0x4a] sm:$0xff] }
 0x1c0   : > { %1933 = vmatmul.f32.gmra.mxu0 %v652_v49  ;;  %v589_v49 = vld [vmem:[#allocation2 + $0x188] sm:$0xff] }
 0x1c1   : > { %2046 = vmatmul.f32.gmra.mxu1 %v716_v14  ;;  %v1654_v33 = vpop.f32.mrf.mxu2 }
 0x1c2   : > { %v1767_v24 = vpop.f32.mrf.mxu3  ;;  %v1655_v61 = vadd.f32 %v1654_v33, %v1542_v34  ;;  %v880_v33 = vld [vmem:[#allocation2 + $0x3a] sm:$0xff] }
 0x1c4   : > { %v1768_v40 = vadd.f32 %v1767_v24, %v1655_v61  ;;  %v3399_v61 = vld [vmem:[#allocation4 + $0x4b0] sm:$0xff] }
 0x1c5   : > { %v1889_v6 = vpop.f32.mrf.mxu0  ;;  %3546 = vmatpush.msra.mxu1 %v3399_v61 }
 0x1c6   : > { %1704 = vmatmul.f32.gmra.mxu2 %v5843_v60  ;;  %v5878_v57 = vadd.f32 %v1880_v39, %v1768_v40  ;;  %v1548_v39 = vadd.f32 %v5724_v4, %v5716_v5  ;;  %v815_v40 = vld [vmem:[#allocation2 + $0x31] sm:$0xff] }
 0x1c7   : > { %1817 = vmatmul.f32.gmra.mxu3 %v587_v52  ;;  %v751_v52 = vld [vmem:[#allocation2 + $0x30] sm:$0xff] }
 0x1c8   : > { %1936 = vmatmul.f32.gmra.mxu0 %v653_v44 }
 0x1c9   : > { %2049 = vmatmul.f32.gmra.mxu1 %v717_v1  ;;  %v1657_v15 = vpop.f32.mrf.mxu2 }
 0x1ca   : > { %v1770_v20 = vpop.f32.mrf.mxu3  ;;  %v1658_v42 = vadd.f32 %v1657_v15, %v1545_v28 }
 0x1cc   : > { %v1771_v38 = vadd.f32 %v1770_v20, %v1658_v42  ;;  %v752_v20 = vld [vmem:[#allocation2 + $0x38] sm:$0xff] }
 0x1cd   : > { %v1892_v27 = vpop.f32.mrf.mxu0 }
 0x1ce   : > { %1707 = vmatmul.f32.gmra.mxu2 %v5854_v32  ;;  %v5883_v60 = vadd.f32 %v1883_v7, %v1771_v38  ;;  %v1551_v32 = vadd.f32 %v5736_v35, %v5726_v19  ;;  %v816_v19 = vld [vmem:[#allocation2 + $0x39] sm:$0xff] }
 0x1cf   : > { %1820 = vmatmul.f32.gmra.mxu3 %v588_v17  ;;  %v882_v17 = vld [vmem:[#allocation2 + $0x52] sm:$0xff] }
 0x1d0   : > { %2295 = vmatmul.f32.vlgmr.msra.gmra.mxu0 %v879_v18  ;;  %v3398_v18 = vld [vmem:[#allocation4 + $0x4a8] sm:$0xff] }
 0x1d1   : > { %v1660_v62 = vpop.f32.mrf.mxu2  ;;  %3547 = vmatpush.msra.mxu1 %v3398_v18 }
 0x1d2   : > { %v1773_v37 = vpop.f32.mrf.mxu3  ;;  %v1661_v8 = vadd.f32 %v1660_v62, %v1548_v39 }
 0x1d4   : > { %v1774_v14 = vadd.f32 %v1773_v37, %v1661_v8  ;;  %v753_v37 = vld [vmem:[#allocation2 + $0x48] sm:$0xff] }
 0x1d5   : > { %v1895_v34 = vpop.f32.mrf.mxu0  ;;  %v817_v8 = vld [vmem:[#allocation2 + $0x49] sm:$0xff] }
 0x1d6   : > { %1710 = vmatmul.f32.gmra.mxu2 %v715_v45  ;;  %v5887_v24 = vadd.f32 %v1886_v16, %v1774_v14  ;;  %v883_v14 = vld [vmem:[#allocation2 + $0x62] sm:$0xff] }
 0x1d7   : > { %1823 = vmatmul.f32.gmra.mxu3 %v589_v49 }
 0x1d8   : > { %2298 = vmatmul.f32.gmra.mxu0 %v880_v33 }
 0x1d9   : > { %v1663_v7 = vpop.f32.mrf.mxu2 }
 0x1da   : > { %v1776_v5 = vpop.f32.mrf.mxu3  ;;  %v1664_v4 = vadd.f32 %v1663_v7, %v1551_v32  ;;  %v5899_v32 = vpop.f32.mrf.mxu1 }
 0x1dc   : > { %v1777_v44 = vadd.f32 %v1776_v5, %v1664_v4  ;;  %v754_v5 = vld [vmem:[#allocation2 + $0x50] sm:$0xff] }
 0x1dd   : > { %v1898_v1 = vpop.f32.mrf.mxu0  ;;  %v818_v4 = vld [vmem:[#allocation2 + $0x51] sm:$0xff] }
 0x1de   : > { %2069 = vmatmul.f32.vlgmr.msra.gmra.mxu2 %v751_v52  ;;  %v5891_v45 = vadd.f32 %v1889_v6, %v1777_v44 }
 0x1df   : > { %2182 = vmatmul.f32.vlgmr.msra.gmra.mxu3 %v815_v40  ;;  %v884_v40 = vld [vmem:[#allocation2 + $0x6a] sm:$0xff] }
 0x1e0   : > { %2301 = vmatmul.f32.gmra.mxu0 %v881_v21  ;;  %v3397_v21 = vld [vmem:[#allocation4 + $0x4a0] sm:$0xff] }
 0x1e1   : > { %v1666_v16 = vpop.f32.mrf.mxu2  ;;  %3548 = vmatpush.msra.mxu1 %v3397_v21  ;;  %v887_v21 = vld [vmem:[#allocation2 + $0x92] sm:$0xff] }
 0x1e2   : > { %v1779_v28 = vpop.f32.mrf.mxu3  ;;  %v1667_v15 = vadd.f32 %v1666_v16, %v5623_v2 }
 0x1e4   : > { %v1780_v35 = vadd.f32 %v1779_v28, %v1667_v15  ;;  %v755_v15 = vld [vmem:[#allocation2 + $0x60] sm:$0xff] }
 0x1e5   : > { %v1901_v42 = vpop.f32.mrf.mxu0 }
 0x1e6   : > { %2072 = vmatmul.f32.gmra.mxu2 %v752_v20  ;;  %v5894_v38 = vadd.f32 %v1892_v27, %v1780_v35  ;;  %v819_v20 = vld [vmem:[#allocation2 + $0x61] sm:$0xff] }
 0x1e7   : > { %2185 = vmatmul.f32.gmra.mxu3 %v816_v19  ;;  %v5905_v19 = vpop.f32.mrf.mxu1 }
 0x1e8   : > { %2304 = vmatmul.f32.gmra.mxu0 %v882_v17  ;;  %v885_v17 = vld [vmem:[#allocation2 + $0x7a] sm:$0xff] }
 0x1e9   : > { %v1669_v39 = vpop.f32.mrf.mxu2 }
 0x1ea   : > { %v1782_v6 = vpop.f32.mrf.mxu3  ;;  %v1670_v62 = vadd.f32 %v1669_v39, %v5631_v3 }
 0x1ec   : > { %v1783_v49 = vadd.f32 %v1782_v6, %v1670_v62  ;;  %v756_v62 = vld [vmem:[#allocation2 + $0x68] sm:$0xff] }
 0x1ed   : > { %v1904_v2 = vpop.f32.mrf.mxu0 }
 0x1ee   : > { %2075 = vmatmul.f32.gmra.mxu2 %v753_v37  ;;  %v5897_v33 = vadd.f32 %v1895_v34, %v1783_v49  ;;  %v820_v37 = vld [vmem:[#allocation2 + $0x69] sm:$0xff] }
 0x1ef   : > { %2188 = vmatmul.f32.gmra.mxu3 %v817_v8  ;;  %v886_v49 = vld [vmem:[#allocation2 + $0x82] sm:$0xff] }
 0x1f0   : > { %2307 = vmatmul.f32.gmra.mxu0 %v883_v14  ;;  %v5910_v14 = vpop.f32.mrf.mxu1 }
 0x1f1   : > { %v1672_v61 = vpop.f32.mrf.mxu2 }
 0x1f2   : > { %v1785_v27 = vpop.f32.mrf.mxu3  ;;  %v1673_v7 = vadd.f32 %v1672_v61, %v5639_v13 }
 0x1f4   : > { %v1786_v52 = vadd.f32 %v1785_v27, %v1673_v7  ;;  %v3396_v27 = vld [vmem:[#allocation4 + $0x498] sm:$0xff] }
 0x1f5   : > { %v1907_v3 = vpop.f32.mrf.mxu0  ;;  %3549 = vmatpush.msra.mxu1 %v3396_v27 }
 0x1f6   : > { %2078 = vmatmul.f32.gmra.mxu2 %v754_v5  ;;  %v5902_v44 = vadd.f32 %v1898_v1, %v1786_v52 }
 0x1f7   : > { %2191 = vmatmul.f32.gmra.mxu3 %v818_v4  ;;  %v757_v4 = vld [vmem:[#allocation2 + $0x78] sm:$0xff] }
 0x1f8   : > { %2310 = vmatmul.f32.gmra.mxu0 %v884_v40 }
 0x1f9   : > { %v1675_v34 = vpop.f32.mrf.mxu2 }
 0x1fa   : > { %v1788_v16 = vpop.f32.mrf.mxu3  ;;  %v1676_v28 = vadd.f32 %v1675_v34, %v5647_v26 }
 0x1fc   : > { %v1789_v13 = vadd.f32 %v1788_v16, %v1676_v28  ;;  %v5917_v16 = vpop.f32.mrf.mxu1 }
 0x1fd   : > { %v1910_v35 = vpop.f32.mrf.mxu0 }
 0x1fe   : > { %2081 = vmatmul.f32.gmra.mxu2 %v755_v15  ;;  %v5907_v18 = vadd.f32 %v1901_v42, %v1789_v13  ;;  %v822_v13 = vld [vmem:[#allocation2 + $0x81] sm:$0xff] }
 0x1ff   : > { %2194 = vmatmul.f32.gmra.mxu3 %v819_v20  ;;  %v758_v20 = vld [vmem:[#allocation2 + $0x80] sm:$0xff] }
 0x200   : > { %2313 = vmatmul.f32.gmra.mxu0 %v885_v17 }
 0x201   : > { %v1678_v1 = vpop.f32.mrf.mxu2 }
 0x202   : > { %v1791_v39 = vpop.f32.mrf.mxu3  ;;  %v1679_v6 = vadd.f32 %v1678_v1, %v5655_v36  ;;  %v821_v36 = vld [vmem:[#allocation2 + $0x79] sm:$0xff] }
 0x203   : > { %v888_v1 = vld [vmem:[#allocation2 + $0x9a] sm:$0xff] }
 0x204   : > { %v1792_v8 = vadd.f32 %v1791_v39, %v1679_v6  ;;  %v3395_v6 = vld [vmem:[#allocation4 + $0x490] sm:$0xff] }
 0x205   : > { %v1913_v26 = vpop.f32.mrf.mxu0  ;;  %3550 = vmatpush.msra.mxu1 %v3395_v6  ;;  %v761_v6 = vld [vmem:[#allocation2 + $0xa8] sm:$0xff] }
 0x206   : > { %2084 = vmatmul.f32.gmra.mxu2 %v756_v62  ;;  %v5912_v61 = vadd.f32 %v1904_v2, %v1792_v8 }
 0x207   : > { %2197 = vmatmul.f32.gmra.mxu3 %v820_v37  ;;  %v5922_v37 = vpop.f32.mrf.mxu1 }
 0x208   : > { %2316 = vmatmul.f32.gmra.mxu0 %v886_v49  ;;  %v759_v49 = vld [vmem:[#allocation2 + $0x90] sm:$0xff] }
 0x209   : > { %v1681_v42 = vpop.f32.mrf.mxu2 }
 0x20a   : > { %v1794_v7 = vpop.f32.mrf.mxu3  ;;  %v1682_v5 = vadd.f32 %v1681_v42, %v5663_v50 }
 0x20c   : > { %v1795_v52 = vadd.f32 %v1794_v7, %v1682_v5  ;;  %v889_v7 = vld [vmem:[#allocation2 + $0xaa] sm:$0xff] }
 0x20d   : > { %v1916_v40 = vpop.f32.mrf.mxu0 }
 0x20e   : > { %2087 = vmatmul.f32.gmra.mxu2 %v757_v4  ;;  %v5915_v34 = vadd.f32 %v1907_v3, %v1795_v52  ;;  %v760_v52 = vld [vmem:[#allocation2 + $0x98] sm:$0xff] }
 0x20f   : > { %2200 = vmatmul.f32.gmra.mxu3 %v821_v36 }
 0x210   : > { %2319 = vmatmul.f32.gmra.mxu0 %v887_v21  ;;  %v824_v21 = vld [vmem:[#allocation2 + $0x99] sm:$0xff] }
 0x211   : > { %v1684_v2 = vpop.f32.mrf.mxu2 }
 0x212   : > { %v1797_v28 = vpop.f32.mrf.mxu3  ;;  %v1685_v15 = vadd.f32 %v1684_v2, %v5671_v58  ;;  %v823_v58 = vld [vmem:[#allocation2 + $0x91] sm:$0xff]  ;;  %v5928_v2 = vpop.f32.mrf.mxu1 }
 0x214   : > { %v1798_v17 = vadd.f32 %v1797_v28, %v1685_v15 }
 0x215   : > { %v1919_v50 = vpop.f32.mrf.mxu0 }
 0x216   : > { %2090 = vmatmul.f32.gmra.mxu2 %v758_v20  ;;  %v5920_v39 = vadd.f32 %v1910_v35, %v1798_v17  ;;  %v3394_v20 = vld [vmem:[#allocation4 + $0x488] sm:$0xff] }
 0x217   : > { %2203 = vmatmul.f32.gmra.mxu3 %v822_v13  ;;  %3551 = vmatpush.msra.mxu1 %v3394_v20  ;;  %v7366_v17 = vld [vmem:[#allocation14_spill] sm:$0xff] }
 0x218   : > { %2322 = vmatmul.f32.gmra.mxu0 %v888_v1 }
 0x219   : > { %v1687_v3 = vpop.f32.mrf.mxu2 }
 0x21a   : > { %v1800_v62 = vpop.f32.mrf.mxu3  ;;  %v1688_v8 = vadd.f32 %v1687_v3, %v5679_v12 }
 0x21c   : > { %v1801_v27 = vadd.f32 %v1800_v62, %v1688_v8  ;;  %v5934_v8 = vpop.f32.mrf.mxu1 }
 0x21d   : > { %v1922_v42 = vpop.f32.mrf.mxu0 }
 0x21e   : > { %2093 = vmatmul.f32.gmra.mxu2 %v759_v49  ;;  %v5925_v5 = vadd.f32 %v1913_v26, %v1801_v27 }
 0x21f   : > { %2206 = vmatmul.f32.gmra.mxu3 %v823_v58 }
 0x220   : > { %7364 = vst [vmem:[#allocation23_spill] sm:$0xff] %v5925_v5  ;;  %2325 = vmatmul.f32.gmra.mxu0 %v889_v7  ;;  %v7369_v7 = vld [vmem:[#allocation15_spill] sm:$0xff] }
 0x221   : > { %v1690_v35 = vpop.f32.mrf.mxu2 }
 0x222   : > { %v1803_v4 = vpop.f32.mrf.mxu3  ;;  %v1691_v36 = vadd.f32 %v1690_v35, %v5687_v29  ;;  %v825_v29 = vld [vmem:[#allocation2 + $0xa9] sm:$0xff] }
 0x223   : > { %v762_v35 = vld [vmem:[#allocation2 + $0xb0] sm:$0xff] }
 0x224   : > { %v1804_v28 = vadd.f32 %v1803_v4, %v1691_v36  ;;  %v826_v4 = vld [vmem:[#allocation2 + $0xb1] sm:$0xff]  ;;  %v5942_v20 = vpop.f32.mrf.mxu1 }
 0x225   : > { %v1925_v12 = vpop.f32.mrf.mxu0 }
 0x226   : > { %2096 = vmatmul.f32.gmra.mxu2 %v760_v52  ;;  %v5930_v15 = vadd.f32 %v1916_v40, %v1804_v28  ;;  %v7368_v40 = vld [vmem:[#allocation17_spill] sm:$0xff] }
 0x227   : > { %2209 = vmatmul.f32.gmra.mxu3 %v824_v21  ;;  %v3393_v28 = vld [vmem:[#allocation4 + $0x480] sm:$0xff] }
 0x228   : > { %7365 = vst [vmem:[#allocation24_spill] sm:$0xff] %v5930_v15  ;;  %2328 = vmatmul.f32.gmra.mxu0 %v5707_v56  ;;  %3552 = vmatpush.msra.mxu1 %v3393_v28 }
 0x229   : > { %v1693_v26 = vpop.f32.mrf.mxu2 }
 0x22a   : > { %v1806_v13 = vpop.f32.mrf.mxu3  ;;  %v1694_v1 = vadd.f32 %v1693_v26, %v7366_v17  ;;  %v5945_v26 = vld [vmem:[#allocation2] sm:$0xff] }
 0x22b   : > { %3553 = vmatmul.f32.vlgmr.msra.gmra.mxu1 %v5945_v26 }
 0x22c   : > { %v1807_v3 = vadd.f32 %v1806_v13, %v1694_v1  ;;  %v7372_v1 = vld [vmem:[#allocation16_spill] sm:$0xff] }
 0x22d   : > { %v1928_v62 = vpop.f32.mrf.mxu0 }
 0x22e   : > { %2099 = vmatmul.f32.gmra.mxu2 %v761_v6  ;;  %v5936_v49 = vadd.f32 %v1919_v50, %v1807_v3  ;;  %v7371_v50 = vld [vmem:[#allocation19_spill] sm:$0xff] }
 0x22f   : > { %2212 = vmatmul.f32.gmra.mxu3 %v825_v29  ;;  %v763_v29 = vld [vmem:[#allocation2 + $0xc0] sm:$0xff] }
 0x230   : > { %7367 = vst [vmem:[#allocation14_spill] sm:$0xff] %v5936_v49  ;;  %2331 = vmatmul.f32.gmra.mxu0 %v7368_v40  ;;  %v827_v3 = vld [vmem:[#allocation2 + $0xc1] sm:$0xff]  ;;  %v903_v49 = vld [vmem:[#allocation2 + $0x152] sm:$0xff] }
 0x231   : > { %v1696_v58 = vpop.f32.mrf.mxu2 }
 0x232   : > { %v1809_v27 = vpop.f32.mrf.mxu3  ;;  %v1697_v56 = vadd.f32 %v1696_v58, %v7369_v7  ;;  %v3424_v58 = vld [vmem:[#allocation4 + $0x578] sm:$0xff] }
 0x233   : > { %3650 = vmatpush.msrb.mxu2 %v3424_v58  ;;  %3556 = vmatmul.f32.gmra.mxu1 %v5945_v26  ;;  %v829_v58 = vld [vmem:[#allocation2 + $0xd9] sm:$0xff] }
 0x234   : > { %v1810_v36 = vadd.f32 %v1809_v27, %v1697_v56 }
 0x235   : > { %v1931_v52 = vpop.f32.mrf.mxu0 }
 0x236   : > { %2102 = vmatmul.f32.gmra.mxu2 %v762_v35  ;;  %v5940_v21 = vadd.f32 %v1922_v42, %v1810_v36  ;;  %v3440_v42 = vld [vmem:[#allocation4 + $0x5f8] sm:$0xff]  ;;  %v7374_v36 = vld [vmem:[#allocation18_spill] sm:$0xff] }
 0x237   : > { %2215 = vmatmul.f32.gmra.mxu3 %v826_v4  ;;  %v5953_v4 = vpop.f32.mrf.mxu1 }
 0x238   : > { %7370 = vst [vmem:[#allocation17_spill] sm:$0xff] %v5940_v21  ;;  %2334 = vmatmul.f32.gmra.mxu0 %v7371_v50  ;;  %3763 = vmatpush.msrb.mxu3 %v3440_v42  ;;  %v764_v50 = vld [vmem:[#allocation2 + $0xc8] sm:$0xff] }
 0x239   : > { %v1699_v13 = vpop.f32.mrf.mxu2 }
 0x23a   : > { %v1812_v17 = vpop.f32.mrf.mxu3  ;;  %v1700_v6 = vadd.f32 %v1699_v13, %v7372_v1  ;;  %v828_v13 = vld [vmem:[#allocation2 + $0xc9] sm:$0xff] }
 0x23c   : > { %v1813_v40 = vadd.f32 %v1812_v17, %v1700_v6 }
 0x23d   : > { %v1934_v27 = vpop.f32.mrf.mxu0 }
 0x23e   : > { %2105 = vmatmul.f32.gmra.mxu2 %v763_v29  ;;  %v5949_v7 = vadd.f32 %v1925_v12, %v1813_v40  ;;  %v7376_v29 = vld [vmem:[#allocation20_spill] sm:$0xff]  ;;  %v765_v40 = vld [vmem:[#allocation2 + $0xd8] sm:$0xff] }
 0x23f   : > { %2218 = vmatmul.f32.gmra.mxu3 %v827_v3  ;;  %v5960_v42 = vpop.f32.mrf.mxu1 }
 0x240   : > { %7373 = vst [vmem:[#allocation15_spill] sm:$0xff] %v5949_v7  ;;  %2337 = vmatmul.f32.gmra.mxu0 %v5734_v22 }
 0x241   : > { %v1702_v56 = vpop.f32.mrf.mxu2 }
 0x242   : > { %v1815_v35 = vpop.f32.mrf.mxu3  ;;  %v1703_v28 = vadd.f32 %v1702_v56, %v7374_v36  ;;  %v3456_v36 = vld [vmem:[#allocation4 + $0x678] sm:$0xff] }
 0x243   : > { %3876 = vmatpush.msrb.mxu0 %v3456_v36 }
 0x244   : > { %v1816_v17 = vadd.f32 %v1815_v35, %v1703_v28  ;;  %v3472_v28 = vld [vmem:[#allocation4 + $0x6f8] sm:$0xff] }
 0x245   : > { %v1937_v1 = vpop.f32.mrf.mxu0  ;;  %3989 = vmatpush.msrb.mxu1 %v3472_v28  ;;  %v767_v28 = vld [vmem:[#allocation2 + $0xf0] sm:$0xff] }
 0x246   : > { %2108 = vmatmul.f32.gmra.mxu2 %v764_v50  ;;  %v5956_v6 = vadd.f32 %v1928_v62, %v1816_v17  ;;  %v7378_v50 = vld [vmem:[#allocation21_spill] sm:$0xff]  ;;  %v766_v17 = vld [vmem:[#allocation2 + $0xe0] sm:$0xff] }
 0x247   : > { %2221 = vmatmul.f32.gmra.mxu3 %v828_v13 }
 0x248   : > { %7375 = vst [vmem:[#allocation19_spill] sm:$0xff] %v5956_v6  ;;  %2340 = vmatmul.f32.gmra.mxu0 %v5741_v47 }
 0x249   : > { %v1705_v12 = vpop.f32.mrf.mxu2 }
 0x24a   : > { %v1818_v22 = vpop.f32.mrf.mxu3  ;;  %v1706_v3 = vadd.f32 %v1705_v12, %v7376_v29  ;;  %v830_v12 = vld [vmem:[#allocation2 + $0xe1] sm:$0xff] }
 0x24c   : > { %v1819_v7 = vadd.f32 %v1818_v22, %v1706_v3  ;;  %v5966_v22 = vpop.f32.mrf.mxu1  ;;  %v3439_v3 = vld [vmem:[#allocation4 + $0x5f0] sm:$0xff] }
 0x24d   : > { %v2296_v56 = vpop.f32.mrf.mxu0  ;;  %3764 = vmatpush.msrb.mxu3 %v3439_v3  ;;  %v768_v3 = vld [vmem:[#allocation2 + $0xf8] sm:$0xff] }
 0x24e   : > { %2111 = vmatmul.f32.gmra.mxu2 %v765_v40  ;;  %v5962_v35 = vadd.f32 %v1931_v52, %v1819_v7  ;;  %v3423_v7 = vld [vmem:[#allocation4 + $0x570] sm:$0xff] }
 0x24f   : > { %2224 = vmatmul.f32.gmra.mxu3 %v829_v58  ;;  %3651 = vmatpush.msrb.mxu2 %v3423_v7  ;;  %v7380_v58 = vld [vmem:[#allocation22_spill] sm:$0xff] }
 0x250   : > { %7377 = vst [vmem:[#allocation16_spill] sm:$0xff] %v5962_v35  ;;  %2343 = vmatmul.f32.gmra.mxu0 %v5749_v54 }
 0x251   : > { %v1708_v47 = vpop.f32.mrf.mxu2 }
 0x252   : > { %v1821_v62 = vpop.f32.mrf.mxu3  ;;  %v1709_v13 = vadd.f32 %v1708_v47, %v7378_v50  ;;  %v831_v47 = vld [vmem:[#allocation2 + $0xf1] sm:$0xff] }
 0x254   : > { %v1822_v29 = vadd.f32 %v1821_v62, %v1709_v13 }
 0x255   : > { %v2299_v6 = vpop.f32.mrf.mxu0 }
 0x256   : > { %2114 = vmatmul.f32.gmra.mxu2 %v766_v17  ;;  %v5968_v52 = vadd.f32 %v1934_v27, %v1822_v29  ;;  %v3455_v27 = vld [vmem:[#allocation4 + $0x670] sm:$0xff] }
 0x257   : > { %2227 = vmatmul.f32.gmra.mxu3 %v830_v12  ;;  %v3471_v17 = vld [vmem:[#allocation4 + $0x6f0] sm:$0xff]  ;;  %3877 = vmatpush.msrb.mxu0 %v3455_v27  ;;  %v5974_v12 = vpop.f32.mrf.mxu1 }
 0x258   : > { %7379 = vst [vmem:[#allocation18_spill] sm:$0xff] %v5968_v52  ;;  %2346 = vmatmul.f32.gmra.mxu0 %v5757_v9  ;;  %3990 = vmatpush.msrb.mxu1 %v3471_v17  ;;  %v772_v52 = vld [vmem:[#allocation2 + $0x128] sm:$0xff] }
 0x259   : > { %v1711_v54 = vpop.f32.mrf.mxu2 }
 0x25a   : > { %v1824_v40 = vpop.f32.mrf.mxu3  ;;  %v1712_v36 = vadd.f32 %v1711_v54, %v7380_v58  ;;  %v832_v54 = vld [vmem:[#allocation2 + $0xf9] sm:$0xff]  ;;  %v5978_v58 = vld [vmem:[#allocation7] ss:$0 sm:$0xff] }
 0x25c   : > { %v1825_v62 = vadd.f32 %v1824_v40, %v1712_v36 }
 0x25d   : > { %v2302_v50 = vpop.f32.mrf.mxu0 }
 0x25e   : > { %2117 = vmatmul.f32.gmra.mxu2 %v767_v28  ;;  %v5972_v13 = vadd.f32 %v1937_v1, %v1825_v62  ;;  %v5982_v28 = vld [vmem:[#allocation9] ss:$0 sm:$0xff]  ;;  %v3438_v62 = vld [vmem:[#allocation4 + $0x5e8] sm:$0xff] }
 0x25f   : > { %2230 = vmatmul.f32.gmra.mxu3 %v831_v47  ;;  %v3422_v47 = vld [vmem:[#allocation4 + $0x568] sm:$0xff]  ;;  %v5986_v17 = vpop.f32.mrf.mxu1 }
 0x260   : > { %7381 = vst [vmem:[#allocation20_spill] sm:$0xff] %v5972_v13  ;;  %2349 = vmatmul.f32.gmra.mxu0 %v5767_v0  ;;  %3652 = vmatpush.msrb.mxu2 %v3422_v47  ;;  %v3470_v47 = vld [vmem:[#allocation4 + $0x6e8] sm:$0xff] }
 0x261   : > { %v2070_v9 = vpop.f32.mrf.mxu2  ;;  %3765 = vmatpush.msrb.mxu3 %v3438_v62  ;;  %3991 = vmatpush.msrb.mxu1 %v3470_v47  ;;  %v3437_v47 = vld [vmem:[#allocation4 + $0x5e0] sm:$0xff] }
 0x262   : > { %v2183_v29 = vpop.f32.mrf.mxu3  ;;  %v2071_v7 = vadd.f32 %v2070_v9, %v5762_v31 }
 0x263   : > { %3766 = vmatpush.msrb.mxu3 %v3437_v47  ;;  %v3469_v47 = vld [vmem:[#allocation4 + $0x6e0] sm:$0xff] }
 0x264   : > { %v2184_v40 = vadd.f32 %v2183_v29, %v2071_v7  ;;  %v769_v29 = vld [vmem:[#allocation2 + $0x108] sm:$0xff]  ;;  %3992 = vmatpush.msrb.mxu1 %v3469_v47 }
 0x265   : > { %v5980_v36 = vpop.f32.mrf.mxu0  ;;  %v833_v7 = vld [vmem:[#allocation2 + $0x109] sm:$0xff] }
 0x266   : > { %v2297_v1 = vadd.f32 %v2296_v56, %v2184_v40  ;;  %2120 = vmatmul.f32.gmra.mxu2 %v768_v3  ;;  %v3436_v47 = vld [vmem:[#allocation4 + $0x5d8] sm:$0xff] }
 0x267   : > { %2233 = vmatmul.f32.gmra.mxu3 %v832_v54 }
 0x268   : > { %v2396_v0 = vmul.f32 %v5978_v58, %v2297_v1  ;;  %2352 = vmatmul.f32.gmra.mxu0 %v5777_v63  ;;  %v3454_v1 = vld [vmem:[#allocation4 + $0x668] sm:$0xff]  ;;  %3767 = vmatpush.msrb.mxu3 %v3436_v47  ;;  %v3468_v47 = vld [vmem:[#allocation4 + $0x6d8] sm:$0xff] }
 0x269   : > { %v2073_v31 = vpop.f32.mrf.mxu2  ;;  %3878 = vmatpush.msrb.mxu0 %v3454_v1  ;;  %3993 = vmatpush.msrb.mxu1 %v3468_v47  ;;  %v3419_v47 = vld [vmem:[#allocation4 + $0x550] sm:$0xff] }
 0x26a   : > { %v2186_v27 = vpop.f32.mrf.mxu3  ;;  %v5989_v9 = vadd.f32 %v5982_v28, %v2396_v0  ;;  %v2074_v56 = vadd.f32 %v2073_v31, %v5772_v59 }
 0x26c   : > { %v7318_v3 = vmax.f32 %v5989_v9, 0.0  ;;  %v2187_v54 = vadd.f32 %v2186_v27, %v2074_v56  ;;  %v770_v56 = vld [vmem:[#allocation2 + $0x110] sm:$0xff] }
 0x26d   : > { %v5993_v40 = vpop.f32.mrf.mxu0 }
 0x26e   : > { %2496 = vst [vmem:[#allocation2 + $0x19] sm:$0xff] %v7318_v3  ;;  %v2300_v63 = vadd.f32 %v2299_v6, %v2187_v54  ;;  %2123 = vmatmul.f32.gmra.mxu2 %v769_v29  ;;  %v834_v3 = vld [vmem:[#allocation2 + $0x111] sm:$0xff]  ;;  %v6003_v6 = vpop.f32.mrf.mxu1 }
 0x26f   : > { %2236 = vmatmul.f32.gmra.mxu3 %v833_v7 }
 0x270   : > { %v2397_v62 = vmul.f32 %v5978_v58, %v2300_v63  ;;  %2355 = vmatmul.f32.gmra.mxu0 %v5788_v10  ;;  %v3421_v63 = vld [vmem:[#allocation4 + $0x560] sm:$0xff] }
 0x271   : > { %v2076_v59 = vpop.f32.mrf.mxu2  ;;  %3653 = vmatpush.msrb.mxu2 %v3421_v63 }
 0x272   : > { %v2189_v0 = vpop.f32.mrf.mxu3  ;;  %v6000_v31 = vadd.f32 %v5982_v28, %v2397_v62  ;;  %v2077_v27 = vadd.f32 %v2076_v59, %v5783_v46 }
 0x274   : > { %v7319_v29 = vmax.f32 %v6000_v31, 0.0  ;;  %v2190_v7 = vadd.f32 %v2189_v0, %v2077_v27 }
 0x275   : > { %v6006_v54 = vld [vmem:[#allocation2 + $0x18] sm:$0xff]  ;;  %v6008_v1 = vpop.f32.mrf.mxu0 }
 0x276   : > { %2497 = vst [vmem:[#allocation2 + $0x21] sm:$0xff] %v7319_v29  ;;  %v2303_v10 = vadd.f32 %v2302_v50, %v2190_v7  ;;  %2126 = vmatmul.f32.gmra.mxu2 %v770_v56  ;;  %3559 = vmatmul.f32.gmra.mxu1 %v6006_v54  ;;  %v771_v50 = vld [vmem:[#allocation2 + $0x120] sm:$0xff]  ;;  %v6024_v13 = vpop.f32.mrf.mxu1 }
 0x277   : > { %2239 = vmatmul.f32.gmra.mxu3 %v834_v3  ;;  %v835_v56 = vld [vmem:[#allocation2 + $0x121] sm:$0xff] }
 0x278   : > { %v2398_v46 = vmul.f32 %v5978_v58, %v2303_v10  ;;  %2358 = vmatmul.f32.gmra.mxu0 %v5799_v25  ;;  %v901_v10 = vld [vmem:[#allocation2 + $0x13a] sm:$0xff] }
 0x279   : > { %v2079_v62 = vpop.f32.mrf.mxu2 }
 0x27a   : > { %v2192_v59 = vpop.f32.mrf.mxu3  ;;  %v6016_v0 = vadd.f32 %v5982_v28, %v2398_v46  ;;  %v2080_v27 = vadd.f32 %v2079_v62, %v5794_v43  ;;  %v3453_v43 = vld [vmem:[#allocation4 + $0x660] sm:$0xff] }
 0x27b   : > { %3879 = vmatpush.msrb.mxu0 %v3453_v43  ;;  %v902_v43 = vld [vmem:[#allocation2 + $0x142] sm:$0xff] }
 0x27c   : > { %v7320_v3 = vmax.f32 %v6016_v0, 0.0  ;;  %v2193_v7 = vadd.f32 %v2192_v59, %v2080_v27 }
 0x27d   : > { %v6020_v29 = vld [vmem:[#allocation2 + $0x20] sm:$0xff]  ;;  %v6022_v63 = vpop.f32.mrf.mxu0 }
 0x27e   : > { %2498 = vst [vmem:[#allocation2 + $0x31] sm:$0xff] %v7320_v3  ;;  %v2306_v25 = vadd.f32 %v5980_v36, %v2193_v7  ;;  %2129 = vmatmul.f32.gmra.mxu2 %v771_v50  ;;  %3562 = vmatmul.f32.gmra.mxu1 %v6020_v29  ;;  %v836_v36 = vld [vmem:[#allocation2 + $0x129] sm:$0xff] }
 0x27f   : > { %2242 = vmatmul.f32.gmra.mxu3 %v835_v56 }
 0x280   : > { %v2399_v46 = vmul.f32 %v5978_v58, %v2306_v25  ;;  %2361 = vmatmul.f32.gmra.mxu0 %v901_v10  ;;  %v3420_v25 = vld [vmem:[#allocation4 + $0x558] sm:$0xff] }
 0x281   : > { %v2082_v62 = vpop.f32.mrf.mxu2  ;;  %3654 = vmatpush.msrb.mxu2 %v3420_v25 }
 0x282   : > { %v2195_v59 = vpop.f32.mrf.mxu3  ;;  %v6032_v27 = vadd.f32 %v5982_v28, %v2399_v46  ;;  %v2083_v3 = vadd.f32 %v2082_v62, %v5805_v55  ;;  %v6044_v55 = vpop.f32.mrf.mxu1 }
 0x283   : > { %7382 = vst [vmem:[#allocation21_spill] sm:$0xff] %v6044_v55  ;;  %3655 = vmatpush.msrb.mxu2 %v3419_v47 }
 0x284   : > { %v7321_v50 = vmax.f32 %v6032_v27, 0.0  ;;  %v2196_v56 = vadd.f32 %v2195_v59, %v2083_v3 }
 0x285   : > { %v6036_v7 = vld [vmem:[#allocation2 + $0x30] sm:$0xff]  ;;  %v6038_v35 = vpop.f32.mrf.mxu0 }
 0x286   : > { %2499 = vst [vmem:[#allocation2 + $0x39] sm:$0xff] %v7321_v50  ;;  %v2309_v10 = vadd.f32 %v5993_v40, %v2196_v56  ;;  %2132 = vmatmul.f32.gmra.mxu2 %v772_v52  ;;  %3565 = vmatmul.f32.gmra.mxu1 %v6036_v7  ;;  %v773_v52 = vld [vmem:[#allocation2 + $0x138] sm:$0xff] }
 0x287   : > { %2245 = vmatmul.f32.gmra.mxu3 %v836_v36  ;;  %v837_v36 = vld [vmem:[#allocation2 + $0x139] sm:$0xff] }
 0x288   : > { %v2400_v3 = vmul.f32 %v5978_v58, %v2309_v10  ;;  %2364 = vmatmul.f32.gmra.mxu0 %v902_v43  ;;  %v3452_v10 = vld [vmem:[#allocation4 + $0x658] sm:$0xff] }
 0x289   : > { %v2085_v46 = vpop.f32.mrf.mxu2  ;;  %3880 = vmatpush.msrb.mxu0 %v3452_v10 }
 0x28a   : > { %v2198_v62 = vpop.f32.mrf.mxu3  ;;  %v6048_v59 = vadd.f32 %v5982_v28, %v2400_v3  ;;  %v2086_v40 = vadd.f32 %v2085_v46, %v5816_v23 }
 0x28c   : > { %v7322_v56 = vmax.f32 %v6048_v59, 0.0  ;;  %v2199_v50 = vadd.f32 %v2198_v62, %v2086_v40  ;;  %v6061_v62 = vpop.f32.mrf.mxu1 }
 0x28d   : > { %v6052_v21 = vld [vmem:[#allocation2 + $0x38] sm:$0xff]  ;;  %v6054_v25 = vpop.f32.mrf.mxu0  ;;  %7383 = vst [vmem:[#allocation22_spill] sm:$0xff] %v6061_v62  ;;  %v775_v62 = vld [vmem:[#allocation2 + $0x150] sm:$0xff] }
 0x28e   : > { %2500 = vst [vmem:[#allocation2 + $0x49] sm:$0xff] %v7322_v56  ;;  %v2312_v43 = vadd.f32 %v6008_v1, %v2199_v50  ;;  %2135 = vmatmul.f32.gmra.mxu2 %v773_v52  ;;  %3568 = vmatmul.f32.gmra.mxu1 %v6052_v21  ;;  %v774_v50 = vld [vmem:[#allocation2 + $0x140] sm:$0xff] }
 0x28f   : > { %2248 = vmatmul.f32.gmra.mxu3 %v837_v36  ;;  %v838_v52 = vld [vmem:[#allocation2 + $0x141] sm:$0xff] }
 0x290   : > { %v2401_v23 = vmul.f32 %v5978_v58, %v2312_v43  ;;  %2367 = vmatmul.f32.gmra.mxu0 %v903_v49  ;;  %v904_v49 = vld [vmem:[#allocation2 + $0x15a] sm:$0xff] }
 0x291   : > { %v2088_v3 = vpop.f32.mrf.mxu2 }
 0x292   : > { %v2201_v46 = vpop.f32.mrf.mxu3  ;;  %v6064_v40 = vadd.f32 %v5982_v28, %v2401_v23  ;;  %v2089_v1 = vadd.f32 %v2088_v3, %v5827_v48  ;;  %v3435_v23 = vld [vmem:[#allocation4 + $0x5d0] sm:$0xff] }
 0x293   : > { %3768 = vmatpush.msrb.mxu3 %v3435_v23  ;;  %v3467_v23 = vld [vmem:[#allocation4 + $0x6d0] sm:$0xff] }
 0x294   : > { %v7323_v36 = vmax.f32 %v6064_v40, 0.0  ;;  %v2202_v56 = vadd.f32 %v2201_v46, %v2089_v1  ;;  %3994 = vmatpush.msrb.mxu1 %v3467_v23  ;;  %v3434_v23 = vld [vmem:[#allocation4 + $0x5c8] sm:$0xff] }
 0x295   : > { %v6068_v15 = vld [vmem:[#allocation2 + $0x48] sm:$0xff]  ;;  %v6070_v10 = vpop.f32.mrf.mxu0  ;;  %3769 = vmatpush.msrb.mxu3 %v3434_v23  ;;  %v3466_v23 = vld [vmem:[#allocation4 + $0x6c8] sm:$0xff] }
 0x296   : > { %2501 = vst [vmem:[#allocation2 + $0x51] sm:$0xff] %v7323_v36  ;;  %v2315_v43 = vadd.f32 %v6022_v63, %v2202_v56  ;;  %2138 = vmatmul.f32.gmra.mxu2 %v774_v50  ;;  %3571 = vmatmul.f32.gmra.mxu1 %v6068_v15  ;;  %v839_v63 = vld [vmem:[#allocation2 + $0x151] sm:$0xff]  ;;  %v6081_v56 = vpop.f32.mrf.mxu1 }
 0x297   : > { %2251 = vmatmul.f32.gmra.mxu3 %v838_v52  ;;  %7385 = vst [vmem:[#allocation26_spill] sm:$0xff] %v6081_v56  ;;  %3995 = vmatpush.msrb.mxu1 %v3466_v23  ;;  %v3414_v23 = vld [vmem:[#allocation4 + $0x528] sm:$0xff] }
 0x298   : > { %v2402_v48 = vmul.f32 %v5978_v58, %v2315_v43  ;;  %2370 = vmatmul.f32.gmra.mxu0 %v904_v49  ;;  %v905_v49 = vld [vmem:[#allocation2 + $0x16a] sm:$0xff] }
 0x299   : > { %v2091_v3 = vpop.f32.mrf.mxu2 }
 0x29a   : > { %v2204_v46 = vpop.f32.mrf.mxu3  ;;  %v6078_v1 = vadd.f32 %v5982_v28, %v2402_v48  ;;  %v2092_v36 = vadd.f32 %v2091_v3, %v5838_v30  ;;  %v3451_v30 = vld [vmem:[#allocation4 + $0x650] sm:$0xff] }
 0x29b   : > { %3881 = vmatpush.msrb.mxu0 %v3451_v30 }
 0x29c   : > { %7384 = vst [vmem:[#allocation25_spill] sm:$0xff] %v6078_v1  ;;  %v7324_v50 = vmax.f32 %v6078_v1, 0.0  ;;  %v2205_v52 = vadd.f32 %v2204_v46, %v2092_v36  ;;  %v1982_v36 = vadd.f32 %v5899_v32, %v5848_v51  ;;  %v906_v51 = vld [vmem:[#allocation2 + $0x172] sm:$0xff] }
 0x29d   : > { %v6084_v55 = vld [vmem:[#allocation2 + $0x50] sm:$0xff]  ;;  %v6086_v47 = vpop.f32.mrf.mxu0 }
 0x29e   : > { %2502 = vst [vmem:[#allocation2 + $0x61] sm:$0xff] %v7324_v50  ;;  %v2318_v43 = vadd.f32 %v6038_v35, %v2205_v52  ;;  %2141 = vmatmul.f32.gmra.mxu2 %v775_v62  ;;  %3574 = vmatmul.f32.gmra.mxu1 %v6084_v55  ;;  %v776_v62 = vld [vmem:[#allocation2 + $0x158] sm:$0xff]  ;;  %v6103_v32 = vpop.f32.mrf.mxu1 }
 0x29f   : > { %2254 = vmatmul.f32.gmra.mxu3 %v839_v63  ;;  %v840_v63 = vld [vmem:[#allocation2 + $0x159] sm:$0xff]  ;;  %7387 = vst [vmem:[#allocation28_spill] sm:$0xff] %v6103_v32 }
 0x2a0   : > { %v2403_v48 = vmul.f32 %v5978_v58, %v2318_v43  ;;  %2373 = vmatmul.f32.gmra.mxu0 %v905_v49  ;;  %v3418_v43 = vld [vmem:[#allocation4 + $0x548] sm:$0xff] }
 0x2a1   : > { %v2094_v3 = vpop.f32.mrf.mxu2  ;;  %3656 = vmatpush.msrb.mxu2 %v3418_v43 }
 0x2a2   : > { %v2207_v46 = vpop.f32.mrf.mxu3  ;;  %v6096_v50 = vadd.f32 %v5982_v28, %v2403_v48  ;;  %v2095_v35 = vadd.f32 %v2094_v3, %v1982_v36  ;;  %v1985_v36 = vadd.f32 %v5905_v19, %v5859_v11  ;;  %v907_v19 = vld [vmem:[#allocation2 + $0x182] sm:$0xff] }
 0x2a4   : > { %7386 = vst [vmem:[#allocation27_spill] sm:$0xff] %v6096_v50  ;;  %v7326_v52 = vmax.f32 %v6096_v50, 0.0  ;;  %v2208_v56 = vadd.f32 %v2207_v46, %v2095_v35  ;;  %v3431_v50 = vld [vmem:[#allocation4 + $0x5b0] sm:$0xff] }
 0x2a5   : > { %v6099_v1 = vld [vmem:[#allocation2 + $0x60] sm:$0xff]  ;;  %v6101_v30 = vpop.f32.mrf.mxu0 }
 0x2a6   : > { %2503 = vst [vmem:[#allocation2 + $0x69] sm:$0xff] %v7326_v52  ;;  %v2321_v49 = vadd.f32 %v6054_v25, %v2208_v56  ;;  %2144 = vmatmul.f32.gmra.mxu2 %v776_v62  ;;  %3577 = vmatmul.f32.gmra.mxu1 %v6099_v1  ;;  %v777_v56 = vld [vmem:[#allocation2 + $0x168] sm:$0xff] }
 0x2a7   : > { %2257 = vmatmul.f32.gmra.mxu3 %v840_v63  ;;  %v841_v62 = vld [vmem:[#allocation2 + $0x169] sm:$0xff]  ;;  %v3450_v63 = vld [vmem:[#allocation4 + $0x648] sm:$0xff] }
 0x2a8   : > { %v2404_v48 = vmul.f32 %v5978_v58, %v2321_v49  ;;  %2376 = vmatmul.f32.gmra.mxu0 %v906_v51  ;;  %v3417_v51 = vld [vmem:[#allocation4 + $0x540] sm:$0xff] }
 0x2a9   : > { %v2097_v3 = vpop.f32.mrf.mxu2  ;;  %3882 = vmatpush.msrb.mxu0 %v3450_v63  ;;  %3657 = vmatpush.msrb.mxu2 %v3417_v51 }
 0x2aa   : > { %v2210_v46 = vpop.f32.mrf.mxu3  ;;  %v6113_v35 = vadd.f32 %v5982_v28, %v2404_v48  ;;  %v2098_v25 = vadd.f32 %v2097_v3, %v1985_v36  ;;  %v3433_v36 = vld [vmem:[#allocation4 + $0x5c0] sm:$0xff]  ;;  %v3416_v3 = vld [vmem:[#allocation4 + $0x538] sm:$0xff] }
 0x2ab   : > { %v3449_v48 = vld [vmem:[#allocation4 + $0x640] sm:$0xff]  ;;  %3770 = vmatpush.msrb.mxu3 %v3433_v36  ;;  %3658 = vmatpush.msrb.mxu2 %v3416_v3 }
 0x2ac   : > { %7388 = vst [vmem:[#allocation29_spill] sm:$0xff] %v6113_v35  ;;  %v7327_v52 = vmax.f32 %v6113_v35, 0.0  ;;  %v2211_v32 = vadd.f32 %v2210_v46, %v2098_v25  ;;  %v1988_v46 = vadd.f32 %v5910_v14, %v5867_v41  ;;  %v6126_v25 = vpop.f32.mrf.mxu1  ;;  %3883 = vmatpush.msrb.mxu0 %v3449_v48  ;;  %v3447_v41 = vld [vmem:[#allocation4 + $0x630] sm:$0xff]  ;;  %v778_v14 = vld [vmem:[#allocation2 + $0x170] sm:$0xff] }
 0x2ad   : > { %v6116_v43 = vld [vmem:[#allocation2 + $0x68] sm:$0xff]  ;;  %v6118_v11 = vpop.f32.mrf.mxu0  ;;  %7389 = vst [vmem:[#allocation30_spill] sm:$0xff] %v6126_v25  ;;  %v842_v25 = vld [vmem:[#allocation2 + $0x171] sm:$0xff] }
 0x2ae   : > { %2504 = vst [vmem:[#allocation2 + $0x79] sm:$0xff] %v7327_v52  ;;  %v2324_v49 = vadd.f32 %v6070_v10, %v2211_v32  ;;  %2147 = vmatmul.f32.gmra.mxu2 %v777_v56  ;;  %3580 = vmatmul.f32.gmra.mxu1 %v6116_v43  ;;  %v3432_v52 = vld [vmem:[#allocation4 + $0x5b8] sm:$0xff] }
 0x2af   : > { %2260 = vmatmul.f32.gmra.mxu3 %v841_v62  ;;  %v3448_v10 = vld [vmem:[#allocation4 + $0x638] sm:$0xff]  ;;  %v3415_v62 = vld [vmem:[#allocation4 + $0x530] sm:$0xff] }
 0x2b0   : > { %v2405_v63 = vmul.f32 %v5978_v58, %v2324_v49  ;;  %2379 = vmatmul.f32.gmra.mxu0 %v907_v19  ;;  %3771 = vmatpush.msrb.mxu3 %v3432_v52  ;;  %v908_v48 = vld [vmem:[#allocation2 + $0x18a] sm:$0xff]  ;;  %v3446_v52 = vld [vmem:[#allocation4 + $0x628] sm:$0xff] }
 0x2b1   : > { %v2100_v32 = vpop.f32.mrf.mxu2  ;;  %3884 = vmatpush.msrb.mxu0 %v3448_v10  ;;  %3659 = vmatpush.msrb.mxu2 %v3415_v62  ;;  %v3429_v10 = vld [vmem:[#allocation4 + $0x5a0] sm:$0xff]  ;;  %v3412_v62 = vld [vmem:[#allocation4 + $0x518] sm:$0xff] }
 0x2b2   : > { %v2213_v56 = vpop.f32.mrf.mxu3  ;;  %v6130_v35 = vadd.f32 %v5982_v28, %v2405_v63  ;;  %v2101_v51 = vadd.f32 %v2100_v32, %v1988_v46  ;;  %3772 = vmatpush.msrb.mxu3 %v3431_v50  ;;  %v3430_v46 = vld [vmem:[#allocation4 + $0x5a8] sm:$0xff]  ;;  %v3413_v63 = vld [vmem:[#allocation4 + $0x520] sm:$0xff]  ;;  %v1991_v32 = vadd.f32 %v5917_v16, %v5873_v53  ;;  %v3411_v53 = vld [vmem:[#allocation4 + $0x510] sm:$0xff] }
 0x2b3   : > { %3885 = vmatpush.msrb.mxu0 %v3447_v41  ;;  %3660 = vmatpush.msrb.mxu2 %v3414_v23  ;;  %v3444_v23 = vld [vmem:[#allocation4 + $0x618] sm:$0xff]  ;;  %v779_v16 = vld [vmem:[#allocation2 + $0x180] sm:$0xff] }
 0x2b4   : > { %v7330_v19 = vmax.f32 %v6130_v35, 0.0  ;;  %v2214_v49 = vadd.f32 %v2213_v56, %v2101_v51  ;;  %3773 = vmatpush.msrb.mxu3 %v3430_v46  ;;  %v3445_v56 = vld [vmem:[#allocation4 + $0x620] sm:$0xff] }
 0x2b5   : > { %v6133_v5 = vld [vmem:[#allocation2 + $0x78] sm:$0xff]  ;;  %v6135_v36 = vpop.f32.mrf.mxu0  ;;  %3886 = vmatpush.msrb.mxu0 %v3446_v52  ;;  %3661 = vmatpush.msrb.mxu2 %v3413_v63  ;;  %v3427_v52 = vld [vmem:[#allocation4 + $0x590] sm:$0xff] }
 0x2b6   : > { %2505 = vst [vmem:[#allocation2 + $0x81] sm:$0xff] %v7330_v19  ;;  %v2327_v3 = vadd.f32 %v6086_v47, %v2214_v49  ;;  %2150 = vmatmul.f32.gmra.mxu2 %v778_v14  ;;  %3583 = vmatmul.f32.gmra.mxu1 %v6133_v5  ;;  %v3428_v47 = vld [vmem:[#allocation4 + $0x598] sm:$0xff] }
 0x2b7   : > { %2263 = vmatmul.f32.gmra.mxu3 %v842_v25  ;;  %v6144_v25 = vpop.f32.mrf.mxu1  ;;  %3887 = vmatpush.msrb.mxu0 %v3445_v56  ;;  %v3410_v56 = vld [vmem:[#allocation4 + $0x508] sm:$0xff] }
 0x2b8   : > { %v2406_v50 = vmul.f32 %v5978_v58, %v2327_v3  ;;  %2382 = vmatmul.f32.gmra.mxu0 %v908_v48  ;;  %7390 = vst [vmem:[#allocation31_spill] sm:$0xff] %v6144_v25  ;;  %3774 = vmatpush.msrb.mxu3 %v3429_v10  ;;  %v843_v3 = vld [vmem:[#allocation2 + $0x181] sm:$0xff] }
 0x2b9   : > { %v2103_v51 = vpop.f32.mrf.mxu2  ;;  %3662 = vmatpush.msrb.mxu2 %v3412_v62  ;;  %v909_v25 = vld [vmem:[#allocation2 + $0x19a] sm:$0xff]  ;;  %3888 = vmatpush.msrb.mxu0 %v3444_v23 }
 0x2ba   : > { %v2216_v41 = vpop.f32.mrf.mxu3  ;;  %v6147_v14 = vadd.f32 %v5982_v28, %v2406_v50  ;;  %v2104_v49 = vadd.f32 %v2103_v51, %v1991_v32  ;;  %3775 = vmatpush.msrb.mxu3 %v3428_v47  ;;  %v3465_v32 = vld [vmem:[#allocation4 + $0x6c0] sm:$0xff]  ;;  %v3443_v50 = vld [vmem:[#allocation4 + $0x610] sm:$0xff]  ;;  %v3426_v62 = vld [vmem:[#allocation4 + $0x588] sm:$0xff]  ;;  %v1994_v51 = vadd.f32 %v5922_v37, %v5878_v57 }
 0x2bb   : > { %3663 = vmatpush.msrb.mxu2 %v3411_v53  ;;  %3996 = vmatpush.msrb.mxu1 %v3465_v32  ;;  %v3442_v47 = vld [vmem:[#allocation4 + $0x608] sm:$0xff]  ;;  %v3425_v53 = vld [vmem:[#allocation4 + $0x580] sm:$0xff] }
 0x2bc   : > { %v7331_v48 = vmax.f32 %v6147_v14, 0.0  ;;  %v2217_v46 = vadd.f32 %v2216_v41, %v2104_v49  ;;  %3776 = vmatpush.msrb.mxu3 %v3427_v52  ;;  %v3409_v49 = vld [vmem:[#allocation4 + $0x500] sm:$0xff]  ;;  %3889 = vmatpush.msrb.mxu0 %v3443_v50  ;;  %v780_v52 = vld [vmem:[#allocation2 + $0x188] sm:$0xff] }
 0x2bd   : > { %v6150_v63 = vld [vmem:[#allocation2 + $0x80] sm:$0xff]  ;;  %v6152_v19 = vpop.f32.mrf.mxu0  ;;  %3664 = vmatpush.msrb.mxu2 %v3410_v56 }
 0x2be   : > { %2506 = vst [vmem:[#allocation2 + $0x91] sm:$0xff] %v7331_v48  ;;  %v2330_v10 = vadd.f32 %v6101_v30, %v2217_v46  ;;  %2153 = vmatmul.f32.gmra.mxu2 %v779_v16  ;;  %3586 = vmatmul.f32.gmra.mxu1 %v6150_v63  ;;  %v3441_v46 = vld [vmem:[#allocation4 + $0x600] sm:$0xff]  ;;  %v910_v50 = vld [vmem:[#allocation2 + $0x1a2] sm:$0xff] }
 0x2bf   : > { %2266 = vmatmul.f32.gmra.mxu3 %v843_v3  ;;  %v844_v48 = vld [vmem:[#allocation2 + $0x189] sm:$0xff]  ;;  %3890 = vmatpush.msrb.mxu0 %v3442_v47  ;;  %v6164_v57 = vpop.f32.mrf.mxu1 }
 0x2c0   : > { %v2407_v41 = vmul.f32 %v5978_v58, %v2330_v10  ;;  %2385 = vmatmul.f32.gmra.mxu0 %v909_v25  ;;  %3777 = vmatpush.msrb.mxu3 %v3426_v62  ;;  %v1997_v62 = vadd.f32 %v5928_v2, %v5883_v60  ;;  %v3464_v2 = vld [vmem:[#allocation4 + $0x6b8] sm:$0xff] }
 0x2c1   : > { %v2106_v23 = vpop.f32.mrf.mxu2  ;;  %3665 = vmatpush.msrb.mxu2 %v3409_v49  ;;  %3891 = vmatpush.msrb.mxu0 %v3441_v46 }
 0x2c2   : > { %v2219_v30 = vpop.f32.mrf.mxu3  ;;  %v6162_v16 = vadd.f32 %v5982_v28, %v2407_v41  ;;  %v2107_v3 = vadd.f32 %v2106_v23, %v1994_v51  ;;  %3778 = vmatpush.msrb.mxu3 %v3425_v53  ;;  %3997 = vmatpush.msrb.mxu1 %v3464_v2 }
 0x2c4   : > { %v2475_v37 = vmax.f32 %v6162_v16, 0.0  ;;  %v2220_v25 = vadd.f32 %v2219_v30, %v2107_v3  ;;  %v845_v30 = vld [vmem:[#allocation2 + $0x199] sm:$0xff] }
 0x2c5   : > { %v6167_v10 = vld [vmem:[#allocation2 + $0x90] sm:$0xff]  ;;  %v2341_v32 = vpop.f32.mrf.mxu0 }
 0x2c6   : > { %2507 = vst [vmem:[#allocation2 + $0x99] sm:$0xff] %v2475_v37  ;;  %v2333_v56 = vadd.f32 %v6118_v11, %v2220_v25  ;;  %2156 = vmatmul.f32.gmra.mxu2 %v780_v52  ;;  %3589 = vmatmul.f32.gmra.mxu1 %v6167_v10  ;;  %v2000_v52 = vadd.f32 %v5934_v8, %v5887_v24 }
 0x2c7   : > { %2269 = vmatmul.f32.gmra.mxu3 %v844_v48  ;;  %v6182_v46 = vpop.f32.mrf.mxu1  ;;  %v2003_v8 = vadd.f32 %v5942_v20, %v5891_v45 }
 0x2c8   : > { %v2408_v51 = vmul.f32 %v5978_v58, %v2333_v56  ;;  %2388 = vmatmul.f32.gmra.mxu0 %v910_v50 }
 0x2c9   : > { %v2109_v41 = vpop.f32.mrf.mxu2 }
 0x2ca   : > { %v2222_v47 = vpop.f32.mrf.mxu3  ;;  %v6177_v49 = vadd.f32 %v5982_v28, %v2408_v51  ;;  %v2110_v23 = vadd.f32 %v2109_v41, %v1997_v62  ;;  %v846_v51 = vld [vmem:[#allocation2 + $0x1a1] sm:$0xff] }
 0x2cc   : > { %v7346_v53 = vmax.f32 %v6177_v49, 0.0  ;;  %v2223_v11 = vadd.f32 %v2222_v47, %v2110_v23 }
 0x2cd   : > { %v6180_v3 = vld [vmem:[#allocation2 + $0x98] sm:$0xff]  ;;  %v2344_v48 = vpop.f32.mrf.mxu0 }
 0x2ce   : > { %2508 = vst [vmem:[#allocation2 + $0xa9] sm:$0xff] %v7346_v53  ;;  %v2336_v60 = vadd.f32 %v6135_v36, %v2223_v11  ;;  %2159 = vmatmul.f32.gmra.mxu2 %v5945_v26  ;;  %3592 = vmatmul.f32.gmra.mxu1 %v6180_v3  ;;  %v2669_v53 = vld [vmem:[#allocation2 + $0x9a] sm:$0xff] }
 0x2cf   : > { %2272 = vmatmul.f32.gmra.mxu3 %v845_v30 }
 0x2d0   : > { %v2409_v25 = vmul.f32 %v5978_v58, %v2336_v60  ;;  %3892 = vmatmul.f32.vlgmr.msrb.gmra.mxu0 %v6006_v54  ;;  %v6206_v54 = vpop.f32.mrf.mxu1 }
 0x2d1   : > { %v2112_v50 = vpop.f32.mrf.mxu2 }
 0x2d2   : > { %v2225_v56 = vpop.f32.mrf.mxu3  ;;  %v6194_v62 = vadd.f32 %v5982_v28, %v2409_v25  ;;  %v2113_v36 = vadd.f32 %v2112_v50, %v2000_v52  ;;  %v2592_v25 = vld [vmem:[#allocation2 + $0x1] sm:$0xff] }
 0x2d4   : > { %v7344_v41 = vmax.f32 %v6194_v62, 0.0  ;;  %v2226_v47 = vadd.f32 %v2225_v56, %v2113_v36 }
 0x2d5   : > { %v6197_v23 = vld [vmem:[#allocation2 + $0xa8] sm:$0xff]  ;;  %v2347_v30 = vpop.f32.mrf.mxu0 }
 0x2d6   : > { %2509 = vst [vmem:[#allocation2 + $0xb1] sm:$0xff] %v7344_v41  ;;  %v2339_v24 = vadd.f32 %v6152_v19, %v2226_v47  ;;  %2162 = vmatmul.f32.gmra.mxu2 %v5945_v26  ;;  %3595 = vmatmul.f32.gmra.mxu1 %v6197_v23  ;;  %v2656_v26 = vld [vmem:[#allocation2 + $0x2] sm:$0xff] }
 0x2d7   : > { %2275 = vmatmul.f32.gmra.mxu3 %v846_v51  ;;  %v2006_v51 = vadd.f32 %v5953_v4, %v5894_v38 }
 0x2d8   : > { %v2410_v11 = vmul.f32 %v5978_v58, %v2339_v24  ;;  %3895 = vmatmul.f32.gmra.mxu0 %v6020_v29  ;;  %v3463_v29 = vld [vmem:[#allocation4 + $0x6b0] sm:$0xff]  ;;  %v6222_v24 = vpop.f32.mrf.mxu1 }
 0x2d9   : > { %v2115_v60 = vpop.f32.mrf.mxu2  ;;  %3998 = vmatpush.msrb.mxu1 %v3463_v29 }
 0x2da   : > { %v2228_v2 = vpop.f32.mrf.mxu3  ;;  %v6211_v52 = vadd.f32 %v5982_v28, %v2410_v11  ;;  %v2116_v19 = vadd.f32 %v2115_v60, %v2003_v8 }
 0x2dc   : > { %v7342_v50 = vmax.f32 %v6211_v52, 0.0  ;;  %v2229_v56 = vadd.f32 %v2228_v2, %v2116_v19  ;;  %v2593_v2 = vld [vmem:[#allocation2 + $0x9] sm:$0xff] }
 0x2dd   : > { %v6214_v36 = vld [vmem:[#allocation2 + $0xb0] sm:$0xff]  ;;  %v2350_v45 = vpop.f32.mrf.mxu0 }
 0x2de   : > { %2510 = vst [vmem:[#allocation2 + $0xc1] sm:$0xff] %v7342_v50  ;;  %v2342_v20 = vadd.f32 %v2341_v32, %v2229_v56  ;;  %3666 = vmatmul.f32.vlgmr.msrb.gmra.mxu2 %v2592_v25  ;;  %3598 = vmatmul.f32.gmra.mxu1 %v6214_v36  ;;  %v2657_v19 = vld [vmem:[#allocation2 + $0xa] sm:$0xff]  ;;  %v2667_v50 = vld [vmem:[#allocation2 + $0x82] sm:$0xff] }
 0x2df   : > { %3779 = vmatmul.f32.vlgmr.msrb.gmra.mxu3 %v2656_v26 }
 0x2e0   : > { %v2411_v47 = vmul.f32 %v5978_v58, %v2342_v20  ;;  %3898 = vmatmul.f32.gmra.mxu0 %v6036_v7  ;;  %v2009_v7 = vadd.f32 %v5960_v42, %v5897_v33  ;;  %v3462_v42 = vld [vmem:[#allocation4 + $0x6a8] sm:$0xff] }
 0x2e1   : > { %v2118_v8 = vpop.f32.mrf.mxu2  ;;  %3999 = vmatpush.msrb.mxu1 %v3462_v42 }
 0x2e2   : > { %v2231_v11 = vpop.f32.mrf.mxu3  ;;  %v6226_v60 = vadd.f32 %v5982_v28, %v2411_v47  ;;  %v2119_v32 = vadd.f32 %v2118_v8, %v2006_v51 }
 0x2e4   : > { %v7340_v25 = vmax.f32 %v6226_v60, 0.0  ;;  %v2232_v26 = vadd.f32 %v2231_v11, %v2119_v32  ;;  %v6241_v11 = vpop.f32.mrf.mxu1 }
 0x2e5   : > { %v6229_v56 = vld [vmem:[#allocation2 + $0xc0] sm:$0xff]  ;;  %v2353_v38 = vpop.f32.mrf.mxu0 }
 0x2e6   : > { %2511 = vst [vmem:[#allocation2 + $0xc9] sm:$0xff] %v7340_v25  ;;  %v2345_v4 = vadd.f32 %v2344_v48, %v2232_v26  ;;  %3669 = vmatmul.f32.gmra.mxu2 %v2593_v2  ;;  %3601 = vmatmul.f32.gmra.mxu1 %v6229_v56 }
 0x2e7   : > { %3782 = vmatmul.f32.gmra.mxu3 %v2657_v19  ;;  %v2658_v19 = vld [vmem:[#allocation2 + $0x1a] sm:$0xff] }
 0x2e8   : > { %v2412_v20 = vmul.f32 %v5978_v58, %v2345_v4  ;;  %3901 = vmatmul.f32.gmra.mxu0 %v6052_v21  ;;  %v7391_v21 = vmax.f32 %v5989_v9, 0.0  ;;  %v2012_v4 = vadd.f32 %v5966_v22, %v5902_v44  ;;  %v7392_v22 = vmax.f32 %v6000_v31, 0.0 }
 0x2e9   : > { %v2121_v29 = vpop.f32.mrf.mxu2 }
 0x2ea   : > { %v2234_v51 = vpop.f32.mrf.mxu3  ;;  %v6239_v47 = vadd.f32 %v5982_v28, %v2412_v20  ;;  %v2122_v8 = vadd.f32 %v2121_v29, %v2009_v7 }
 0x2ec   : > { %v7339_v48 = vmax.f32 %v6239_v47, 0.0  ;;  %v2235_v32 = vadd.f32 %v2234_v51, %v2122_v8 }
 0x2ed   : > { %v6244_v2 = vld [vmem:[#allocation2 + $0xc8] sm:$0xff]  ;;  %v2356_v26 = vpop.f32.mrf.mxu0 }
 0x2ee   : > { %2512 = vst [vmem:[#allocation2 + $0xd9] sm:$0xff] %v7339_v48  ;;  %v2348_v33 = vadd.f32 %v2347_v30, %v2235_v32  ;;  %3672 = vmatmul.f32.gmra.mxu2 %v7391_v21  ;;  %3604 = vmatmul.f32.gmra.mxu1 %v6244_v2  ;;  %v2659_v21 = vld [vmem:[#allocation2 + $0x22] sm:$0xff] }
 0x2ef   : > { %3785 = vmatmul.f32.gmra.mxu3 %v2658_v19 }
 0x2f0   : > { %v2413_v7 = vmul.f32 %v5978_v58, %v2348_v33  ;;  %3904 = vmatmul.f32.gmra.mxu0 %v6068_v15  ;;  %v2015_v33 = vadd.f32 %v5974_v12, %v5907_v18  ;;  %v7393_v12 = vmax.f32 %v6016_v0, 0.0 }
 0x2f1   : > { %v2124_v20 = vpop.f32.mrf.mxu2 }
 0x2f2   : > { %v2237_v29 = vpop.f32.mrf.mxu3  ;;  %v6256_v51 = vadd.f32 %v5982_v28, %v2413_v7  ;;  %v2125_v30 = vadd.f32 %v2124_v20, %v2012_v4 }
 0x2f3   : > { %v6259_v32 = vpop.f32.mrf.mxu1 }
 0x2f4   : > { %v7337_v9 = vmax.f32 %v6256_v51, 0.0  ;;  %v2238_v8 = vadd.f32 %v2237_v29, %v2125_v30 }
 0x2f5   : > { %v6261_v19 = vld [vmem:[#allocation2 + $0xd8] sm:$0xff]  ;;  %v2359_v44 = vpop.f32.mrf.mxu0 }
 0x2f6   : > { %2513 = vst [vmem:[#allocation2 + $0xe1] sm:$0xff] %v7337_v9  ;;  %v2351_v15 = vadd.f32 %v2350_v45, %v2238_v8  ;;  %3675 = vmatmul.f32.gmra.mxu2 %v7392_v22  ;;  %3607 = vmatmul.f32.gmra.mxu1 %v6261_v19 }
 0x2f7   : > { %3788 = vmatmul.f32.gmra.mxu3 %v2659_v21  ;;  %v2660_v21 = vld [vmem:[#allocation2 + $0x32] sm:$0xff] }
 0x2f8   : > { %v2414_v42 = vmul.f32 %v5978_v58, %v2351_v15  ;;  %3907 = vmatmul.f32.gmra.mxu0 %v6084_v55  ;;  %v3461_v55 = vld [vmem:[#allocation4 + $0x6a0] sm:$0xff]  ;;  %v2018_v15 = vadd.f32 %v5986_v17, %v5912_v61 }
 0x2f9   : > { %v2127_v4 = vpop.f32.mrf.mxu2  ;;  %4000 = vmatpush.msrb.mxu1 %v3461_v55 }
 0x2fa   : > { %v2240_v7 = vpop.f32.mrf.mxu3  ;;  %v6273_v20 = vadd.f32 %v5982_v28, %v2414_v42  ;;  %v2128_v29 = vadd.f32 %v2127_v4, %v2015_v33 }
 0x2fb   : > { %v6276_v30 = vpop.f32.mrf.mxu1 }
 0x2fc   : > { %v7336_v45 = vmax.f32 %v6273_v20, 0.0  ;;  %v2241_v31 = vadd.f32 %v2240_v7, %v2128_v29 }
 0x2fd   : > { %v6278_v8 = vld [vmem:[#allocation2 + $0xe0] sm:$0xff]  ;;  %v2362_v22 = vpop.f32.mrf.mxu0 }
 0x2fe   : > { %2514 = vst [vmem:[#allocation2 + $0xf1] sm:$0xff] %v7336_v45  ;;  %v2354_v18 = vadd.f32 %v2353_v38, %v2241_v31  ;;  %3678 = vmatmul.f32.gmra.mxu2 %v7393_v12  ;;  %3610 = vmatmul.f32.gmra.mxu1 %v6278_v8  ;;  %v2661_v12 = vld [vmem:[#allocation2 + $0x3a] sm:$0xff]  ;;  %v2665_v45 = vld [vmem:[#allocation2 + $0x6a] sm:$0xff] }
 0x2ff   : > { %3791 = vmatmul.f32.gmra.mxu3 %v2660_v21 }
 0x300   : > { %v2415_v33 = vmul.f32 %v5978_v58, %v2354_v18  ;;  %3910 = vmatmul.f32.gmra.mxu0 %v6099_v1  ;;  %v7394_v1 = vmax.f32 %v6032_v27, 0.0  ;;  %v2021_v18 = vadd.f32 %v6003_v6, %v5915_v34  ;;  %v7395_v6 = vmax.f32 %v6048_v59, 0.0 }
 0x301   : > { %v2130_v42 = vpop.f32.mrf.mxu2 }
 0x302   : > { %v2243_v4 = vpop.f32.mrf.mxu3  ;;  %v6290_v7 = vadd.f32 %v5982_v28, %v2415_v33  ;;  %v2131_v38 = vadd.f32 %v2130_v42, %v2018_v15 }
 0x303   : > { %v6293_v31 = vpop.f32.mrf.mxu1 }
 0x304   : > { %v7334_v0 = vmax.f32 %v6290_v7, 0.0  ;;  %v2244_v29 = vadd.f32 %v2243_v4, %v2131_v38 }
 0x305   : > { %v6295_v21 = vld [vmem:[#allocation2 + $0xf0] sm:$0xff]  ;;  %v2365_v61 = vpop.f32.mrf.mxu0 }
 0x306   : > { %2515 = vst [vmem:[#allocation2 + $0xf9] sm:$0xff] %v7334_v0  ;;  %v2357_v17 = vadd.f32 %v2356_v26, %v2244_v29  ;;  %3681 = vmatmul.f32.gmra.mxu2 %v7394_v1  ;;  %3613 = vmatmul.f32.gmra.mxu1 %v6295_v21 }
 0x307   : > { %3794 = vmatmul.f32.gmra.mxu3 %v2661_v12  ;;  %v2662_v12 = vld [vmem:[#allocation2 + $0x4a] sm:$0xff] }
 0x308   : > { %v2416_v55 = vmul.f32 %v5978_v58, %v2357_v17  ;;  %3913 = vmatmul.f32.gmra.mxu0 %v6116_v43  ;;  %v3460_v43 = vld [vmem:[#allocation4 + $0x698] sm:$0xff]  ;;  %v2024_v17 = vadd.f32 %v6024_v13, %v5920_v39  ;;  %v7396_v13 = vmax.f32 %v6064_v40, 0.0 }
 0x309   : > { %v2133_v15 = vpop.f32.mrf.mxu2  ;;  %4001 = vmatpush.msrb.mxu1 %v3460_v43  ;;  %v6338_v43 = vld [vmem:[#allocation7] ss:$0 sm:$0xff] }
 0x30a   : > { %v2246_v33 = vpop.f32.mrf.mxu3  ;;  %v6307_v42 = vadd.f32 %v5982_v28, %v2416_v55  ;;  %v2134_v4 = vadd.f32 %v2133_v15, %v2021_v18 }
 0x30b   : > { %v6310_v38 = vpop.f32.mrf.mxu1 }
 0x30c   : > { %v7333_v26 = vmax.f32 %v6307_v42, 0.0  ;;  %v2247_v27 = vadd.f32 %v2246_v33, %v2134_v4 }
 0x30d   : > { %v6312_v29 = vld [vmem:[#allocation2 + $0xf8] sm:$0xff]  ;;  %v2368_v1 = vpop.f32.mrf.mxu0 }
 0x30e   : > { %2516 = vst [vmem:[#allocation2 + $0x109] sm:$0xff] %v7333_v26  ;;  %v2360_v34 = vadd.f32 %v2359_v44, %v2247_v27  ;;  %3684 = vmatmul.f32.gmra.mxu2 %v7395_v6  ;;  %3616 = vmatmul.f32.gmra.mxu1 %v6312_v29  ;;  %v2663_v6 = vld [vmem:[#allocation2 + $0x52] sm:$0xff] }
 0x30f   : > { %3797 = vmatmul.f32.gmra.mxu3 %v2662_v12 }
 0x310   : > { %v2417_v18 = vmul.f32 %v5978_v58, %v2360_v34  ;;  %3916 = vmatmul.f32.gmra.mxu0 %v6133_v5  ;;  %v7397_v58 = vld [vmem:[#allocation23_spill] sm:$0xff] }
 0x311   : > { %v2136_v55 = vpop.f32.mrf.mxu2 }
 0x312   : > { %v2249_v15 = vpop.f32.mrf.mxu3  ;;  %v6324_v33 = vadd.f32 %v5982_v28, %v2417_v18  ;;  %v2137_v44 = vadd.f32 %v2136_v55, %v2024_v17  ;;  %v7398_v28 = vld [vmem:[#allocation21_spill] sm:$0xff] }
 0x313   : > { %v6327_v27 = vpop.f32.mrf.mxu1  ;;  %v2027_v34 = vadd.f32 %v7398_v28, %v7397_v58  ;;  %v2664_v58 = vld [vmem:[#allocation2 + $0x62] sm:$0xff] }
 0x314   : > { %v7332_v59 = vmax.f32 %v6324_v33, 0.0  ;;  %v2250_v4 = vadd.f32 %v2249_v15, %v2137_v44  ;;  %v6342_v15 = vld [vmem:[#allocation9] ss:$0 sm:$0xff] }
 0x315   : > { %v6329_v12 = vld [vmem:[#allocation2 + $0x108] sm:$0xff]  ;;  %v2371_v39 = vpop.f32.mrf.mxu0 }
 0x316   : > { %2517 = vst [vmem:[#allocation2 + $0x111] sm:$0xff] %v7332_v59  ;;  %v2363_v5 = vadd.f32 %v2362_v22, %v2250_v4  ;;  %3687 = vmatmul.f32.gmra.mxu2 %v7396_v13  ;;  %3619 = vmatmul.f32.gmra.mxu1 %v6329_v12 }
 0x317   : > { %3800 = vmatmul.f32.gmra.mxu3 %v2663_v6 }
 0x318   : > { %v2418_v17 = vmul.f32 %v6338_v43, %v2363_v5  ;;  %3919 = vmatmul.f32.gmra.mxu0 %v6150_v63  ;;  %v7399_v5 = vld [vmem:[#allocation25_spill] sm:$0xff] }
 0x319   : > { %v2139_v18 = vpop.f32.mrf.mxu2  ;;  %v7400_v59 = vmax.f32 %v7399_v5, 0.0 }
 0x31a   : > { %v2252_v55 = vpop.f32.mrf.mxu3  ;;  %v6345_v22 = vadd.f32 %v6342_v15, %v2418_v17  ;;  %v2140_v40 = vadd.f32 %v2139_v18, %v2027_v34  ;;  %v3459_v17 = vld [vmem:[#allocation4 + $0x690] sm:$0xff]  ;;  %v7402_v18 = vld [vmem:[#allocation22_spill] sm:$0xff] }
 0x31b   : > { %v6348_v6 = vpop.f32.mrf.mxu1  ;;  %v7401_v34 = vld [vmem:[#allocation24_spill] sm:$0xff]  ;;  %4002 = vmatpush.msrb.mxu1 %v3459_v17 }
 0x31c   : > { %v7335_v44 = vmax.f32 %v6345_v22, 0.0  ;;  %v2253_v4 = vadd.f32 %v2252_v55, %v2140_v40  ;;  %v2030_v55 = vadd.f32 %v7402_v18, %v7401_v34  ;;  %v7406_v18 = vld [vmem:[#allocation26_spill] sm:$0xff] }
 0x31d   : > { %v6350_v13 = vld [vmem:[#allocation2 + $0x110] sm:$0xff]  ;;  %v2374_v28 = vpop.f32.mrf.mxu0 }
 0x31e   : > { %2518 = vst [vmem:[#allocation2 + $0x121] sm:$0xff] %v7335_v44  ;;  %v2366_v63 = vadd.f32 %v2365_v61, %v2253_v4  ;;  %3690 = vmatmul.f32.gmra.mxu2 %v7400_v59  ;;  %3622 = vmatmul.f32.gmra.mxu1 %v6350_v13 }
 0x31f   : > { %3803 = vmatmul.f32.gmra.mxu3 %v2664_v58 }
 0x320   : > { %v2419_v40 = vmul.f32 %v6338_v43, %v2366_v63  ;;  %3922 = vmatmul.f32.gmra.mxu0 %v6167_v10  ;;  %v7403_v63 = vld [vmem:[#allocation27_spill] sm:$0xff] }
 0x321   : > { %v2142_v26 = vpop.f32.mrf.mxu2  ;;  %v7404_v17 = vmax.f32 %v7403_v63, 0.0 }
 0x322   : > { %v2255_v0 = vpop.f32.mrf.mxu3  ;;  %v6362_v44 = vadd.f32 %v6342_v15, %v2419_v40  ;;  %v2143_v61 = vadd.f32 %v2142_v26, %v2030_v55  ;;  %v7405_v26 = vld [vmem:[#allocation14_spill] sm:$0xff] }
 0x323   : > { %v6365_v58 = vpop.f32.mrf.mxu1  ;;  %v2033_v55 = vadd.f32 %v7406_v18, %v7405_v26  ;;  %v3458_v18 = vld [vmem:[#allocation4 + $0x688] sm:$0xff] }
 0x324   : > { %v7338_v59 = vmax.f32 %v6362_v44, 0.0  ;;  %v2256_v4 = vadd.f32 %v2255_v0, %v2143_v61  ;;  %4003 = vmatpush.msrb.mxu1 %v3458_v18  ;;  %v7412_v18 = vld [vmem:[#allocation15_spill] sm:$0xff] }
 0x325   : > { %v6367_v5 = vld [vmem:[#allocation2 + $0x120] sm:$0xff]  ;;  %v2377_v34 = vpop.f32.mrf.mxu0 }
 0x326   : > { %2519 = vst [vmem:[#allocation2 + $0x129] sm:$0xff] %v7338_v59  ;;  %v2369_v10 = vadd.f32 %v2368_v1, %v2256_v4  ;;  %3693 = vmatmul.f32.gmra.mxu2 %v7404_v17  ;;  %3625 = vmatmul.f32.gmra.mxu1 %v6367_v5  ;;  %v2666_v17 = vld [vmem:[#allocation2 + $0x7a] sm:$0xff] }
 0x327   : > { %3806 = vmatmul.f32.gmra.mxu3 %v2665_v45 }
 0x328   : > { %v2420_v0 = vmul.f32 %v6338_v43, %v2369_v10  ;;  %3925 = vmatmul.f32.gmra.mxu0 %v6180_v3  ;;  %v7407_v3 = vld [vmem:[#allocation29_spill] sm:$0xff] }
 0x329   : > { %v2145_v40 = vpop.f32.mrf.mxu2  ;;  %v7408_v26 = vmax.f32 %v7407_v3, 0.0 }
 0x32a   : > { %v2258_v61 = vpop.f32.mrf.mxu3  ;;  %v6379_v9 = vadd.f32 %v6342_v15, %v2420_v0  ;;  %v2146_v59 = vadd.f32 %v2145_v40, %v2033_v55  ;;  %v7409_v55 = vld [vmem:[#allocation17_spill] sm:$0xff]  ;;  %v7410_v0 = vld [vmem:[#allocation28_spill] sm:$0xff] }
 0x32b   : > { %v6382_v63 = vpop.f32.mrf.mxu1 }
 0x32c   : > { %v7341_v1 = vmax.f32 %v6379_v9, 0.0  ;;  %v2259_v4 = vadd.f32 %v2258_v61, %v2146_v59  ;;  %v2036_v59 = vadd.f32 %v7410_v0, %v7409_v55  ;;  %v7413_v0 = vld [vmem:[#allocation30_spill] sm:$0xff] }
 0x32d   : > { %v6384_v45 = vld [vmem:[#allocation2 + $0x128] sm:$0xff]  ;;  %v2380_v48 = vpop.f32.mrf.mxu0 }
 0x32e   : > { %2520 = vst [vmem:[#allocation2 + $0x139] sm:$0xff] %v7341_v1  ;;  %v2372_v10 = vadd.f32 %v2371_v39, %v2259_v4  ;;  %3696 = vmatmul.f32.gmra.mxu2 %v7408_v26  ;;  %3628 = vmatmul.f32.gmra.mxu1 %v6384_v45 }
 0x32f   : > { %3809 = vmatmul.f32.gmra.mxu3 %v2666_v17 }
 0x330   : > { %v2421_v40 = vmul.f32 %v6338_v43, %v2372_v10  ;;  %3928 = vmatmul.f32.gmra.mxu0 %v6197_v23  ;;  %v7411_v10 = vmax.f32 %v6130_v35, 0.0 }
 0x331   : > { %v2148_v61 = vpop.f32.mrf.mxu2 }
 0x332   : > { %v2261_v25 = vpop.f32.mrf.mxu3  ;;  %v6396_v1 = vadd.f32 %v6342_v15, %v2421_v40  ;;  %v2149_v39 = vadd.f32 %v2148_v61, %v2036_v59 }
 0x333   : > { %v6399_v3 = vpop.f32.mrf.mxu1 }
 0x334   : > { %v7343_v4 = vmax.f32 %v6396_v1, 0.0  ;;  %v2262_v17 = vadd.f32 %v2261_v25, %v2149_v39  ;;  %v2039_v25 = vadd.f32 %v7413_v0, %v7412_v18  ;;  %v3457_v18 = vld [vmem:[#allocation4 + $0x680] sm:$0xff]  ;;  %v7415_v0 = vld [vmem:[#allocation19_spill] sm:$0xff] }
 0x335   : > { %v6401_v26 = vld [vmem:[#allocation2 + $0x138] sm:$0xff]  ;;  %v6403_v55 = vpop.f32.mrf.mxu0  ;;  %4004 = vmatpush.msrb.mxu1 %v3457_v18  ;;  %v3504_v18 = vld [vmem:[#allocation4 + $0x7f8] sm:$0xff] }
 0x336   : > { %2521 = vst [vmem:[#allocation2 + $0x141] sm:$0xff] %v7343_v4  ;;  %v2375_v23 = vadd.f32 %v2374_v28, %v2262_v17  ;;  %3699 = vmatmul.f32.gmra.mxu2 %v7411_v10  ;;  %3631 = vmatmul.f32.gmra.mxu1 %v6401_v26  ;;  %v2668_v10 = vld [vmem:[#allocation2 + $0x92] sm:$0xff] }
 0x337   : > { %3812 = vmatmul.f32.gmra.mxu3 %v2667_v50 }
 0x338   : > { %v2422_v59 = vmul.f32 %v6338_v43, %v2375_v23  ;;  %3931 = vmatmul.f32.gmra.mxu0 %v6214_v36  ;;  %v7414_v23 = vmax.f32 %v6147_v14, 0.0  ;;  %4215 = vmatpush.msra.mxu3 %v3504_v18 }
 0x339   : > { %v2151_v40 = vpop.f32.mrf.mxu2 }
 0x33a   : > { %v2264_v61 = vpop.f32.mrf.mxu3  ;;  %v6415_v39 = vadd.f32 %v6342_v15, %v2422_v59  ;;  %v2152_v4 = vadd.f32 %v2151_v40, %v2039_v25 }
 0x33b   : > { %v6418_v17 = vpop.f32.mrf.mxu1 }
 0x33c   : > { %v7345_v28 = vmax.f32 %v6415_v39, 0.0  ;;  %v2265_v35 = vadd.f32 %v2264_v61, %v2152_v4  ;;  %v7416_v4 = vld [vmem:[#allocation31_spill] sm:$0xff] }
 0x33d   : > { %v6420_v50 = vld [vmem:[#allocation2 + $0x140] sm:$0xff]  ;;  %v6422_v41 = vpop.f32.mrf.mxu0  ;;  %v2042_v25 = vadd.f32 %v7416_v4, %v7415_v0  ;;  %v3520_v4 = vld [vmem:[#allocation4 + $0x878] sm:$0xff] }
 0x33e   : > { %2522 = vst [vmem:[#allocation2 + $0x151] sm:$0xff] %v7345_v28  ;;  %v2378_v36 = vadd.f32 %v2377_v34, %v2265_v35  ;;  %3702 = vmatmul.f32.gmra.mxu2 %v7414_v23  ;;  %3634 = vmatmul.f32.gmra.mxu1 %v6420_v50 }
 0x33f   : > { %3815 = vmatmul.f32.gmra.mxu3 %v2668_v10  ;;  %4328 = vmatpush.msra.mxu0 %v3520_v4  ;;  %v7418_v4 = vmax.f32 %v6177_v49, 0.0 }
 0x340   : > { %v2423_v59 = vmul.f32 %v6338_v43, %v2378_v36  ;;  %3934 = vmatmul.f32.gmra.mxu0 %v6229_v56  ;;  %v3488_v36 = vld [vmem:[#allocation4 + $0x778] sm:$0xff] }
 0x341   : > { %v2154_v40 = vpop.f32.mrf.mxu2  ;;  %4102 = vmatpush.msra.mxu2 %v3488_v36 }
 0x342   : > { %v2267_v61 = vpop.f32.mrf.mxu3  ;;  %v6434_v28 = vadd.f32 %v6342_v15, %v2423_v59  ;;  %v2155_v34 = vadd.f32 %v2154_v40, %v2042_v25  ;;  %v3536_v25 = vld [vmem:[#allocation4 + $0x8f8] sm:$0xff] }
 0x343   : > { %v6437_v10 = vpop.f32.mrf.mxu1  ;;  %v7417_v59 = vld [vmem:[#allocation16_spill] sm:$0xff]  ;;  %4441 = vmatpush.msra.mxu1 %v3536_v25  ;;  %v7419_v25 = vld [vmem:[#allocation18_spill] sm:$0xff] }
 0x344   : > { %v7347_v14 = vmax.f32 %v6434_v28, 0.0  ;;  %v2268_v35 = vadd.f32 %v2267_v61, %v2155_v34  ;;  %v2045_v40 = vadd.f32 %v6164_v57, %v7417_v59  ;;  %v3503_v57 = vld [vmem:[#allocation4 + $0x7f0] sm:$0xff] }
 0x345   : > { %v6439_v23 = vld [vmem:[#allocation2 + $0x150] sm:$0xff]  ;;  %v6441_v0 = vpop.f32.mrf.mxu0  ;;  %4216 = vmatpush.msra.mxu3 %v3503_v57  ;;  %v3519_v57 = vld [vmem:[#allocation4 + $0x870] sm:$0xff] }
 0x346   : > { %2523 = vst [vmem:[#allocation2 + $0x159] sm:$0xff] %v7347_v14  ;;  %v2381_v56 = vadd.f32 %v2380_v48, %v2268_v35  ;;  %3705 = vmatmul.f32.gmra.mxu2 %v2475_v37  ;;  %3637 = vmatmul.f32.gmra.mxu1 %v6439_v23  ;;  %v3487_v14 = vld [vmem:[#allocation4 + $0x770] sm:$0xff] }
 0x347   : > { %3818 = vmatmul.f32.gmra.mxu3 %v2669_v53  ;;  %4103 = vmatpush.msra.mxu2 %v3487_v14 }
 0x348   : > { %v2424_v61 = vmul.f32 %v6338_v43, %v2381_v56  ;;  %3937 = vmatmul.f32.gmra.mxu0 %v6244_v2  ;;  %v2670_v56 = vld [vmem:[#allocation2 + $0xaa] sm:$0xff] }
 0x349   : > { %v2157_v48 = vpop.f32.mrf.mxu2  ;;  %4329 = vmatpush.msra.mxu0 %v3519_v57 }
 0x34a   : > { %v2270_v34 = vpop.f32.mrf.mxu3  ;;  %v6453_v16 = vadd.f32 %v6342_v15, %v2424_v61  ;;  %v2158_v37 = vadd.f32 %v2157_v48, %v2045_v40  ;;  %v2048_v40 = vadd.f32 %v6182_v46, %v7419_v25  ;;  %v3535_v25 = vld [vmem:[#allocation4 + $0x8f0] sm:$0xff] }
 0x34b   : > { %v6456_v36 = vpop.f32.mrf.mxu1  ;;  %4442 = vmatpush.msra.mxu1 %v3535_v25 }
 0x34c   : > { %v7349_v53 = vmax.f32 %v6453_v16, 0.0  ;;  %v2271_v35 = vadd.f32 %v2270_v34, %v2158_v37 }
 0x34d   : > { %v6458_v59 = vld [vmem:[#allocation2 + $0x158] sm:$0xff]  ;;  %v6460_v2 = vpop.f32.mrf.mxu0 }
 0x34e   : > { %2524 = vst [vmem:[#allocation2 + $0x169] sm:$0xff] %v7349_v53  ;;  %v2384_v18 = vadd.f32 %v6403_v55, %v2271_v35  ;;  %3708 = vmatmul.f32.gmra.mxu2 %v7418_v4  ;;  %3640 = vmatmul.f32.gmra.mxu1 %v6458_v59  ;;  %v2671_v4 = vld [vmem:[#allocation2 + $0xb2] sm:$0xff] }
 0x34f   : > { %3821 = vmatmul.f32.gmra.mxu3 %v2670_v56 }
 0x350   : > { %v2425_v61 = vmul.f32 %v6338_v43, %v2384_v18  ;;  %3940 = vmatmul.f32.gmra.mxu0 %v6261_v19  ;;  %v7421_v18 = vmax.f32 %v6194_v62, 0.0 }
 0x351   : > { %v2160_v14 = vpop.f32.mrf.mxu2 }
 0x352   : > { %v2273_v48 = vpop.f32.mrf.mxu3  ;;  %v6473_v34 = vadd.f32 %v6342_v15, %v2425_v61  ;;  %v2161_v37 = vadd.f32 %v2160_v14, %v2048_v40  ;;  %v7422_v40 = vld [vmem:[#allocation20_spill] sm:$0xff] }
 0x353   : > { %v6476_v35 = vpop.f32.mrf.mxu1  ;;  %v2051_v61 = vadd.f32 %v6206_v54, %v7422_v40 }
 0x354   : > { %7420 = vst [vmem:[#allocation23_spill] sm:$0xff] %v6473_v34  ;;  %v7348_v55 = vmax.f32 %v6473_v34, 0.0  ;;  %v2274_v49 = vadd.f32 %v2273_v48, %v2161_v37  ;;  %v2672_v34 = vld [vmem:[#allocation2 + $0xc2] sm:$0xff] }
 0x355   : > { %v6478_v56 = vld [vmem:[#allocation2 + $0x168] sm:$0xff]  ;;  %v6480_v46 = vpop.f32.mrf.mxu0 }
 0x356   : > { %2525 = vst [vmem:[#allocation2 + $0x171] sm:$0xff] %v7348_v55  ;;  %v2387_v19 = vadd.f32 %v6422_v41, %v2274_v49  ;;  %3711 = vmatmul.f32.gmra.mxu2 %v7421_v18  ;;  %3643 = vmatmul.f32.gmra.mxu1 %v6478_v56  ;;  %v3502_v55 = vld [vmem:[#allocation4 + $0x7e8] sm:$0xff] }
 0x357   : > { %3824 = vmatmul.f32.gmra.mxu3 %v2671_v4  ;;  %v3486_v4 = vld [vmem:[#allocation4 + $0x768] sm:$0xff] }
 0x358   : > { %v2426_v14 = vmul.f32 %v6338_v43, %v2387_v19  ;;  %3943 = vmatmul.f32.gmra.mxu0 %v6278_v8  ;;  %4104 = vmatpush.msra.mxu2 %v3486_v4  ;;  %v7423_v19 = vmax.f32 %v6211_v52, 0.0  ;;  %v2673_v52 = vld [vmem:[#allocation2 + $0xca] sm:$0xff] }
 0x359   : > { %v2163_v48 = vpop.f32.mrf.mxu2  ;;  %4217 = vmatpush.msra.mxu3 %v3502_v55 }
 0x35a   : > { %v2276_v37 = vpop.f32.mrf.mxu3  ;;  %v2462_v57 = vadd.f32 %v6342_v15, %v2426_v14  ;;  %v2164_v41 = vadd.f32 %v2163_v48, %v2051_v61 }
 0x35b   : > { %v6493_v18 = vpop.f32.mrf.mxu1 }
 0x35c   : > { %v2494_v49 = vmax.f32 %v2462_v57, 0.0  ;;  %v2277_v62 = vadd.f32 %v2276_v37, %v2164_v41 }
 0x35d   : > { %v6495_v53 = vld [vmem:[#allocation2 + $0x170] sm:$0xff]  ;;  %v3899_v54 = vpop.f32.mrf.mxu0 }
 0x35e   : > { %2526 = vst [vmem:[#allocation2 + $0x181] sm:$0xff] %v2494_v49  ;;  %v2390_v8 = vadd.f32 %v6441_v0, %v2277_v62  ;;  %3714 = vmatmul.f32.gmra.mxu2 %v7423_v19  ;;  %3646 = vmatmul.f32.gmra.mxu1 %v6495_v53  ;;  %v3518_v0 = vld [vmem:[#allocation4 + $0x868] sm:$0xff]  ;;  %v3485_v19 = vld [vmem:[#allocation4 + $0x760] sm:$0xff] }
 0x35f   : > { %3827 = vmatmul.f32.gmra.mxu3 %v2672_v34  ;;  %4330 = vmatpush.msra.mxu0 %v3518_v0  ;;  %v7424_v34 = vmax.f32 %v6226_v60, 0.0  ;;  %v3501_v60 = vld [vmem:[#allocation4 + $0x7e0] sm:$0xff] }
 0x360   : > { %v2427_v25 = vmul.f32 %v6338_v43, %v2390_v8  ;;  %3946 = vmatmul.f32.gmra.mxu0 %v6295_v21  ;;  %v2784_v21 = vld [vmem:[#allocation2 + $0x19] sm:$0xff]  ;;  %4105 = vmatpush.msra.mxu2 %v3485_v19  ;;  %v3517_v0 = vld [vmem:[#allocation4 + $0x860] sm:$0xff] }
 0x361   : > { %v3667_v40 = vpop.f32.mrf.mxu2  ;;  %4218 = vmatpush.msra.mxu3 %v3501_v60  ;;  %4331 = vmatpush.msra.mxu0 %v3517_v0  ;;  %v2676_v19 = vld [vmem:[#allocation2 + $0xf2] sm:$0xff]  ;;  %v7428_v0 = vmax.f32 %v6290_v7, 0.0  ;;  %v3483_v7 = vld [vmem:[#allocation4 + $0x750] sm:$0xff] }
 0x362   : > { %v3780_v61 = vpop.f32.mrf.mxu3  ;;  %v2463_v14 = vadd.f32 %v6342_v15, %v2427_v25  ;;  %v3668_v48 = vadd.f32 %v3667_v40, %v6222_v24  ;;  %v3534_v15 = vld [vmem:[#allocation4 + $0x8e8] sm:$0xff] }
 0x363   : > { %v6505_v57 = vpop.f32.mrf.mxu1  ;;  %4443 = vmatpush.msra.mxu1 %v3534_v15  ;;  %v2674_v25 = vld [vmem:[#allocation2 + $0xda] sm:$0xff] }
 0x364   : > { %v2495_v55 = vmax.f32 %v2463_v14, 0.0  ;;  %v3781_v37 = vadd.f32 %v3780_v61, %v3668_v48  ;;  %v2785_v61 = vld [vmem:[#allocation2 + $0x21] sm:$0xff] }
 0x365   : > { %v3902_v41 = vpop.f32.mrf.mxu0 }
 0x366   : > { %2527 = vst [vmem:[#allocation2 + $0x189] sm:$0xff] %v2495_v55  ;;  %3717 = vmatmul.f32.gmra.mxu2 %v7424_v34  ;;  %v6510_v43 = vadd.f32 %v6460_v2, %v3781_v37  ;;  %4005 = vmatmul.f32.vlgmr.msrb.gmra.mxu1 %v2784_v21  ;;  %v7425_v2 = vmax.f32 %v6239_v47, 0.0  ;;  %v7426_v47 = vmax.f32 %v6256_v51, 0.0  ;;  %v3484_v51 = vld [vmem:[#allocation4 + $0x758] sm:$0xff] }
 0x367   : > { %3830 = vmatmul.f32.gmra.mxu3 %v2673_v52  ;;  %v2675_v52 = vld [vmem:[#allocation2 + $0xe2] sm:$0xff]  ;;  %4106 = vmatpush.msra.mxu2 %v3484_v51 }
 0x368   : > { %3949 = vmatmul.f32.gmra.mxu0 %v6312_v29 }
 0x369   : > { %v3670_v24 = vpop.f32.mrf.mxu2  ;;  %4107 = vmatpush.msra.mxu2 %v3483_v7 }
 0x36a   : > { %v3783_v49 = vpop.f32.mrf.mxu3  ;;  %v3671_v62 = vadd.f32 %v3670_v24, %v6241_v11 }
 0x36b   : > { %v6514_v8 = vpop.f32.mrf.mxu1 }
 0x36c   : > { %v3784_v4 = vadd.f32 %v3783_v49, %v3671_v62 }
 0x36d   : > { %v3905_v40 = vpop.f32.mrf.mxu0 }
 0x36e   : > { %3720 = vmatmul.f32.gmra.mxu2 %v7425_v2  ;;  %v6519_v29 = vadd.f32 %v6480_v46, %v3784_v4  ;;  %4008 = vmatmul.f32.gmra.mxu1 %v2785_v61  ;;  %v6527_v46 = vld [vmem:[#allocation2 + $0x31] sm:$0xff]  ;;  %v3500_v4 = vld [vmem:[#allocation4 + $0x7d8] sm:$0xff] }
 0x36f   : > { %3833 = vmatmul.f32.gmra.mxu3 %v2674_v25  ;;  %v6538_v25 = vld [vmem:[#allocation2 + $0x39] sm:$0xff] }
 0x370   : > { %3952 = vmatmul.f32.gmra.mxu0 %v6329_v12  ;;  %v3533_v12 = vld [vmem:[#allocation4 + $0x8e0] sm:$0xff]  ;;  %4219 = vmatpush.msra.mxu3 %v3500_v4 }
 0x371   : > { %v3673_v11 = vpop.f32.mrf.mxu2  ;;  %4444 = vmatpush.msra.mxu1 %v3533_v12  ;;  %v6560_v4 = vld [vmem:[#allocation2 + $0x51] sm:$0xff] }
 0x372   : > { %v3786_v14 = vpop.f32.mrf.mxu3  ;;  %v3674_v48 = vadd.f32 %v3673_v11, %v6259_v32 }
 0x373   : > { %v6523_v37 = vpop.f32.mrf.mxu1 }
 0x374   : > { %v3787_v55 = vadd.f32 %v3786_v14, %v3674_v48  ;;  %v3516_v48 = vld [vmem:[#allocation4 + $0x858] sm:$0xff] }
 0x375   : > { %v3908_v34 = vpop.f32.mrf.mxu0  ;;  %4332 = vmatpush.msra.mxu0 %v3516_v48  ;;  %v7430_v48 = vmax.f32 %v6324_v33, 0.0  ;;  %v3482_v33 = vld [vmem:[#allocation4 + $0x748] sm:$0xff] }
 0x376   : > { %3723 = vmatmul.f32.gmra.mxu2 %v7426_v47  ;;  %v6529_v21 = vadd.f32 %v3899_v54, %v3787_v55  ;;  %4011 = vmatmul.f32.gmra.mxu1 %v6527_v46  ;;  %v7427_v54 = vmax.f32 %v6273_v20, 0.0  ;;  %v2677_v55 = vld [vmem:[#allocation2 + $0xfa] sm:$0xff] }
 0x377   : > { %3836 = vmatmul.f32.gmra.mxu3 %v2675_v52  ;;  %4108 = vmatpush.msra.mxu2 %v3482_v33  ;;  %v2682_v33 = vld [vmem:[#allocation2 + $0x13a] sm:$0xff] }
 0x378   : > { %3955 = vmatmul.f32.gmra.mxu0 %v6350_v13 }
 0x379   : > { %v3676_v32 = vpop.f32.mrf.mxu2 }
 0x37a   : > { %v3789_v15 = vpop.f32.mrf.mxu3  ;;  %v3677_v24 = vadd.f32 %v3676_v32, %v6276_v30 }
 0x37b   : > { %v6534_v62 = vpop.f32.mrf.mxu1 }
 0x37c   : > { %v3790_v49 = vadd.f32 %v3789_v15, %v3677_v24  ;;  %v3499_v24 = vld [vmem:[#allocation4 + $0x7d0] sm:$0xff] }
 0x37d   : > { %v3911_v60 = vpop.f32.mrf.mxu0  ;;  %4220 = vmatpush.msra.mxu3 %v3499_v24 }
 0x37e   : > { %3726 = vmatmul.f32.gmra.mxu2 %v7427_v54  ;;  %v6540_v13 = vadd.f32 %v3902_v41, %v3790_v49  ;;  %4014 = vmatmul.f32.gmra.mxu1 %v6538_v25  ;;  %v6549_v41 = vld [vmem:[#allocation2 + $0x49] sm:$0xff] }
 0x37f   : > { %3839 = vmatmul.f32.gmra.mxu3 %v2676_v19  ;;  %v2678_v49 = vld [vmem:[#allocation2 + $0x10a] sm:$0xff] }
 0x380   : > { %3958 = vmatmul.f32.gmra.mxu0 %v6367_v5  ;;  %v3532_v5 = vld [vmem:[#allocation4 + $0x8d8] sm:$0xff] }
 0x381   : > { %v3679_v30 = vpop.f32.mrf.mxu2  ;;  %4445 = vmatpush.msra.mxu1 %v3532_v5 }
 0x382   : > { %v3792_v2 = vpop.f32.mrf.mxu3  ;;  %v3680_v61 = vadd.f32 %v3679_v30, %v6293_v31 }
 0x383   : > { %v6545_v14 = vpop.f32.mrf.mxu1 }
 0x384   : > { %v3793_v11 = vadd.f32 %v3792_v2, %v3680_v61  ;;  %v3515_v61 = vld [vmem:[#allocation4 + $0x850] sm:$0xff] }
 0x385   : > { %v3914_v20 = vpop.f32.mrf.mxu0  ;;  %4333 = vmatpush.msra.mxu0 %v3515_v61  ;;  %v7432_v61 = vmax.f32 %v6362_v44, 0.0  ;;  %v3481_v44 = vld [vmem:[#allocation4 + $0x740] sm:$0xff] }
 0x386   : > { %3729 = vmatmul.f32.gmra.mxu2 %v7428_v0  ;;  %v6551_v52 = vadd.f32 %v3905_v40, %v3793_v11  ;;  %4017 = vmatmul.f32.gmra.mxu1 %v6549_v41  ;;  %v7429_v40 = vmax.f32 %v6307_v42, 0.0  ;;  %v2679_v11 = vld [vmem:[#allocation2 + $0x112] sm:$0xff] }
 0x387   : > { %3842 = vmatmul.f32.gmra.mxu3 %v2677_v55  ;;  %4109 = vmatpush.msra.mxu2 %v3481_v44 }
 0x388   : > { %3961 = vmatmul.f32.gmra.mxu0 %v6384_v45 }
 0x389   : > { %v3682_v31 = vpop.f32.mrf.mxu2 }
 0x38a   : > { %v3795_v47 = vpop.f32.mrf.mxu3  ;;  %v3683_v12 = vadd.f32 %v3682_v31, %v6310_v38 }
 0x38b   : > { %v6556_v15 = vpop.f32.mrf.mxu1 }
 0x38c   : > { %v3796_v32 = vadd.f32 %v3795_v47, %v3683_v12  ;;  %v3498_v12 = vld [vmem:[#allocation4 + $0x7c8] sm:$0xff] }
 0x38d   : > { %v3917_v51 = vpop.f32.mrf.mxu0  ;;  %4221 = vmatpush.msra.mxu3 %v3498_v12 }
 0x38e   : > { %3732 = vmatmul.f32.gmra.mxu2 %v7429_v40  ;;  %v6562_v45 = vadd.f32 %v3908_v34, %v3796_v32  ;;  %4020 = vmatmul.f32.gmra.mxu1 %v6560_v4  ;;  %v6571_v34 = vld [vmem:[#allocation2 + $0x61] sm:$0xff] }
 0x38f   : > { %3845 = vmatmul.f32.gmra.mxu3 %v2678_v49  ;;  %v2680_v32 = vld [vmem:[#allocation2 + $0x122] sm:$0xff] }
 0x390   : > { %3964 = vmatmul.f32.gmra.mxu0 %v6401_v26  ;;  %v3531_v26 = vld [vmem:[#allocation4 + $0x8d0] sm:$0xff] }
 0x391   : > { %v3685_v38 = vpop.f32.mrf.mxu2  ;;  %4446 = vmatpush.msra.mxu1 %v3531_v26 }
 0x392   : > { %v3798_v19 = vpop.f32.mrf.mxu3  ;;  %v3686_v54 = vadd.f32 %v3685_v38, %v6327_v27 }
 0x393   : > { %v6567_v2 = vpop.f32.mrf.mxu1 }
 0x394   : > { %v3799_v30 = vadd.f32 %v3798_v19, %v3686_v54  ;;  %v3514_v54 = vld [vmem:[#allocation4 + $0x848] sm:$0xff] }
 0x395   : > { %v3920_v42 = vpop.f32.mrf.mxu0  ;;  %4334 = vmatpush.msra.mxu0 %v3514_v54 }
 0x396   : > { %3735 = vmatmul.f32.gmra.mxu2 %v7430_v48  ;;  %v6573_v55 = vadd.f32 %v3911_v60, %v3799_v30  ;;  %4023 = vmatmul.f32.gmra.mxu1 %v6571_v34  ;;  %v7431_v60 = vmax.f32 %v6345_v22, 0.0  ;;  %v2681_v30 = vld [vmem:[#allocation2 + $0x12a] sm:$0xff] }
 0x397   : > { %3848 = vmatmul.f32.gmra.mxu3 %v2679_v11 }
 0x398   : > { %3967 = vmatmul.f32.gmra.mxu0 %v6420_v50  ;;  %v6584_v50 = vld [vmem:[#allocation2 + $0x69] sm:$0xff] }
 0x399   : > { %v3688_v27 = vpop.f32.mrf.mxu2 }
 0x39a   : > { %v3801_v0 = vpop.f32.mrf.mxu3  ;;  %v3689_v5 = vadd.f32 %v3688_v27, %v6348_v6 }
 0x39b   : > { %v6578_v47 = vpop.f32.mrf.mxu1 }
 0x39c   : > { %v3802_v31 = vadd.f32 %v3801_v0, %v3689_v5  ;;  %v3497_v5 = vld [vmem:[#allocation4 + $0x7c0] sm:$0xff] }
 0x39d   : > { %v6580_v7 = vpop.f32.mrf.mxu0  ;;  %4222 = vmatpush.msra.mxu3 %v3497_v5  ;;  %v3477_v5 = vld [vmem:[#allocation4 + $0x720] sm:$0xff] }
 0x39e   : > { %3738 = vmatmul.f32.gmra.mxu2 %v7431_v60  ;;  %v6586_v24 = vadd.f32 %v3914_v20, %v3802_v31  ;;  %4026 = vmatmul.f32.gmra.mxu1 %v6584_v50  ;;  %v6597_v20 = vld [vmem:[#allocation2 + $0x79] sm:$0xff]  ;;  %v3513_v31 = vld [vmem:[#allocation4 + $0x840] sm:$0xff]  ;;  %v3496_v60 = vld [vmem:[#allocation4 + $0x7b8] sm:$0xff] }
 0x39f   : > { %3851 = vmatmul.f32.gmra.mxu3 %v2680_v32  ;;  %4335 = vmatpush.msra.mxu0 %v3513_v31  ;;  %v3529_v31 = vld [vmem:[#allocation4 + $0x8c0] sm:$0xff] }
 0x3a0   : > { %3970 = vmatmul.f32.gmra.mxu0 %v6439_v23  ;;  %v3530_v23 = vld [vmem:[#allocation4 + $0x8c8] sm:$0xff]  ;;  %4223 = vmatpush.msra.mxu3 %v3496_v60  ;;  %v3476_v60 = vld [vmem:[#allocation4 + $0x718] sm:$0xff] }
 0x3a1   : > { %v3691_v6 = vpop.f32.mrf.mxu2  ;;  %4447 = vmatpush.msra.mxu1 %v3530_v23  ;;  %v2683_v23 = vld [vmem:[#allocation2 + $0x142] sm:$0xff] }
 0x3a2   : > { %v3804_v49 = vpop.f32.mrf.mxu3  ;;  %v3692_v40 = vadd.f32 %v3691_v6, %v6365_v58  ;;  %v3512_v6 = vld [vmem:[#allocation4 + $0x838] sm:$0xff] }
 0x3a3   : > { %v6591_v19 = vpop.f32.mrf.mxu1  ;;  %4336 = vmatpush.msra.mxu0 %v3512_v6  ;;  %4448 = vmatpush.msra.mxu1 %v3529_v31  ;;  %v3473_v31 = vld [vmem:[#allocation4 + $0x700] sm:$0xff] }
 0x3a4   : > { %v3805_v38 = vadd.f32 %v3804_v49, %v3692_v40 }
 0x3a5   : > { %v6593_v22 = vpop.f32.mrf.mxu0 }
 0x3a6   : > { %3741 = vmatmul.f32.gmra.mxu2 %v7432_v61  ;;  %v6599_v11 = vadd.f32 %v3917_v51, %v3805_v38  ;;  %4029 = vmatmul.f32.gmra.mxu1 %v6597_v20  ;;  %v7433_v51 = vmax.f32 %v6379_v9, 0.0  ;;  %v3511_v61 = vld [vmem:[#allocation4 + $0x830] sm:$0xff] }
 0x3a7   : > { %3854 = vmatmul.f32.gmra.mxu3 %v2681_v30  ;;  %v3495_v30 = vld [vmem:[#allocation4 + $0x7b0] sm:$0xff]  ;;  %4337 = vmatpush.msra.mxu0 %v3511_v61  ;;  %v7435_v61 = vmax.f32 %v6415_v39, 0.0 }
 0x3a8   : > { %3973 = vmatmul.f32.gmra.mxu0 %v6458_v59  ;;  %v6610_v59 = vld [vmem:[#allocation2 + $0x81] sm:$0xff]  ;;  %4224 = vmatpush.msra.mxu3 %v3495_v30 }
 0x3a9   : > { %v3694_v58 = vpop.f32.mrf.mxu2  ;;  %v3491_v30 = vld [vmem:[#allocation4 + $0x790] sm:$0xff] }
 0x3aa   : > { %v3807_v48 = vpop.f32.mrf.mxu3  ;;  %v3695_v26 = vadd.f32 %v3694_v58, %v6382_v63  ;;  %v3480_v63 = vld [vmem:[#allocation4 + $0x738] sm:$0xff] }
 0x3ab   : > { %v6604_v0 = vpop.f32.mrf.mxu1  ;;  %4110 = vmatpush.msra.mxu2 %v3480_v63 }
 0x3ac   : > { %v3808_v27 = vadd.f32 %v3807_v48, %v3695_v26  ;;  %v3478_v48 = vld [vmem:[#allocation4 + $0x728] sm:$0xff] }
 0x3ad   : > { %v6606_v12 = vpop.f32.mrf.mxu0  ;;  %v6623_v26 = vld [vmem:[#allocation2 + $0x91] sm:$0xff] }
 0x3ae   : > { %3744 = vmatmul.f32.gmra.mxu2 %v7433_v51  ;;  %v6612_v32 = vadd.f32 %v3920_v42, %v3808_v27  ;;  %4032 = vmatmul.f32.gmra.mxu1 %v6610_v59  ;;  %v3479_v42 = vld [vmem:[#allocation4 + $0x730] sm:$0xff]  ;;  %v3494_v27 = vld [vmem:[#allocation4 + $0x7a8] sm:$0xff]  ;;  %v3509_v51 = vld [vmem:[#allocation4 + $0x820] sm:$0xff] }
 0x3af   : > { %3857 = vmatmul.f32.gmra.mxu3 %v2682_v33  ;;  %4111 = vmatpush.msra.mxu2 %v3479_v42  ;;  %v3493_v33 = vld [vmem:[#allocation4 + $0x7a0] sm:$0xff] }
 0x3b0   : > { %3976 = vmatmul.f32.gmra.mxu0 %v6478_v56  ;;  %v7434_v56 = vmax.f32 %v6396_v1, 0.0  ;;  %4225 = vmatpush.msra.mxu3 %v3494_v27  ;;  %v2750_v27 = vld [vmem:[#allocation2 + $0x180] sm:$0xff] }
 0x3b1   : > { %v3697_v49 = vpop.f32.mrf.mxu2  ;;  %4112 = vmatpush.msra.mxu2 %v3478_v48  ;;  %v3474_v48 = vld [vmem:[#allocation4 + $0x708] sm:$0xff] }
 0x3b2   : > { %v3810_v40 = vpop.f32.mrf.mxu3  ;;  %v3698_v9 = vadd.f32 %v3697_v49, %v6399_v3  ;;  %v3510_v3 = vld [vmem:[#allocation4 + $0x828] sm:$0xff]  ;;  %v3508_v49 = vld [vmem:[#allocation4 + $0x818] sm:$0xff]  ;;  %4226 = vmatpush.msra.mxu3 %v3493_v33 }
 0x3b3   : > { %v6617_v54 = vpop.f32.mrf.mxu1  ;;  %4338 = vmatpush.msra.mxu0 %v3510_v3  ;;  %4113 = vmatpush.msra.mxu2 %v3477_v5  ;;  %v3490_v3 = vld [vmem:[#allocation4 + $0x788] sm:$0xff] }
 0x3b4   : > { %v3811_v38 = vadd.f32 %v3810_v40, %v3698_v9  ;;  %v3506_v5 = vld [vmem:[#allocation4 + $0x808] sm:$0xff] }
 0x3b5   : > { %v6619_v58 = vpop.f32.mrf.mxu0  ;;  %4339 = vmatpush.msra.mxu0 %v3509_v51  ;;  %4114 = vmatpush.msra.mxu2 %v3476_v60  ;;  %v3489_v51 = vld [vmem:[#allocation4 + $0x780] sm:$0xff] }
 0x3b6   : > { %3747 = vmatmul.f32.gmra.mxu2 %v7434_v56  ;;  %v6626_v44 = vadd.f32 %v6580_v7, %v3811_v38  ;;  %4035 = vmatmul.f32.gmra.mxu1 %v6623_v26  ;;  %v3492_v7 = vld [vmem:[#allocation4 + $0x798] sm:$0xff]  ;;  %v2684_v38 = vld [vmem:[#allocation2 + $0x152] sm:$0xff] }
 0x3b7   : > { %3860 = vmatmul.f32.gmra.mxu3 %v2683_v23  ;;  %4340 = vmatpush.msra.mxu0 %v3508_v49  ;;  %v3507_v23 = vld [vmem:[#allocation4 + $0x810] sm:$0xff]  ;;  %v7437_v49 = vmax.f32 %v6434_v28, 0.0  ;;  %v2686_v28 = vld [vmem:[#allocation2 + $0x16a] sm:$0xff] }
 0x3b8   : > { %3979 = vmatmul.f32.gmra.mxu0 %v6495_v53  ;;  %v3475_v53 = vld [vmem:[#allocation4 + $0x710] sm:$0xff]  ;;  %4227 = vmatpush.msra.mxu3 %v3492_v7 }
 0x3b9   : > { %v3700_v1 = vpop.f32.mrf.mxu2  ;;  %4115 = vmatpush.msra.mxu2 %v3475_v53  ;;  %4341 = vmatpush.msra.mxu0 %v3507_v23 }
 0x3ba   : > { %v3813_v63 = vpop.f32.mrf.mxu3  ;;  %v3701_v6 = vadd.f32 %v3700_v1, %v6418_v17  ;;  %v6637_v17 = vld [vmem:[#allocation2 + $0x99] sm:$0xff]  ;;  %4228 = vmatpush.msra.mxu3 %v3491_v30 }
 0x3bb   : > { %v6631_v9 = vpop.f32.mrf.mxu1  ;;  %4116 = vmatpush.msra.mxu2 %v3474_v48  ;;  %4342 = vmatpush.msra.mxu0 %v3506_v5  ;;  %v7439_v5 = vmax.f32 %v6453_v16, 0.0 }
 0x3bc   : > { %v3814_v40 = vadd.f32 %v3813_v63, %v3701_v6  ;;  %4229 = vmatpush.msra.mxu3 %v3490_v3  ;;  %v3505_v63 = vld [vmem:[#allocation4 + $0x800] sm:$0xff]  ;;  %v2685_v6 = vld [vmem:[#allocation2 + $0x15a] sm:$0xff] }
 0x3bd   : > { %v6633_v42 = vpop.f32.mrf.mxu0  ;;  %4117 = vmatpush.msra.mxu2 %v3473_v31  ;;  %4343 = vmatpush.msra.mxu0 %v3505_v63  ;;  %v2687_v63 = vld [vmem:[#allocation2 + $0x172] sm:$0xff] }
 0x3be   : > { %3750 = vmatmul.f32.gmra.mxu2 %v7435_v61  ;;  %v6640_v56 = vadd.f32 %v6593_v22, %v3814_v40  ;;  %4038 = vmatmul.f32.gmra.mxu1 %v6637_v17  ;;  %v6648_v40 = vld [vmem:[#allocation2 + $0xa9] sm:$0xff] }
 0x3bf   : > { %3863 = vmatmul.f32.gmra.mxu3 %v2684_v38  ;;  %v3528_v38 = vld [vmem:[#allocation4 + $0x8b8] sm:$0xff] }
 0x3c0   : > { %7436 = vst [vmem:[#allocation21_spill] sm:$0xff] %v6640_v56  ;;  %3982 = vmatmul.f32.gmra.mxu0 %v2750_v27  ;;  %4230 = vmatpush.msra.mxu3 %v3489_v51  ;;  %v2924_v56 = vld [vmem:[#allocation2 + $0xc0] sm:$0xff] }
 0x3c1   : > { %v3703_v33 = vpop.f32.mrf.mxu2  ;;  %4449 = vmatpush.msra.mxu1 %v3528_v38 }
 0x3c2   : > { %v3816_v39 = vpop.f32.mrf.mxu3  ;;  %v3704_v1 = vadd.f32 %v3703_v33, %v6437_v10  ;;  %v2751_v10 = vld [vmem:[#allocation2 + $0x188] sm:$0xff] }
 0x3c3   : > { %v6644_v60 = vpop.f32.mrf.mxu1 }
 0x3c4   : > { %v3817_v22 = vadd.f32 %v3816_v39, %v3704_v1 }
 0x3c5   : > { %v3938_v7 = vpop.f32.mrf.mxu0 }
 0x3c6   : > { %3753 = vmatmul.f32.gmra.mxu2 %v7437_v49  ;;  %v6651_v53 = vadd.f32 %v6606_v12, %v3817_v22  ;;  %4041 = vmatmul.f32.gmra.mxu1 %v6648_v40  ;;  %v6659_v12 = vld [vmem:[#allocation2 + $0xb1] sm:$0xff]  ;;  %v7441_v22 = vld [vmem:[#allocation23_spill] sm:$0xff] }
 0x3c7   : > { %3866 = vmatmul.f32.gmra.mxu3 %v2685_v6  ;;  %v7442_v6 = vmax.f32 %v7441_v22, 0.0  ;;  %v6671_v49 = vld [vmem:[#allocation2 + $0xc1] sm:$0xff] }
 0x3c8   : > { %7438 = vst [vmem:[#allocation25_spill] sm:$0xff] %v6651_v53  ;;  %3985 = vmatmul.f32.gmra.mxu0 %v2751_v10  ;;  %v6797_v53 = vld [vmem:[#allocation2 + $0x141] sm:$0xff] }
 0x3c9   : > { %v3706_v30 = vpop.f32.mrf.mxu2 }
 0x3ca   : > { %v3819_v61 = vpop.f32.mrf.mxu3  ;;  %v3707_v23 = vadd.f32 %v3706_v30, %v6456_v36 }
 0x3cb   : > { %v6655_v27 = vpop.f32.mrf.mxu1 }
 0x3cc   : > { %v3820_v48 = vadd.f32 %v3819_v61, %v3707_v23  ;;  %v2848_v23 = vld [vmem:[#allocation2 + $0x1a] sm:$0xff] }
 0x3cd   : > { %v3941_v3 = vpop.f32.mrf.mxu0 }
 0x3ce   : > { %3756 = vmatmul.f32.gmra.mxu2 %v7439_v5  ;;  %v6662_v31 = vadd.f32 %v6619_v58, %v3820_v48  ;;  %4044 = vmatmul.f32.gmra.mxu1 %v6659_v12  ;;  %v2912_v48 = vld [vmem:[#allocation2 + $0x30] sm:$0xff] }
 0x3cf   : > { %3869 = vmatmul.f32.gmra.mxu3 %v2686_v28  ;;  %v6681_v5 = vld [vmem:[#allocation2 + $0xc9] sm:$0xff] }
 0x3d0   : > { %7440 = vst [vmem:[#allocation24_spill] sm:$0xff] %v6662_v31  ;;  %4344 = vmatmul.f32.vlgmr.msra.gmra.mxu0 %v6527_v46  ;;  %v3527_v46 = vld [vmem:[#allocation4 + $0x8b0] sm:$0xff] }
 0x3d1   : > { %v3709_v33 = vpop.f32.mrf.mxu2  ;;  %4450 = vmatpush.msra.mxu1 %v3527_v46  ;;  %v3526_v46 = vld [vmem:[#allocation4 + $0x8a8] sm:$0xff] }
 0x3d2   : > { %v3822_v36 = vpop.f32.mrf.mxu3  ;;  %v3710_v39 = vadd.f32 %v3709_v33, %v6476_v35 }
 0x3d3   : > { %v6667_v1 = vpop.f32.mrf.mxu1  ;;  %4451 = vmatpush.msra.mxu1 %v3526_v46 }
 0x3d4   : > { %v3823_v51 = vadd.f32 %v3822_v36, %v3710_v39 }
 0x3d5   : > { %v3944_v16 = vpop.f32.mrf.mxu0 }
 0x3d6   : > { %3759 = vmatmul.f32.gmra.mxu2 %v7442_v6  ;;  %v6674_v58 = vadd.f32 %v6633_v42, %v3823_v51  ;;  %4047 = vmatmul.f32.gmra.mxu1 %v6671_v49  ;;  %v2849_v51 = vld [vmem:[#allocation2 + $0x22] sm:$0xff]  ;;  %v6690_v6 = vld [vmem:[#allocation2 + $0xd9] sm:$0xff] }
 0x3d7   : > { %3872 = vmatmul.f32.gmra.mxu3 %v2687_v63  ;;  %v2913_v63 = vld [vmem:[#allocation2 + $0x38] sm:$0xff] }
 0x3d8   : > { %7443 = vst [vmem:[#allocation22_spill] sm:$0xff] %v6674_v58  ;;  %4347 = vmatmul.f32.gmra.mxu0 %v6538_v25  ;;  %v6785_v58 = vld [vmem:[#allocation2 + $0x139] sm:$0xff] }
 0x3d9   : > { %v3712_v35 = vpop.f32.mrf.mxu2 }
 0x3da   : > { %v3825_v10 = vpop.f32.mrf.mxu3  ;;  %v3713_v38 = vadd.f32 %v3712_v35, %v6493_v18 }
 0x3db   : > { %v6679_v61 = vpop.f32.mrf.mxu1 }
 0x3dc   : > { %v3826_v30 = vadd.f32 %v3825_v10, %v3713_v38 }
 0x3dd   : > { %v3947_v28 = vpop.f32.mrf.mxu0 }
 0x3de   : > { %4118 = vmatmul.f32.vlgmr.msra.gmra.mxu2 %v2848_v23  ;;  %v6683_v42 = vadd.f32 %v3938_v7, %v3826_v30  ;;  %4050 = vmatmul.f32.gmra.mxu1 %v6681_v5  ;;  %v6699_v30 = vld [vmem:[#allocation2 + $0x32] sm:$0xff]  ;;  %v2914_v23 = vld [vmem:[#allocation2 + $0x48] sm:$0xff] }
 0x3df   : > { %4231 = vmatmul.f32.vlgmr.msra.gmra.mxu3 %v2912_v48 }
 0x3e0   : > { %7444 = vst [vmem:[#allocation27_spill] sm:$0xff] %v6683_v42  ;;  %4350 = vmatmul.f32.gmra.mxu0 %v6549_v41  ;;  %v6761_v42 = vld [vmem:[#allocation2 + $0x121] sm:$0xff] }
 0x3e1   : > { %v3715_v25 = vpop.f32.mrf.mxu2 }
 0x3e2   : > { %v3828_v33 = vpop.f32.mrf.mxu3  ;;  %v3716_v18 = vadd.f32 %v3715_v25, %v6505_v57  ;;  %v6701_v25 = vld [vmem:[#allocation2 + $0xe1] sm:$0xff] }
 0x3e3   : > { %v6688_v39 = vpop.f32.mrf.mxu1 }
 0x3e4   : > { %v3829_v36 = vadd.f32 %v3828_v33, %v3716_v18 }
 0x3e5   : > { %v3950_v22 = vpop.f32.mrf.mxu0 }
 0x3e6   : > { %4121 = vmatmul.f32.gmra.mxu2 %v2849_v51  ;;  %v6692_v7 = vadd.f32 %v3941_v3, %v3829_v36  ;;  %4053 = vmatmul.f32.gmra.mxu1 %v6690_v6  ;;  %v6711_v51 = vld [vmem:[#allocation2 + $0x3a] sm:$0xff] }
 0x3e7   : > { %4234 = vmatmul.f32.gmra.mxu3 %v2913_v63  ;;  %v2915_v63 = vld [vmem:[#allocation2 + $0x50] sm:$0xff] }
 0x3e8   : > { %7445 = vst [vmem:[#allocation14_spill] sm:$0xff] %v6692_v7  ;;  %4353 = vmatmul.f32.gmra.mxu0 %v6560_v4 }
 0x3e9   : > { %v3718_v41 = vpop.f32.mrf.mxu2 }
 0x3ea   : > { %v3831_v57 = vpop.f32.mrf.mxu3  ;;  %v3719_v35 = vadd.f32 %v3718_v41, %v6514_v8  ;;  %v6713_v41 = vld [vmem:[#allocation2 + $0xf1] sm:$0xff] }
 0x3eb   : > { %v6697_v38 = vpop.f32.mrf.mxu1 }
 0x3ec   : > { %v3832_v10 = vadd.f32 %v3831_v57, %v3719_v35 }
 0x3ed   : > { %v3953_v48 = vpop.f32.mrf.mxu0 }
 0x3ee   : > { %4124 = vmatmul.f32.gmra.mxu2 %v6699_v30  ;;  %v6704_v3 = vadd.f32 %v3944_v16, %v3832_v10  ;;  %4056 = vmatmul.f32.gmra.mxu1 %v6701_v25 }
 0x3ef   : > { %4237 = vmatmul.f32.gmra.mxu3 %v2914_v23 }
 0x3f0   : > { %7446 = vst [vmem:[#allocation26_spill] sm:$0xff] %v6704_v3  ;;  %4356 = vmatmul.f32.gmra.mxu0 %v6571_v34  ;;  %v3525_v34 = vld [vmem:[#allocation4 + $0x8a0] sm:$0xff] }
 0x3f1   : > { %v3721_v4 = vpop.f32.mrf.mxu2  ;;  %4452 = vmatpush.msra.mxu1 %v3525_v34 }
 0x3f2   : > { %v3834_v8 = vpop.f32.mrf.mxu3  ;;  %v3722_v33 = vadd.f32 %v3721_v4, %v6523_v37  ;;  %v6723_v4 = vld [vmem:[#allocation2 + $0x4a] sm:$0xff] }
 0x3f3   : > { %v6709_v36 = vpop.f32.mrf.mxu1 }
 0x3f4   : > { %v3835_v18 = vadd.f32 %v3834_v8, %v3722_v33  ;;  %v2916_v8 = vld [vmem:[#allocation2 + $0x60] sm:$0xff] }
 0x3f5   : > { %v3956_v46 = vpop.f32.mrf.mxu0 }
 0x3f6   : > { %4127 = vmatmul.f32.gmra.mxu2 %v6711_v51  ;;  %v6716_v16 = vadd.f32 %v3947_v28, %v3835_v18  ;;  %4059 = vmatmul.f32.gmra.mxu1 %v6713_v41 }
 0x3f7   : > { %4240 = vmatmul.f32.gmra.mxu3 %v2915_v63  ;;  %v6725_v63 = vld [vmem:[#allocation2 + $0xf9] sm:$0xff] }
 0x3f8   : > { %7447 = vst [vmem:[#allocation29_spill] sm:$0xff] %v6716_v16  ;;  %4359 = vmatmul.f32.gmra.mxu0 %v6584_v50  ;;  %v6737_v16 = vld [vmem:[#allocation2 + $0x109] sm:$0xff] }
 0x3f9   : > { %v3724_v37 = vpop.f32.mrf.mxu2 }
 0x3fa   : > { %v3837_v57 = vpop.f32.mrf.mxu3  ;;  %v3725_v35 = vadd.f32 %v3724_v37, %v6534_v62 }
 0x3fb   : > { %v6721_v23 = vpop.f32.mrf.mxu1 }
 0x3fc   : > { %v3838_v10 = vadd.f32 %v3837_v57, %v3725_v35  ;;  %v6735_v57 = vld [vmem:[#allocation2 + $0x52] sm:$0xff]  ;;  %v2917_v35 = vld [vmem:[#allocation2 + $0x68] sm:$0xff] }
 0x3fd   : > { %v3959_v33 = vpop.f32.mrf.mxu0 }
 0x3fe   : > { %4130 = vmatmul.f32.gmra.mxu2 %v6723_v4  ;;  %v6728_v28 = vadd.f32 %v3950_v22, %v3838_v10  ;;  %4062 = vmatmul.f32.gmra.mxu1 %v6725_v63 }
 0x3ff   : > { %4243 = vmatmul.f32.gmra.mxu3 %v2916_v8 }
 0x400   : > { %7448 = vst [vmem:[#allocation17_spill] sm:$0xff] %v6728_v28  ;;  %4362 = vmatmul.f32.gmra.mxu0 %v6597_v20  ;;  %v3524_v20 = vld [vmem:[#allocation4 + $0x898] sm:$0xff]  ;;  %v2918_v28 = vld [vmem:[#allocation2 + $0x78] sm:$0xff] }
 0x401   : > { %v3727_v50 = vpop.f32.mrf.mxu2  ;;  %4453 = vmatpush.msra.mxu1 %v3524_v20 }
 0x402   : > { %v3840_v62 = vpop.f32.mrf.mxu3  ;;  %v3728_v18 = vadd.f32 %v3727_v50, %v6545_v14 }
 0x403   : > { %v6733_v37 = vpop.f32.mrf.mxu1 }
 0x404   : > { %v3841_v34 = vadd.f32 %v3840_v62, %v3728_v18  ;;  %v6747_v18 = vld [vmem:[#allocation2 + $0x62] sm:$0xff] }
 0x405   : > { %v3962_v3 = vpop.f32.mrf.mxu0 }
 0x406   : > { %4133 = vmatmul.f32.gmra.mxu2 %v6735_v57  ;;  %v6740_v22 = vadd.f32 %v3953_v48, %v3841_v34  ;;  %4065 = vmatmul.f32.gmra.mxu1 %v6737_v16 }
 0x407   : > { %4246 = vmatmul.f32.gmra.mxu3 %v2917_v35  ;;  %v6749_v35 = vld [vmem:[#allocation2 + $0x111] sm:$0xff] }
 0x408   : > { %7449 = vst [vmem:[#allocation28_spill] sm:$0xff] %v6740_v22  ;;  %4365 = vmatmul.f32.gmra.mxu0 %v6610_v59 }
 0x409   : > { %v3730_v14 = vpop.f32.mrf.mxu2 }
 0x40a   : > { %v3843_v10 = vpop.f32.mrf.mxu3  ;;  %v3731_v8 = vadd.f32 %v3730_v14, %v6556_v15 }
 0x40b   : > { %v6745_v62 = vpop.f32.mrf.mxu1 }
 0x40c   : > { %v3844_v50 = vadd.f32 %v3843_v10, %v3731_v8  ;;  %v6759_v10 = vld [vmem:[#allocation2 + $0x6a] sm:$0xff]  ;;  %v2919_v8 = vld [vmem:[#allocation2 + $0x80] sm:$0xff] }
 0x40d   : > { %v3965_v7 = vpop.f32.mrf.mxu0 }
 0x40e   : > { %4136 = vmatmul.f32.gmra.mxu2 %v6747_v18  ;;  %v6752_v48 = vadd.f32 %v3956_v46, %v3844_v50  ;;  %4068 = vmatmul.f32.gmra.mxu1 %v6749_v35 }
 0x40f   : > { %4249 = vmatmul.f32.gmra.mxu3 %v2918_v28 }
 0x410   : > { %7450 = vst [vmem:[#allocation15_spill] sm:$0xff] %v6752_v48  ;;  %4368 = vmatmul.f32.gmra.mxu0 %v6623_v26  ;;  %v3523_v26 = vld [vmem:[#allocation4 + $0x890] sm:$0xff]  ;;  %v2920_v48 = vld [vmem:[#allocation2 + $0x90] sm:$0xff] }
 0x411   : > { %v3733_v59 = vpop.f32.mrf.mxu2  ;;  %4454 = vmatpush.msra.mxu1 %v3523_v26 }
 0x412   : > { %v3846_v15 = vpop.f32.mrf.mxu3  ;;  %v3734_v34 = vadd.f32 %v3733_v59, %v6567_v2 }
 0x413   : > { %v6757_v14 = vpop.f32.mrf.mxu1 }
 0x414   : > { %v3847_v20 = vadd.f32 %v3846_v15, %v3734_v34  ;;  %v6771_v34 = vld [vmem:[#allocation2 + $0x7a] sm:$0xff] }
 0x415   : > { %v3968_v22 = vpop.f32.mrf.mxu0 }
 0x416   : > { %4139 = vmatmul.f32.gmra.mxu2 %v6759_v10  ;;  %v6764_v46 = vadd.f32 %v3959_v33, %v3847_v20  ;;  %4071 = vmatmul.f32.gmra.mxu1 %v6761_v42 }
 0x417   : > { %4252 = vmatmul.f32.gmra.mxu3 %v2919_v8  ;;  %v6773_v8 = vld [vmem:[#allocation2 + $0x129] sm:$0xff] }
 0x418   : > { %7451 = vst [vmem:[#allocation30_spill] sm:$0xff] %v6764_v46  ;;  %4371 = vmatmul.f32.gmra.mxu0 %v6637_v17 }
 0x419   : > { %v3736_v2 = vpop.f32.mrf.mxu2 }
 0x41a   : > { %v3849_v28 = vpop.f32.mrf.mxu3  ;;  %v3737_v50 = vadd.f32 %v3736_v2, %v6578_v47 }
 0x41b   : > { %v6769_v15 = vpop.f32.mrf.mxu1 }
 0x41c   : > { %v3850_v59 = vadd.f32 %v3849_v28, %v3737_v50  ;;  %v6783_v28 = vld [vmem:[#allocation2 + $0x82] sm:$0xff]  ;;  %v2921_v50 = vld [vmem:[#allocation2 + $0x98] sm:$0xff] }
 0x41d   : > { %v3971_v31 = vpop.f32.mrf.mxu0 }
 0x41e   : > { %4142 = vmatmul.f32.gmra.mxu2 %v6771_v34  ;;  %v6776_v33 = vadd.f32 %v3962_v3, %v3850_v59  ;;  %4074 = vmatmul.f32.gmra.mxu1 %v6773_v8 }
 0x41f   : > { %4255 = vmatmul.f32.gmra.mxu3 %v2920_v48 }
 0x420   : > { %7452 = vst [vmem:[#allocation19_spill] sm:$0xff] %v6776_v33  ;;  %4374 = vmatmul.f32.gmra.mxu0 %v6648_v40  ;;  %v3522_v40 = vld [vmem:[#allocation4 + $0x888] sm:$0xff]  ;;  %v2922_v33 = vld [vmem:[#allocation2 + $0xa8] sm:$0xff] }
 0x421   : > { %v3739_v17 = vpop.f32.mrf.mxu2  ;;  %4455 = vmatpush.msra.mxu1 %v3522_v40 }
 0x422   : > { %v3852_v47 = vpop.f32.mrf.mxu3  ;;  %v3740_v20 = vadd.f32 %v3739_v17, %v6591_v19 }
 0x423   : > { %v6781_v2 = vpop.f32.mrf.mxu1 }
 0x424   : > { %v3853_v26 = vadd.f32 %v3852_v47, %v3740_v20  ;;  %v6795_v20 = vld [vmem:[#allocation2 + $0x92] sm:$0xff] }
 0x425   : > { %v3974_v46 = vpop.f32.mrf.mxu0 }
 0x426   : > { %4145 = vmatmul.f32.gmra.mxu2 %v6783_v28  ;;  %v6788_v3 = vadd.f32 %v3965_v7, %v3853_v26  ;;  %4077 = vmatmul.f32.gmra.mxu1 %v6785_v58 }
 0x427   : > { %4258 = vmatmul.f32.gmra.mxu3 %v2921_v50 }
 0x428   : > { %7453 = vst [vmem:[#allocation31_spill] sm:$0xff] %v6788_v3  ;;  %4377 = vmatmul.f32.gmra.mxu0 %v6659_v12  ;;  %v6809_v3 = vld [vmem:[#allocation2 + $0x151] sm:$0xff] }
 0x429   : > { %v3742_v19 = vpop.f32.mrf.mxu2 }
 0x42a   : > { %v3855_v48 = vpop.f32.mrf.mxu3  ;;  %v3743_v59 = vadd.f32 %v3742_v19, %v6604_v0 }
 0x42b   : > { %v6793_v47 = vpop.f32.mrf.mxu1 }
 0x42c   : > { %v3856_v17 = vadd.f32 %v3855_v48, %v3743_v59  ;;  %v6807_v48 = vld [vmem:[#allocation2 + $0x9a] sm:$0xff]  ;;  %v2923_v59 = vld [vmem:[#allocation2 + $0xb0] sm:$0xff] }
 0x42d   : > { %v3977_v7 = vpop.f32.mrf.mxu0 }
 0x42e   : > { %4148 = vmatmul.f32.gmra.mxu2 %v6795_v20  ;;  %v6800_v26 = vadd.f32 %v3968_v22, %v3856_v17  ;;  %4080 = vmatmul.f32.gmra.mxu1 %v6797_v53 }
 0x42f   : > { %4261 = vmatmul.f32.gmra.mxu3 %v2922_v33 }
 0x430   : > { %7454 = vst [vmem:[#allocation16_spill] sm:$0xff] %v6800_v26  ;;  %4380 = vmatmul.f32.gmra.mxu0 %v6671_v49  ;;  %v3521_v49 = vld [vmem:[#allocation4 + $0x880] sm:$0xff] }
 0x431   : > { %v3745_v12 = vpop.f32.mrf.mxu2  ;;  %4456 = vmatpush.msra.mxu1 %v3521_v49  ;;  %v6819_v26 = vld [vmem:[#allocation2 + $0xaa] sm:$0xff] }
 0x432   : > { %v3858_v0 = vpop.f32.mrf.mxu3  ;;  %v3746_v50 = vadd.f32 %v3745_v12, %v6617_v54 }
 0x433   : > { %v6805_v19 = vpop.f32.mrf.mxu1 }
 0x434   : > { %v3859_v40 = vadd.f32 %v3858_v0, %v3746_v50 }
 0x435   : > { %v3980_v33 = vpop.f32.mrf.mxu0 }
 0x436   : > { %4151 = vmatmul.f32.gmra.mxu2 %v6807_v48  ;;  %v6812_v22 = vadd.f32 %v3971_v31, %v3859_v40  ;;  %4083 = vmatmul.f32.gmra.mxu1 %v6809_v3 }
 0x437   : > { %4264 = vmatmul.f32.gmra.mxu3 %v2923_v59  ;;  %v6821_v59 = vld [vmem:[#allocation2 + $0x159] sm:$0xff] }
 0x438   : > { %7455 = vst [vmem:[#allocation18_spill] sm:$0xff] %v6812_v22  ;;  %4383 = vmatmul.f32.gmra.mxu0 %v6681_v5  ;;  %v2925_v22 = vld [vmem:[#allocation2 + $0xc8] sm:$0xff] }
 0x439   : > { %v3748_v54 = vpop.f32.mrf.mxu2 }
 0x43a   : > { %v3861_v17 = vpop.f32.mrf.mxu3  ;;  %v3749_v12 = vadd.f32 %v3748_v54, %v6631_v9 }
 0x43b   : > { %v6817_v50 = vpop.f32.mrf.mxu1 }
 0x43c   : > { %v3862_v0 = vadd.f32 %v3861_v17, %v3749_v12  ;;  %7456 = vst [vmem:[#allocation20_spill] sm:$0xff] %v6817_v50  ;;  %v6831_v12 = vld [vmem:[#allocation2 + $0xb2] sm:$0xff]  ;;  %v6833_v50 = vld [vmem:[#allocation2 + $0x169] sm:$0xff] }
 0x43d   : > { %v3983_v49 = vpop.f32.mrf.mxu0 }
 0x43e   : > { %4154 = vmatmul.f32.gmra.mxu2 %v6819_v26  ;;  %v6824_v31 = vadd.f32 %v3974_v46, %v3862_v0  ;;  %4086 = vmatmul.f32.gmra.mxu1 %v6821_v59 }
 0x43f   : > { %4267 = vmatmul.f32.gmra.mxu3 %v2924_v56 }
 0x440   : > { %7457 = vst [vmem:[#allocation23_spill] sm:$0xff] %v6824_v31  ;;  %4386 = vmatmul.f32.gmra.mxu0 %v6690_v6  ;;  %v2926_v31 = vld [vmem:[#allocation2 + $0xd8] sm:$0xff] }
 0x441   : > { %v3751_v5 = vpop.f32.mrf.mxu2 }
 0x442   : > { %v3864_v40 = vpop.f32.mrf.mxu3  ;;  %v3752_v9 = vadd.f32 %v3751_v5, %v6644_v60 }
 0x443   : > { %v6829_v17 = vpop.f32.mrf.mxu1 }
 0x444   : > { %v3865_v54 = vadd.f32 %v3864_v40, %v3752_v9  ;;  %7458 = vst [vmem:[#allocation32_spill] sm:$0xff] %v6829_v17  ;;  %v6843_v9 = vld [vmem:[#allocation2 + $0xc2] sm:$0xff]  ;;  %v6845_v17 = vld [vmem:[#allocation2 + $0x171] sm:$0xff] }
 0x445   : > { %v3986_v40 = vpop.f32.mrf.mxu0 }
 0x446   : > { %4157 = vmatmul.f32.gmra.mxu2 %v6831_v12  ;;  %v6836_v56 = vadd.f32 %v3977_v7, %v3865_v54  ;;  %4089 = vmatmul.f32.gmra.mxu1 %v6833_v50 }
 0x447   : > { %4270 = vmatmul.f32.gmra.mxu3 %v2925_v22 }
 0x448   : > { %7459 = vst [vmem:[#allocation33_spill] sm:$0xff] %v6836_v56  ;;  %4389 = vmatmul.f32.gmra.mxu0 %v6701_v25  ;;  %v6857_v56 = vld [vmem:[#allocation2 + $0x181] sm:$0xff] }
 0x449   : > { %v3754_v6 = vpop.f32.mrf.mxu2 }
 0x44a   : > { %v3867_v60 = vpop.f32.mrf.mxu3  ;;  %v3755_v46 = vadd.f32 %v3754_v6, %v6655_v27 }
 0x44b   : > { %v6841_v5 = vpop.f32.mrf.mxu1 }
 0x44c   : > { %v3868_v0 = vadd.f32 %v3867_v60, %v3755_v46  ;;  %7460 = vst [vmem:[#allocation34_spill] sm:$0xff] %v6841_v5  ;;  %v6855_v60 = vld [vmem:[#allocation2 + $0xca] sm:$0xff]  ;;  %v2927_v46 = vld [vmem:[#allocation2 + $0xe0] sm:$0xff] }
 0x44d   : > { %v6869_v5 = vld [vmem:[#allocation2 + $0x189] sm:$0xff] }
 0x44e   : > { %4160 = vmatmul.f32.gmra.mxu2 %v6843_v9  ;;  %v6848_v7 = vadd.f32 %v3980_v33, %v3868_v0  ;;  %4092 = vmatmul.f32.gmra.mxu1 %v6845_v17  ;;  %v4345_v33 = vpop.f32.mrf.mxu0 }
 0x44f   : > { %4273 = vmatmul.f32.gmra.mxu3 %v2926_v31 }
 0x450   : > { %7461 = vst [vmem:[#allocation35_spill] sm:$0xff] %v6848_v7  ;;  %4392 = vmatmul.f32.gmra.mxu0 %v6713_v41  ;;  %v2928_v7 = vld [vmem:[#allocation2 + $0xf0] sm:$0xff] }
 0x451   : > { %v3757_v25 = vpop.f32.mrf.mxu2 }
 0x452   : > { %v3870_v27 = vpop.f32.mrf.mxu3  ;;  %v3758_v22 = vadd.f32 %v3757_v25, %v6667_v1 }
 0x453   : > { %v6853_v6 = vpop.f32.mrf.mxu1 }
 0x454   : > { %v3871_v54 = vadd.f32 %v3870_v27, %v3758_v22  ;;  %v6867_v22 = vld [vmem:[#allocation2 + $0xda] sm:$0xff] }
 0x456   : > { %4163 = vmatmul.f32.gmra.mxu2 %v6855_v60  ;;  %v6860_v31 = vadd.f32 %v3983_v49, %v3871_v54  ;;  %4095 = vmatmul.f32.gmra.mxu1 %v6857_v56  ;;  %v4348_v54 = vpop.f32.mrf.mxu0 }
 0x457   : > { %4276 = vmatmul.f32.gmra.mxu3 %v2927_v46 }
 0x458   : > { %7462 = vst [vmem:[#allocation36_spill] sm:$0xff] %v6860_v31  ;;  %4395 = vmatmul.f32.gmra.mxu0 %v6725_v63  ;;  %v4007_v63 = vadd.f32 %v6688_v39, %v6510_v43  ;;  %v6880_v31 = vld [vmem:[#allocation2 + $0xe2] sm:$0xff]  ;;  %v4010_v43 = vadd.f32 %v6697_v38, %v6519_v29  ;;  %v4013_v29 = vadd.f32 %v6709_v36, %v6529_v21 }
 0x459   : > { %v3760_v41 = vpop.f32.mrf.mxu2  ;;  %v4016_v21 = vadd.f32 %v6721_v23, %v6540_v13  ;;  %v4019_v13 = vadd.f32 %v6733_v37, %v6551_v52  ;;  %v4022_v52 = vadd.f32 %v6745_v62, %v6562_v45  ;;  %v4025_v45 = vadd.f32 %v6757_v14, %v6573_v55 }
 0x45a   : > { %v3873_v1 = vpop.f32.mrf.mxu3  ;;  %v3761_v0 = vadd.f32 %v3760_v41, %v6679_v61  ;;  %v4028_v55 = vadd.f32 %v6769_v15, %v6586_v24  ;;  %v6966_v15 = vld [vmem:[#allocation2 + $0x142] sm:$0xff] }
 0x45b   : > { %v6865_v27 = vpop.f32.mrf.mxu1 }
 0x45c   : > { %v3874_v25 = vadd.f32 %v3873_v1, %v3761_v0  ;;  %7463 = vst [vmem:[#allocation37_spill] sm:$0xff] %v6865_v27  ;;  %v2929_v27 = vld [vmem:[#allocation2 + $0xf8] sm:$0xff] }
 0x45e   : > { %4166 = vmatmul.f32.gmra.mxu2 %v6867_v22  ;;  %v6872_v49 = vadd.f32 %v3986_v40, %v3874_v25  ;;  %4098 = vmatmul.f32.gmra.mxu1 %v6869_v5  ;;  %v4351_v25 = vpop.f32.mrf.mxu0 }
 0x45f   : > { %4279 = vmatmul.f32.gmra.mxu3 %v2928_v7 }
 0x460   : > { %4398 = vmatmul.f32.gmra.mxu0 %v6737_v16 }
 0x461   : > { %v4119_v61 = vpop.f32.mrf.mxu2 }
 0x462   : > { %v4232_v46 = vpop.f32.mrf.mxu3  ;;  %v4120_v41 = vadd.f32 %v4119_v61, %v4007_v63 }
 0x463   : > { %v6878_v0 = vpop.f32.mrf.mxu1 }
 0x464   : > { %v4233_v1 = vadd.f32 %v4232_v46, %v4120_v41  ;;  %v6891_v46 = vld [vmem:[#allocation2 + $0xf2] sm:$0xff]  ;;  %v2930_v41 = vld [vmem:[#allocation2 + $0x108] sm:$0xff] }
 0x466   : > { %4169 = vmatmul.f32.gmra.mxu2 %v6880_v31  ;;  %v6883_v40 = vadd.f32 %v4345_v33, %v4233_v1  ;;  %4457 = vmatmul.f32.vlgmr.msra.gmra.mxu1 %v6699_v30 }
 0x467   : > { %4282 = vmatmul.f32.gmra.mxu3 %v2929_v27 }
 0x468   : > { %4401 = vmatmul.f32.gmra.mxu0 %v6749_v35 }
 0x469   : > { %v4122_v39 = vpop.f32.mrf.mxu2 }
 0x46a   : > { %v4235_v16 = vpop.f32.mrf.mxu3  ;;  %v4123_v7 = vadd.f32 %v4122_v39, %v4010_v43  ;;  %v4354_v43 = vpop.f32.mrf.mxu0  ;;  %v6902_v39 = vld [vmem:[#allocation2 + $0xfa] sm:$0xff] }
 0x46b   : > { %v6889_v61 = vpop.f32.mrf.mxu1 }
 0x46c   : > { %v4236_v63 = vadd.f32 %v4235_v16, %v4123_v7  ;;  %v2931_v16 = vld [vmem:[#allocation2 + $0x110] sm:$0xff] }
 0x46e   : > { %4172 = vmatmul.f32.gmra.mxu2 %v6891_v46  ;;  %v6894_v33 = vadd.f32 %v4348_v54, %v4236_v63  ;;  %4460 = vmatmul.f32.gmra.mxu1 %v6711_v51 }
 0x46f   : > { %4285 = vmatmul.f32.gmra.mxu3 %v2930_v41  ;;  %v6913_v41 = vld [vmem:[#allocation2 + $0x10a] sm:$0xff] }
 0x470   : > { %4404 = vmatmul.f32.gmra.mxu0 %v6761_v42 }
 0x471   : > { %v4125_v38 = vpop.f32.mrf.mxu2 }
 0x472   : > { %v4238_v30 = vpop.f32.mrf.mxu3  ;;  %v4126_v35 = vadd.f32 %v4125_v38, %v4013_v29  ;;  %v2932_v29 = vld [vmem:[#allocation2 + $0x120] sm:$0xff]  ;;  %v4357_v38 = vpop.f32.mrf.mxu0 }
 0x473   : > { %v6900_v1 = vpop.f32.mrf.mxu1 }
 0x474   : > { %v4239_v27 = vadd.f32 %v4238_v30, %v4126_v35 }
 0x476   : > { %4175 = vmatmul.f32.gmra.mxu2 %v6902_v39  ;;  %v6905_v54 = vadd.f32 %v4351_v25, %v4239_v27  ;;  %4463 = vmatmul.f32.gmra.mxu1 %v6723_v4  ;;  %v6924_v27 = vld [vmem:[#allocation2 + $0x112] sm:$0xff] }
 0x477   : > { %4288 = vmatmul.f32.gmra.mxu3 %v2931_v16  ;;  %v2933_v16 = vld [vmem:[#allocation2 + $0x128] sm:$0xff] }
 0x478   : > { %4407 = vmatmul.f32.gmra.mxu0 %v6773_v8 }
 0x479   : > { %v4128_v42 = vpop.f32.mrf.mxu2 }
 0x47a   : > { %v4241_v36 = vpop.f32.mrf.mxu3  ;;  %v4129_v51 = vadd.f32 %v4128_v42, %v4016_v21 }
 0x47b   : > { %v6911_v63 = vpop.f32.mrf.mxu1 }
 0x47c   : > { %v4242_v7 = vadd.f32 %v4241_v36, %v4129_v51  ;;  %v6935_v51 = vld [vmem:[#allocation2 + $0x122] sm:$0xff] }
 0x47e   : > { %4178 = vmatmul.f32.gmra.mxu2 %v6913_v41  ;;  %v6916_v25 = vadd.f32 %v4354_v43, %v4242_v7  ;;  %4466 = vmatmul.f32.gmra.mxu1 %v6735_v57  ;;  %v2934_v7 = vld [vmem:[#allocation2 + $0x138] sm:$0xff] }
 0x47f   : > { %4291 = vmatmul.f32.gmra.mxu3 %v2932_v29 }
 0x480   : > { %4410 = vmatmul.f32.gmra.mxu0 %v6785_v58  ;;  %v4360_v58 = vpop.f32.mrf.mxu0 }
 0x481   : > { %v4131_v23 = vpop.f32.mrf.mxu2 }
 0x482   : > { %v4244_v4 = vpop.f32.mrf.mxu3  ;;  %v4132_v8 = vadd.f32 %v4131_v23, %v4019_v13 }
 0x483   : > { %v6922_v35 = vpop.f32.mrf.mxu1 }
 0x484   : > { %v4245_v30 = vadd.f32 %v4244_v4, %v4132_v8  ;;  %v6946_v4 = vld [vmem:[#allocation2 + $0x12a] sm:$0xff]  ;;  %v2935_v8 = vld [vmem:[#allocation2 + $0x140] sm:$0xff] }
 0x486   : > { %4181 = vmatmul.f32.gmra.mxu2 %v6924_v27  ;;  %v6927_v43 = vadd.f32 %v4357_v38, %v4245_v30  ;;  %4469 = vmatmul.f32.gmra.mxu1 %v6747_v18 }
 0x487   : > { %4294 = vmatmul.f32.gmra.mxu3 %v2933_v16 }
 0x488   : > { %4413 = vmatmul.f32.gmra.mxu0 %v6797_v53  ;;  %v4363_v38 = vpop.f32.mrf.mxu0 }
 0x489   : > { %v4134_v37 = vpop.f32.mrf.mxu2 }
 0x48a   : > { %v4247_v57 = vpop.f32.mrf.mxu3  ;;  %v4135_v21 = vadd.f32 %v4134_v37, %v4022_v52  ;;  %v6957_v37 = vld [vmem:[#allocation2 + $0x13a] sm:$0xff] }
 0x48b   : > { %v6933_v36 = vpop.f32.mrf.mxu1 }
 0x48c   : > { %v4248_v42 = vadd.f32 %v4247_v57, %v4135_v21  ;;  %v2936_v57 = vld [vmem:[#allocation2 + $0x150] sm:$0xff] }
 0x48e   : > { %4184 = vmatmul.f32.gmra.mxu2 %v6935_v51  ;;  %v6938_v29 = vadd.f32 %v4360_v58, %v4248_v42  ;;  %4472 = vmatmul.f32.gmra.mxu1 %v6759_v10  ;;  %v6973_v42 = vld [vmem:[#allocation2 + $0x152] sm:$0xff] }
 0x48f   : > { %4297 = vmatmul.f32.gmra.mxu3 %v2934_v7  ;;  %v2938_v7 = vld [vmem:[#allocation2 + $0x168] sm:$0xff] }
 0x490   : > { %4416 = vmatmul.f32.gmra.mxu0 %v6809_v3  ;;  %v4366_v58 = vpop.f32.mrf.mxu0 }
 0x491   : > { %v4137_v53 = vpop.f32.mrf.mxu2 }
 0x492   : > { %v4250_v62 = vpop.f32.mrf.mxu3  ;;  %v4138_v18 = vadd.f32 %v4137_v53, %v4025_v45  ;;  %v2939_v45 = vld [vmem:[#allocation2 + $0x170] sm:$0xff]  ;;  %v2940_v53 = vld [vmem:[#allocation2 + $0x180] sm:$0xff] }
 0x493   : > { %v6944_v23 = vpop.f32.mrf.mxu1 }
 0x494   : > { %v4251_v13 = vadd.f32 %v4250_v62, %v4138_v18  ;;  %v6993_v62 = vld [vmem:[#allocation2 + $0x172] sm:$0xff]  ;;  %v2941_v18 = vld [vmem:[#allocation2 + $0x188] sm:$0xff] }
 0x496   : > { %4187 = vmatmul.f32.gmra.mxu2 %v6946_v4  ;;  %v6949_v30 = vadd.f32 %v4363_v38, %v4251_v13  ;;  %4475 = vmatmul.f32.gmra.mxu1 %v6771_v34  ;;  %v2937_v34 = vld [vmem:[#allocation2 + $0x158] sm:$0xff]  ;;  %v6999_v38 = vld [vmem:[#allocation2 + $0x182] sm:$0xff] }
 0x497   : > { %4300 = vmatmul.f32.gmra.mxu3 %v2935_v8  ;;  %v7005_v8 = vld [vmem:[#allocation2 + $0x18a] sm:$0xff] }
 0x498   : > { %4419 = vmatmul.f32.gmra.mxu0 %v6821_v59 }
 0x499   : > { %v4140_v14 = vpop.f32.mrf.mxu2 }
 0x49a   : > { %v4141_v10 = vadd.f32 %v4140_v14, %v4028_v55  ;;  %v4253_v3 = vpop.f32.mrf.mxu3 }
 0x49b   : > { %v6955_v52 = vpop.f32.mrf.mxu1 }
 0x49c   : > { %v4254_v16 = vadd.f32 %v4253_v3, %v4141_v10  ;;  %v7016_v3 = vld [vmem:[#allocation7 + $0x1] ss:$0 sm:$0xff] }
 0x49e   : > { %4190 = vmatmul.f32.gmra.mxu2 %v6957_v37  ;;  %v6960_v21 = vadd.f32 %v4366_v58, %v4254_v16  ;;  %4478 = vmatmul.f32.gmra.mxu1 %v6783_v28  ;;  %v7021_v58 = vpop.f32.mrf.mxu0 }
 0x49f   : > { %4303 = vmatmul.f32.gmra.mxu3 %v2936_v57  ;;  %v7024_v57 = vld [vmem:[#allocation9 + $0x1] ss:$0 sm:$0xff] }
 0x4a0   : > { %4422 = vmatmul.f32.gmra.mxu0 %v6833_v50  ;;  %v6980_v50 = vld [vmem:[#allocation2 + $0x15a] sm:$0xff] }
 0x4a1   : > { %v7013_v14 = vpop.f32.mrf.mxu2 }
 0x4a2   : > { %v7019_v16 = vpop.f32.mrf.mxu3 }
 0x4a3   : > { %v6964_v24 = vpop.f32.mrf.mxu1 }
 0x4a6   : > { %4193 = vmatmul.f32.gmra.mxu2 %v6966_v15  ;;  %4481 = vmatmul.f32.gmra.mxu1 %v6795_v20 }
 0x4a7   : > { %4306 = vmatmul.f32.gmra.mxu3 %v2937_v34 }
 0x4a8   : > { %4425 = vmatmul.f32.gmra.mxu0 %v6845_v17  ;;  %v6987_v17 = vld [vmem:[#allocation2 + $0x16a] sm:$0xff] }
 0x4ab   : > { %v6971_v59 = vpop.f32.mrf.mxu1 }
 0x4ae   : > { %4196 = vmatmul.f32.gmra.mxu2 %v6973_v42  ;;  %4484 = vmatmul.f32.gmra.mxu1 %v6807_v48  ;;  %v3006_v48 = vld [vmem:[#allocation2 + $0x199] sm:$0xff] }
 0x4af   : > { %4309 = vmatmul.f32.gmra.mxu3 %v2938_v7 }
 0x4b0   : > { %4428 = vmatmul.f32.gmra.mxu0 %v6857_v56 }
 0x4b3   : > { %v6978_v28 = vpop.f32.mrf.mxu1 }
 0x4b6   : > { %4199 = vmatmul.f32.gmra.mxu2 %v6980_v50  ;;  %4487 = vmatmul.f32.gmra.mxu1 %v6819_v26  ;;  %v3007_v26 = vld [vmem:[#allocation2 + $0x1a1] sm:$0xff] }
 0x4b7   : > { %4312 = vmatmul.f32.gmra.mxu3 %v2939_v45 }
 0x4b8   : > { %4431 = vmatmul.f32.gmra.mxu0 %v6869_v5 }
 0x4bb   : > { %v6985_v20 = vpop.f32.mrf.mxu1 }
 0x4be   : > { %4202 = vmatmul.f32.gmra.mxu2 %v6987_v17  ;;  %4490 = vmatmul.f32.gmra.mxu1 %v6831_v12  ;;  %v5113_v12 = vld [vmem:[#allocation2] sm:$0xff] }
 0x4bf   : > { %4315 = vmatmul.f32.gmra.mxu3 %v2940_v53 }
 0x4c0   : > { %4434 = vmatmul.f32.gmra.mxu0 %v3006_v48 }
 0x4c3   : > { %v6991_v56 = vpop.f32.mrf.mxu1 }
 0x4c6   : > { %4205 = vmatmul.f32.gmra.mxu2 %v6993_v62  ;;  %4493 = vmatmul.f32.gmra.mxu1 %v6843_v9 }
 0x4c7   : > { %4318 = vmatmul.f32.gmra.mxu3 %v2941_v18  ;;  %v7034_v18 = vpop.f32.mrf.mxu3 }
 0x4c8   : > { %4437 = vmatmul.f32.gmra.mxu0 %v3007_v26 }
 0x4cb   : > { %v6997_v5 = vpop.f32.mrf.mxu1 }
 0x4ce   : > { %4208 = vmatmul.f32.gmra.mxu2 %v6999_v38  ;;  %4496 = vmatmul.f32.gmra.mxu1 %v6855_v60 }
 0x4cf   : > { %4321 = vmatmul.f32.gmra.mxu3 %v5113_v12 }
 0x4d3   : > { %v7003_v13 = vpop.f32.mrf.mxu1 }
 0x4d6   : > { %4211 = vmatmul.f32.gmra.mxu2 %v7005_v8  ;;  %4499 = vmatmul.f32.gmra.mxu1 %v6867_v22 }
 0x4d7   : > { %4324 = vmatmul.f32.gmra.mxu3 %v5113_v12 }
 0x4db   : > { %v7009_v9 = vpop.f32.mrf.mxu1 }
 0x4dc   : > { %7464 = vst [vmem:[#allocation38_spill] sm:$0xff] %v7009_v9 }
 0x4de   : > { %4502 = vmatmul.f32.gmra.mxu1 %v6880_v31  ;;  %v7026_v31 = vpop.f32.mrf.mxu2 }
 0x4e3   : > { %v4458_v55 = vpop.f32.mrf.mxu1 }
 0x4e4   : > { %v4459_v60 = vadd.f32 %v4458_v55, %v6883_v40 }
 0x4e6   : > { %4505 = vmatmul.f32.gmra.mxu1 %v6891_v46  ;;  %v4559_v22 = vmul.f32 %v7016_v3, %v4459_v60 }
 0x4e8   : > { %v4596_v7 = vadd.f32 %v7024_v57, %v4559_v22  ;;  %v7039_v22 = vpop.f32.mrf.mxu0 }
 0x4ea   : > { %v4628_v26 = vmax.f32 %v4596_v7, 0.0 }
 0x4eb   : > { %v4461_v10 = vpop.f32.mrf.mxu1 }
 0x4ec   : > { %v4462_v40 = vadd.f32 %v4461_v10, %v6894_v33 }
 0x4ee   : > { %4508 = vmatmul.f32.gmra.mxu1 %v6902_v39  ;;  %v5284_v39 = vmov 1966171168   ;;  %v4560_v12 = vmul.f32 %v7016_v3, %v4462_v40 }
 0x4ef   : > { %v4677_v53 = vunpack.c.l.s4 %v5284_v39 }
 0x4f1   : > { %v7037_v60 = vunpack.c.0.s8 %v4677_v53 }
 0x4f3   : > { %v4464_v46 = vpop.f32.mrf.mxu1 }
 0x4f4   : > { %v4465_v34 = vadd.f32 %v4464_v46, %v6905_v54  ;;  %v7042_v46 = vpop.f32.mrf.mxu2 }
 0x4f6   : > { %v4561_v45 = vmul.f32 %v7016_v3, %v4465_v34  ;;  %4511 = vmatmul.f32.gmra.mxu1 %v6913_v41  ;;  %v4597_v41 = vadd.f32 %v7024_v57, %v4560_v12  ;;  %v7051_v12 = vpop.f32.mrf.mxu0 }
 0x4f8   : > { %v4598_v48 = vadd.f32 %v7024_v57, %v4561_v45  ;;  %v4629_v39 = vmax.f32 %v4597_v41, 0.0 }
 0x4fa   : > { %v4630_v55 = vmax.f32 %v4598_v48, 0.0 }
 0x4fb   : > { %v4467_v54 = vpop.f32.mrf.mxu1 }
 0x4fc   : > { %v4660_v33 = vmax.f32 %v4628_v26, %v4630_v55  ;;  %v4468_v10 = vadd.f32 %v4467_v54, %v6916_v25  ;;  %v7049_v26 = vpop.f32.mrf.mxu3 }
 0x4fe   : > { %v4679_v34 = vperm.slane %v4660_v33, %v7037_v60  ;;  %v4562_v45 = vmul.f32 %v7016_v3, %v4468_v10  ;;  %4514 = vmatmul.f32.gmra.mxu1 %v6924_v27  ;;  %v7055_v27 = vpop.f32.mrf.mxu2 }
 0x500   : > { %v4756_v7 = vrot.slane %v4679_v34, 4  ;;  %v4599_v40 = vadd.f32 %v7024_v57, %v4562_v45 }
 0x502   : > { %v4788_v53 = vmax.f32 %v4679_v34, %v4756_v7  ;;  %v4631_v48 = vmax.f32 %v4599_v40, 0.0  ;;  %v7064_v7 = vpop.f32.mrf.mxu0 }
 0x503   : > { %v4470_v25 = vpop.f32.mrf.mxu1 }
 0x504   : > { %4820 = vst [vmem:[#allocation1] ss:$2 sm:$0xff] %v4788_v53  ;;  %v4661_v55 = vmax.f32 %v4629_v39, %v4631_v48  ;;  %v7058_v41 = vpop.f32.mrf.mxu3  ;;  %v4471_v34 = vadd.f32 %v4470_v25, %v6927_v43 }
 0x506   : > { %v4683_v54 = vperm.slane %v4661_v55, %v7037_v60  ;;  %4517 = vmatmul.f32.gmra.mxu1 %v6935_v51  ;;  %v7066_v40 = vpop.f32.mrf.mxu2  ;;  %v4563_v51 = vmul.f32 %v7016_v3, %v4471_v34 }
 0x508   : > { %v4757_v33 = vrot.slane %v4683_v54, 4  ;;  %v4600_v43 = vadd.f32 %v7024_v57, %v4563_v51 }
 0x50a   : > { %v4789_v10 = vmax.f32 %v4683_v54, %v4757_v33  ;;  %v7080_v33 = vpop.f32.mrf.mxu0 }
 0x50b   : > { %v4473_v45 = vpop.f32.mrf.mxu1 }
 0x50c   : > { %4822 = vst [vmem:[#allocation1 + $0x1] ss:$2 sm:$0xff] %v4789_v10  ;;  %v7077_v55 = vpop.f32.mrf.mxu3  ;;  %v4632_v10 = vmax.f32 %v4600_v43, 0.0 }
 0x50e   : > { %4520 = vmatmul.f32.gmra.mxu1 %v6946_v4  ;;  %v4474_v4 = vadd.f32 %v4473_v45, %v6938_v29 }
 0x513   : > { %v4476_v39 = vpop.f32.mrf.mxu1  ;;  %v4823_v53 = vld.sshfl [vmem:[#allocation1] sm:$0xff pattern:$0x75316420] }
 0x514   : > { %v4477_v48 = vadd.f32 %v4476_v39, %v6949_v30  ;;  %4859 = vst [vmem:[%s7070_s12] sm:$0xff] %v4823_v53  ;;  %v4564_v30 = vmul.f32 %v7016_v3, %v4474_v4  ;;  %v7083_v39 = vpop.f32.mrf.mxu2  ;;  %v7091_v9 = vpop.f32.mrf.mxu3  ;;  %v4031_v4 = vadd.f32 %v6781_v2, %v6599_v11 }
 0x516   : > { %v4565_v25 = vmul.f32 %v7016_v3, %v4477_v48  ;;  %4523 = vmatmul.f32.gmra.mxu1 %v6957_v37  ;;  %v4601_v45 = vadd.f32 %v7024_v57, %v4564_v30  ;;  %v4144_v30 = vadd.f32 %v7013_v14, %v4031_v4 }
 0x518   : > { %v4602_v54 = vadd.f32 %v7024_v57, %v4565_v25  ;;  %v4257_v11 = vadd.f32 %v7019_v16, %v4144_v30 }
 0x51a   : > { %v4634_v34 = vmax.f32 %v4602_v54, 0.0  ;;  %v4633_v54 = vmax.f32 %v4601_v45, 0.0  ;;  %v4034_v45 = vadd.f32 %v6793_v47, %v6612_v32  ;;  %v7465_v47 = vld [vmem:[#allocation21_spill] sm:$0xff] }
 0x51b   : > { %v4479_v53 = vpop.f32.mrf.mxu1 }
 0x51c   : > { %v4662_v51 = vmax.f32 %v4632_v10, %v4634_v34  ;;  %v4480_v29 = vadd.f32 %v4479_v53, %v6960_v21  ;;  %v7096_v53 = vpop.f32.mrf.mxu0  ;;  %v4147_v4 = vadd.f32 %v7026_v31, %v4034_v45 }
 0x51e   : > { %v4687_v37 = vperm.slane %v4662_v51, %v7037_v60  ;;  %v4566_v48 = vmul.f32 %v7016_v3, %v4480_v29  ;;  %4526 = vmatmul.f32.gmra.mxu1 %v6966_v15  ;;  %v7098_v29 = vpop.f32.mrf.mxu2 }
 0x520   : > { %v4758_v25 = vrot.slane %v4687_v37, 4  ;;  %v4603_v43 = vadd.f32 %v7024_v57, %v4566_v48  ;;  %v4037_v48 = vadd.f32 %v6805_v19, %v6626_v44 }
 0x522   : > { %v4790_v10 = vmax.f32 %v4687_v37, %v4758_v25  ;;  %v4635_v34 = vmax.f32 %v4603_v43, 0.0  ;;  %v4150_v14 = vadd.f32 %v7042_v46, %v4037_v48  ;;  %v7108_v25 = vpop.f32.mrf.mxu3  ;;  %v7466_v46 = vld [vmem:[#allocation20_spill] sm:$0xff] }
 0x523   : > { %v4482_v21 = vpop.f32.mrf.mxu1 }
 0x524   : > { %4825 = vst [vmem:[#allocation1 + $0x10] ss:$2 sm:$0xff] %v4790_v10  ;;  %v4663_v51 = vmax.f32 %v4633_v54, %v4635_v34  ;;  %v4263_v44 = vadd.f32 %v7049_v26, %v4150_v14  ;;  %v7113_v19 = vpop.f32.mrf.mxu0  ;;  %v4040_v54 = vadd.f32 %v7466_v46, %v7465_v47  ;;  %v4260_v10 = vadd.f32 %v7034_v18, %v4147_v4 }
 0x526   : > { %v4691_v15 = vperm.slane %v4663_v51, %v7037_v60  ;;  %4529 = vmatmul.f32.gmra.mxu1 %v6973_v42  ;;  %v4370_v42 = vadd.f32 %v7021_v58, %v4257_v11  ;;  %v7116_v32 = vpop.f32.mrf.mxu2  ;;  %v4153_v31 = vadd.f32 %v7055_v27, %v4040_v54  ;;  %v4376_v58 = vadd.f32 %v7051_v12, %v4263_v44  ;;  %v7467_v54 = vld [vmem:[#allocation25_spill] sm:$0xff] }
 0x527   : > { %v4373_v51 = vadd.f32 %v7039_v22, %v4260_v10  ;;  %v7468_v10 = vld [vmem:[#allocation32_spill] sm:$0xff] }
 0x528   : > { %v4759_v2 = vrot.slane %v4691_v15, 4  ;;  %v4483_v16 = vadd.f32 %v4482_v21, %v4370_v42 }
 0x52a   : > { %v4791_v37 = vmax.f32 %v4691_v15, %v4759_v2  ;;  %v4567_v34 = vmul.f32 %v7016_v3, %v4483_v16  ;;  %v4266_v15 = vadd.f32 %v7058_v41, %v4153_v31  ;;  %v4043_v31 = vadd.f32 %v7468_v10, %v7467_v54 }
 0x52b   : > { %v4485_v43 = vpop.f32.mrf.mxu1 }
 0x52c   : > { %4827 = vst [vmem:[#allocation1 + $0x11] ss:$2 sm:$0xff] %v4791_v37  ;;  %v4604_v48 = vadd.f32 %v7024_v57, %v4567_v34  ;;  %v4486_v11 = vadd.f32 %v4485_v43, %v4373_v51  ;;  %v7132_v27 = vpop.f32.mrf.mxu0  ;;  %v4379_v37 = vadd.f32 %v7064_v7, %v4266_v15 }
 0x52e   : > { %4532 = vmatmul.f32.gmra.mxu1 %v6980_v50  ;;  %v7126_v50 = vpop.f32.mrf.mxu3  ;;  %v7135_v2 = vpop.f32.mrf.mxu2  ;;  %v4636_v22 = vmax.f32 %v4604_v48, 0.0  ;;  %v4568_v45 = vmul.f32 %v7016_v3, %v4486_v11  ;;  %v7469_v48 = vld [vmem:[#allocation22_spill] sm:$0xff] }
 0x52f   : > { %v4049_v11 = vadd.f32 %v6853_v6, %v7469_v48 }
 0x530   : > { %v4605_v43 = vadd.f32 %v7024_v57, %v4568_v45  ;;  %v7470_v45 = vld [vmem:[#allocation24_spill] sm:$0xff] }
 0x532   : > { %v4637_v34 = vmax.f32 %v4605_v43, 0.0 }
 0x533   : > { %v4488_v30 = vpop.f32.mrf.mxu1  ;;  %v4828_v26 = vld.sshfl [vmem:[#allocation1 + $0x10] sm:$0xff pattern:$0x75316420] }
 0x534   : > { %v4489_v21 = vadd.f32 %v4488_v30, %v4376_v58  ;;  %4860 = vst [vmem:[%s7070_s12 + $0x8] sm:$0xff] %v4828_v26  ;;  %v7148_v7 = vpop.f32.mrf.mxu0 }
 0x536   : > { %v4569_v18 = vmul.f32 %v7016_v3, %v4489_v21  ;;  %4535 = vmatmul.f32.gmra.mxu1 %v6987_v17  ;;  %v7143_v16 = vpop.f32.mrf.mxu3  ;;  %v7150_v26 = vpop.f32.mrf.mxu2  ;;  %v4156_v21 = vadd.f32 %v7066_v40, %v4043_v31 }
 0x538   : > { %v4606_v12 = vadd.f32 %v7024_v57, %v4569_v18  ;;  %v4269_v18 = vadd.f32 %v7077_v55, %v4156_v21 }
 0x53a   : > { %v4638_v14 = vmax.f32 %v4606_v12, 0.0 }
 0x53b   : > { %v4491_v41 = vpop.f32.mrf.mxu1 }
 0x53c   : > { %v4664_v4 = vmax.f32 %v4636_v22, %v4638_v14  ;;  %v4492_v42 = vadd.f32 %v4491_v41, %v4379_v37  ;;  %v7471_v14 = vld [vmem:[#allocation34_spill] sm:$0xff]  ;;  %v4162_v41 = vadd.f32 %v7098_v29, %v4049_v11  ;;  %v7164_v43 = vpop.f32.mrf.mxu0 }
 0x53d   : > { %v4046_v37 = vadd.f32 %v7471_v14, %v7470_v45 }
 0x53e   : > { %v4695_v44 = vperm.slane %v4664_v4, %v7037_v60  ;;  %v4570_v17 = vmul.f32 %v7016_v3, %v4492_v42  ;;  %4538 = vmatmul.f32.gmra.mxu1 %v6993_v62  ;;  %v7158_v22 = vpop.f32.mrf.mxu3  ;;  %v4173_v6 = vpop.f32.mrf.mxu2  ;;  %v4275_v55 = vadd.f32 %v7108_v25, %v4162_v41 }
 0x53f   : > { %v4159_v42 = vadd.f32 %v7083_v39, %v4046_v37 }
 0x540   : > { %v4760_v47 = vrot.slane %v4695_v44, 4  ;;  %v4607_v46 = vadd.f32 %v7024_v57, %v4570_v17  ;;  %v7472_v17 = vld [vmem:[#allocation27_spill] sm:$0xff]  ;;  %v4388_v10 = vadd.f32 %v7113_v19, %v4275_v55 }
 0x541   : > { %v4272_v29 = vadd.f32 %v7091_v9, %v4159_v42 }
 0x542   : > { %v4792_v58 = vmax.f32 %v4695_v44, %v4760_v47  ;;  %v4639_v30 = vmax.f32 %v4607_v46, 0.0  ;;  %v7473_v47 = vld [vmem:[#allocation37_spill] sm:$0xff] }
 0x543   : > { %v4494_v51 = vpop.f32.mrf.mxu1  ;;  %v4052_v46 = vadd.f32 %v7473_v47, %v7472_v17  ;;  %v4385_v25 = vadd.f32 %v7096_v53, %v4272_v29 }
 0x544   : > { %4830 = vst [vmem:[#allocation1 + $0x20] ss:$2 sm:$0xff] %v4792_v58  ;;  %v4665_v62 = vmax.f32 %v4637_v34, %v4639_v30  ;;  %v3070_v34 = vld [vmem:[#allocation2 + $0x19a] sm:$0xff] }
 0x545   : > { %v4165_v54 = vadd.f32 %v7116_v32, %v4052_v46 }
 0x546   : > { %v4699_v15 = vperm.slane %v4665_v62, %v7037_v60  ;;  %4541 = vmatmul.f32.gmra.mxu1 %v6999_v38  ;;  %v4382_v38 = vadd.f32 %v7080_v33, %v4269_v18  ;;  %v4286_v31 = vpop.f32.mrf.mxu3  ;;  %v4176_v62 = vpop.f32.mrf.mxu2 }
 0x548   : > { %v4761_v12 = vrot.slane %v4699_v15, 4  ;;  %v4495_v44 = vadd.f32 %v4494_v51, %v4382_v38  ;;  %v4399_v51 = vpop.f32.mrf.mxu0 }
 0x54a   : > { %v4793_v40 = vmax.f32 %v4699_v15, %v4761_v12  ;;  %v4571_v39 = vmul.f32 %v7016_v3, %v4495_v44  ;;  %v3071_v12 = vld [vmem:[#allocation2 + $0x1a2] sm:$0xff]  ;;  %v7474_v44 = vld [vmem:[#allocation14_spill] sm:$0xff] }
 0x54b   : > { %v4497_v4 = vpop.f32.mrf.mxu1 }
 0x54c   : > { %4832 = vst [vmem:[#allocation1 + $0x21] ss:$2 sm:$0xff] %v4793_v40  ;;  %v4608_v21 = vadd.f32 %v7024_v57, %v4571_v39  ;;  %v4498_v9 = vadd.f32 %v4497_v4, %v4385_v25 }
 0x54e   : > { %4544 = vmatmul.f32.gmra.mxu1 %v7005_v8  ;;  %v4278_v8 = vadd.f32 %v7126_v50, %v4165_v54  ;;  %v4640_v15 = vmax.f32 %v4608_v21, 0.0  ;;  %v4572_v48 = vmul.f32 %v7016_v3, %v4498_v9  ;;  %v4289_v14 = vpop.f32.mrf.mxu3  ;;  %v7187_v55 = vpop.f32.mrf.mxu2 }
 0x550   : > { %v4391_v53 = vadd.f32 %v7132_v27, %v4278_v8  ;;  %v4609_v37 = vadd.f32 %v7024_v57, %v4572_v48  ;;  %v4402_v4 = vpop.f32.mrf.mxu0  ;;  %v4055_v27 = vadd.f32 %v6878_v0, %v7474_v44  ;;  %v7476_v8 = vld [vmem:[#allocation26_spill] sm:$0xff] }
 0x551   : > { %v4058_v0 = vadd.f32 %v6889_v61, %v7476_v8 }
 0x552   : > { %v4641_v17 = vmax.f32 %v4609_v37, 0.0  ;;  %v4168_v54 = vadd.f32 %v7135_v2, %v4055_v27 }
 0x553   : > { %v4500_v33 = vpop.f32.mrf.mxu1  ;;  %v4833_v58 = vld.sshfl [vmem:[#allocation1 + $0x20] sm:$0xff pattern:$0x75316420] }
 0x554   : > { %v4501_v30 = vadd.f32 %v4500_v33, %v4388_v10  ;;  %4861 = vst [vmem:[%s7070_s12 + $0x10] sm:$0xff] %v4833_v58  ;;  %v4281_v25 = vadd.f32 %v7143_v16, %v4168_v54 }
 0x556   : > { %v4573_v32 = vmul.f32 %v7016_v3, %v4501_v30  ;;  %4547 = vmatmul.f32.gmra.mxu1 %v3070_v34  ;;  %v4292_v33 = vpop.f32.mrf.mxu3  ;;  %v7475_v34 = vld [vmem:[#allocation29_spill] sm:$0xff]  ;;  %v4394_v48 = vadd.f32 %v7148_v7, %v4281_v25  ;;  %v7478_v25 = vld [vmem:[#allocation28_spill] sm:$0xff] }
 0x557   : > { %v4061_v58 = vadd.f32 %v6900_v1, %v7475_v34 }
 0x558   : > { %v4610_v19 = vadd.f32 %v7024_v57, %v4573_v32  ;;  %v7198_v9 = vpop.f32.mrf.mxu0 }
 0x559   : > { %v4174_v21 = vadd.f32 %v4173_v6, %v4061_v58 }
 0x55a   : > { %v4642_v11 = vmax.f32 %v4610_v19, 0.0  ;;  %v4182_v19 = vpop.f32.mrf.mxu2 }
 0x55b   : > { %v4503_v18 = vpop.f32.mrf.mxu1 }
 0x55c   : > { %v4666_v45 = vmax.f32 %v4640_v15, %v4642_v11  ;;  %v4504_v50 = vadd.f32 %v4503_v18, %v4391_v53  ;;  %v4171_v15 = vadd.f32 %v7150_v26, %v4058_v0  ;;  %v4287_v11 = vadd.f32 %v4286_v31, %v4174_v21  ;;  %v7477_v53 = vld [vmem:[#allocation17_spill] sm:$0xff] }
 0x55d   : > { %v4064_v16 = vadd.f32 %v6911_v63, %v7477_v53 }
 0x55e   : > { %v4703_v41 = vperm.slane %v4666_v45, %v7037_v60  ;;  %v4574_v40 = vmul.f32 %v7016_v3, %v4504_v50  ;;  %4550 = vmatmul.f32.gmra.mxu1 %v3071_v12  ;;  %v4284_v18 = vadd.f32 %v7158_v22, %v4171_v15  ;;  %v4295_v61 = vpop.f32.mrf.mxu3  ;;  %v4400_v45 = vadd.f32 %v4399_v51, %v4287_v11  ;;  %v7479_v11 = vld [vmem:[#allocation30_spill] sm:$0xff] }
 0x55f   : > { %v4177_v6 = vadd.f32 %v4176_v62, %v4064_v16 }
 0x560   : > { %v4762_v42 = vrot.slane %v4703_v41, 4  ;;  %v4611_v38 = vadd.f32 %v7024_v57, %v4574_v40  ;;  %v4397_v26 = vadd.f32 %v7164_v43, %v4284_v18 }
 0x561   : > { %v4290_v31 = vadd.f32 %v4289_v14, %v4177_v6 }
 0x562   : > { %v4794_v47 = vmax.f32 %v4703_v41, %v4762_v42  ;;  %v4643_v46 = vmax.f32 %v4611_v38, 0.0  ;;  %v4408_v41 = vpop.f32.mrf.mxu0  ;;  %v4185_v7 = vpop.f32.mrf.mxu2 }
 0x563   : > { %v4506_v29 = vpop.f32.mrf.mxu1  ;;  %v4403_v27 = vadd.f32 %v4402_v4, %v4290_v31 }
 0x564   : > { %4835 = vst [vmem:[#allocation1 + $0x30] ss:$2 sm:$0xff] %v4794_v47  ;;  %v4667_v39 = vmax.f32 %v4641_v17, %v4643_v46  ;;  %v4507_v1 = vadd.f32 %v4506_v29, %v4394_v48 }
 0x566   : > { %v4707_v10 = vperm.slane %v4667_v39, %v7037_v60  ;;  %v4575_v12 = vmul.f32 %v7016_v3, %v4507_v1  ;;  %v4298_v17 = vpop.f32.mrf.mxu3  ;;  %v4073_v1 = vadd.f32 %v6944_v23, %v7479_v11 }
 0x568   : > { %v4763_v30 = vrot.slane %v4707_v10, 4  ;;  %v4612_v42 = vadd.f32 %v7024_v57, %v4575_v12  ;;  %v7480_v12 = vld [vmem:[#allocation15_spill] sm:$0xff] }
 0x56a   : > { %v4795_v32 = vmax.f32 %v4707_v10, %v4763_v30  ;;  %v4644_v62 = vmax.f32 %v4612_v42, 0.0  ;;  %v4411_v29 = vpop.f32.mrf.mxu0  ;;  %v4188_v10 = vpop.f32.mrf.mxu2  ;;  %v4067_v30 = vadd.f32 %v6922_v35, %v7478_v25  ;;  %v4070_v35 = vadd.f32 %v6933_v36, %v7480_v12 }
 0x56b   : > { %v4509_v2 = vpop.f32.mrf.mxu1 }
 0x56c   : > { %4837 = vst [vmem:[#allocation1 + $0x31] ss:$2 sm:$0xff] %v4795_v32  ;;  %v4510_v38 = vadd.f32 %v4509_v2, %v4397_v26  ;;  %v4180_v32 = vadd.f32 %v7187_v55, %v4067_v30  ;;  %v4183_v26 = vadd.f32 %v4182_v19, %v4070_v35 }
 0x56e   : > { %v4576_v44 = vmul.f32 %v7016_v3, %v4510_v38  ;;  %v4301_v15 = vpop.f32.mrf.mxu3  ;;  %v4293_v53 = vadd.f32 %v4292_v33, %v4180_v32  ;;  %v7481_v38 = vld [vmem:[#allocation19_spill] sm:$0xff]  ;;  %v4296_v33 = vadd.f32 %v4295_v61, %v4183_v26 }
 0x56f   : > { %v4076_v23 = vadd.f32 %v6955_v52, %v7481_v38 }
 0x570   : > { %v4613_v54 = vadd.f32 %v7024_v57, %v4576_v44  ;;  %v4406_v55 = vadd.f32 %v7198_v9, %v4293_v53  ;;  %v4409_v19 = vadd.f32 %v4408_v41, %v4296_v33 }
 0x572   : > { %v4645_v8 = vmax.f32 %v4613_v54, 0.0  ;;  %v4414_v16 = vpop.f32.mrf.mxu0  ;;  %v4191_v6 = vpop.f32.mrf.mxu2 }
 0x573   : > { %v4512_v50 = vpop.f32.mrf.mxu1  ;;  %v4838_v37 = vld.sshfl [vmem:[#allocation1 + $0x30] sm:$0xff pattern:$0x75316420] }
 0x574   : > { %v4513_v40 = vadd.f32 %v4512_v50, %v4400_v45  ;;  %4862 = vst [vmem:[%s7070_s12 + $0x18] sm:$0xff] %v4838_v37  ;;  %v4186_v45 = vadd.f32 %v4185_v7, %v4073_v1 }
 0x576   : > { %v4577_v63 = vmul.f32 %v7016_v3, %v4513_v40  ;;  %v4299_v40 = vadd.f32 %v4298_v17, %v4186_v45  ;;  %v4304_v42 = vpop.f32.mrf.mxu3  ;;  %v7483_v45 = vld [vmem:[#allocation18_spill] sm:$0xff] }
 0x578   : > { %v4614_v22 = vadd.f32 %v7024_v57, %v4577_v63  ;;  %v4189_v63 = vadd.f32 %v4188_v10, %v4076_v23  ;;  %v4412_v36 = vadd.f32 %v4411_v29, %v4299_v40 }
 0x57a   : > { %v4646_v51 = vmax.f32 %v4614_v22, 0.0  ;;  %v4417_v22 = vpop.f32.mrf.mxu0  ;;  %v4194_v7 = vpop.f32.mrf.mxu2 }
 0x57b   : > { %v4515_v47 = vpop.f32.mrf.mxu1 }
 0x57c   : > { %v4668_v46 = vmax.f32 %v4644_v62, %v4646_v51  ;;  %v4516_v43 = vadd.f32 %v4515_v47, %v4403_v27  ;;  %v4302_v47 = vadd.f32 %v4301_v15, %v4189_v63 }
 0x57e   : > { %v4711_v14 = vperm.slane %v4668_v46, %v7037_v60  ;;  %v4578_v39 = vmul.f32 %v7016_v3, %v4516_v43  ;;  %v4307_v61 = vpop.f32.mrf.mxu3  ;;  %v4415_v29 = vadd.f32 %v4414_v16, %v4302_v47 }
 0x580   : > { %v4764_v34 = vrot.slane %v4711_v14, 4  ;;  %v4615_v58 = vadd.f32 %v7024_v57, %v4578_v39 }
 0x582   : > { %v4796_v4 = vmax.f32 %v4711_v14, %v4764_v34  ;;  %v4647_v0 = vmax.f32 %v4615_v58, 0.0  ;;  %v4420_v10 = vpop.f32.mrf.mxu0  ;;  %v4197_v58 = vpop.f32.mrf.mxu2 }
 0x583   : > { %v4518_v21 = vpop.f32.mrf.mxu1 }
 0x584   : > { %4839 = vst [vmem:[#allocation1] ss:$2 sm:$0xff] %v4796_v4  ;;  %v4669_v2 = vmax.f32 %v4645_v8, %v4647_v0  ;;  %v4519_v31 = vadd.f32 %v4518_v21, %v4406_v55  ;;  %v7482_v21 = vld [vmem:[#allocation31_spill] sm:$0xff]  ;;  %v7484_v55 = vld [vmem:[#allocation16_spill] sm:$0xff] }
 0x585   : > { %v4079_v32 = vadd.f32 %v6964_v24, %v7482_v21  ;;  %v4082_v24 = vadd.f32 %v6971_v59, %v7484_v55 }
 0x586   : > { %v4715_v48 = vperm.slane %v4669_v2, %v7037_v60  ;;  %v4579_v62 = vmul.f32 %v7016_v3, %v4519_v31  ;;  %v4310_v11 = vpop.f32.mrf.mxu3 }
 0x587   : > { %v4192_v53 = vadd.f32 %v4191_v6, %v4079_v32  ;;  %v4195_v23 = vadd.f32 %v4194_v7, %v4082_v24 }
 0x588   : > { %v4765_v18 = vrot.slane %v4715_v48, 4  ;;  %v4616_v9 = vadd.f32 %v7024_v57, %v4579_v62 }
 0x58a   : > { %v4797_v50 = vmax.f32 %v4715_v48, %v4765_v18  ;;  %v4648_v43 = vmax.f32 %v4616_v9, 0.0  ;;  %v4423_v18 = vpop.f32.mrf.mxu0  ;;  %v4200_v35 = vpop.f32.mrf.mxu2 }
 0x58b   : > { %v4521_v37 = vpop.f32.mrf.mxu1 }
 0x58c   : > { %4840 = vst [vmem:[#allocation1 + $0x1] ss:$2 sm:$0xff] %v4797_v50  ;;  %v4522_v17 = vadd.f32 %v4521_v37, %v4409_v19  ;;  %v4085_v50 = vadd.f32 %v6978_v28, %v7483_v45  ;;  %v4305_v37 = vadd.f32 %v4304_v42, %v4192_v53 }
 0x58e   : > { %v4580_v54 = vmul.f32 %v7016_v3, %v4522_v17  ;;  %v4198_v40 = vadd.f32 %v4197_v58, %v4085_v50  ;;  %v4418_v6 = vadd.f32 %v4417_v22, %v4305_v37  ;;  %v4313_v33 = vpop.f32.mrf.mxu3  ;;  %v7487_v50 = vld [vmem:[#allocation36_spill] sm:$0xff] }
 0x58f   : > { %v4097_v37 = vadd.f32 %v7003_v13, %v7487_v50 }
 0x590   : > { %v4617_v25 = vadd.f32 %v7024_v57, %v4580_v54  ;;  %v4311_v63 = vadd.f32 %v4310_v11, %v4198_v40  ;;  %v7488_v40 = vld [vmem:[#allocation35_spill] sm:$0xff] }
 0x592   : > { %v4649_v2 = vmax.f32 %v4617_v25, 0.0  ;;  %v4426_v28 = vpop.f32.mrf.mxu0  ;;  %v4203_v42 = vpop.f32.mrf.mxu2  ;;  %v4424_v59 = vadd.f32 %v4423_v18, %v4311_v63 }
 0x593   : > { %v4524_v44 = vpop.f32.mrf.mxu1  ;;  %v4841_v51 = vld.sshfl [vmem:[#allocation1] sm:$0xff pattern:$0x75316420] }
 0x594   : > { %v4525_v27 = vadd.f32 %v4524_v44, %v4412_v36  ;;  %4863 = vst [vmem:[%s7070_s12 + $0x20] sm:$0xff] %v4841_v51  ;;  %v7485_v36 = vld [vmem:[#allocation23_spill] sm:$0xff]  ;;  %v4308_v51 = vadd.f32 %v4307_v61, %v4195_v23 }
 0x595   : > { %v4088_v44 = vadd.f32 %v6985_v20, %v7485_v36 }
 0x596   : > { %v4581_v46 = vmul.f32 %v7016_v3, %v4525_v27  ;;  %v4421_v17 = vadd.f32 %v4420_v10, %v4308_v51  ;;  %v4316_v54 = vpop.f32.mrf.mxu3  ;;  %v7489_v51 = vld [vmem:[#allocation38_spill] sm:$0xff] }
 0x597   : > { %v4201_v19 = vadd.f32 %v4200_v35, %v4088_v44  ;;  %v4100_v13 = vadd.f32 %v7489_v51, %v6872_v49 }
 0x598   : > { %v4618_v52 = vadd.f32 %v7024_v57, %v4581_v46 }
 0x599   : > { %v4314_v46 = vadd.f32 %v4313_v33, %v4201_v19 }
 0x59a   : > { %v4650_v14 = vmax.f32 %v4618_v52, 0.0  ;;  %v4429_v61 = vpop.f32.mrf.mxu0 }
 0x59b   : > { %v4527_v39 = vpop.f32.mrf.mxu1 }
 0x59c   : > { %v4670_v34 = vmax.f32 %v4648_v43, %v4650_v14  ;;  %v4528_v41 = vadd.f32 %v4527_v39, %v4415_v29 }
 0x59e   : > { %v4719_v30 = vperm.slane %v4670_v34, %v7037_v60  ;;  %v4582_v8 = vmul.f32 %v7016_v3, %v4528_v41  ;;  %v4427_v34 = vadd.f32 %v4426_v28, %v4314_v46  ;;  %v4206_v41 = vpop.f32.mrf.mxu2  ;;  %v4319_v32 = vpop.f32.mrf.mxu3 }
 0x5a0   : > { %v4766_v4 = vrot.slane %v4719_v30, 4  ;;  %v4619_v0 = vadd.f32 %v7024_v57, %v4582_v8 }
 0x5a2   : > { %v4798_v15 = vmax.f32 %v4719_v30, %v4766_v4  ;;  %v4651_v48 = vmax.f32 %v4619_v0, 0.0 }
 0x5a3   : > { %v4530_v1 = vpop.f32.mrf.mxu1 }
 0x5a4   : > { %4842 = vst [vmem:[#allocation1 + $0x10] ss:$2 sm:$0xff] %v4798_v15  ;;  %v4671_v16 = vmax.f32 %v4649_v2, %v4651_v48  ;;  %v4531_v62 = vadd.f32 %v4530_v1, %v4418_v6  ;;  %v7486_v2 = vld [vmem:[#allocation33_spill] sm:$0xff] }
 0x5a5   : > { %v4091_v15 = vadd.f32 %v6991_v56, %v7486_v2  ;;  %v4094_v56 = vadd.f32 %v6997_v5, %v7488_v40 }
 0x5a6   : > { %v4723_v12 = vperm.slane %v4671_v16, %v7037_v60  ;;  %v4583_v27 = vmul.f32 %v7016_v3, %v4531_v62  ;;  %v4209_v35 = vpop.f32.mrf.mxu2  ;;  %v4322_v24 = vpop.f32.mrf.mxu3 }
 0x5a7   : > { %v4204_v16 = vadd.f32 %v4203_v42, %v4091_v15  ;;  %v4207_v6 = vadd.f32 %v4206_v41, %v4094_v56 }
 0x5a8   : > { %v4767_v26 = vrot.slane %v4723_v12, 4  ;;  %v4620_v22 = vadd.f32 %v7024_v57, %v4583_v27 }
 0x5a9   : > { %v4320_v28 = vadd.f32 %v4319_v32, %v4207_v6 }
 0x5aa   : > { %v4799_v31 = vmax.f32 %v4723_v12, %v4767_v26  ;;  %v4652_v14 = vmax.f32 %v4620_v22, 0.0  ;;  %v4432_v12 = vpop.f32.mrf.mxu0  ;;  %v4317_v26 = vadd.f32 %v4316_v54, %v4204_v16 }
 0x5ab   : > { %v4533_v38 = vpop.f32.mrf.mxu1 }
 0x5ac   : > { %4843 = vst [vmem:[#allocation1 + $0x11] ss:$2 sm:$0xff] %v4799_v31  ;;  %v4534_v52 = vadd.f32 %v4533_v38, %v4421_v17  ;;  %v4210_v31 = vadd.f32 %v4209_v35, %v4097_v37  ;;  %v4430_v33 = vadd.f32 %v4429_v61, %v4317_v26 }
 0x5ae   : > { %v4584_v29 = vmul.f32 %v7016_v3, %v4534_v52  ;;  %v4323_v62 = vadd.f32 %v4322_v24, %v4210_v31  ;;  %v4212_v44 = vpop.f32.mrf.mxu2  ;;  %v4325_v5 = vpop.f32.mrf.mxu3 }
 0x5af   : > { %v4213_v19 = vadd.f32 %v4212_v44, %v4100_v13 }
 0x5b0   : > { %v4621_v30 = vadd.f32 %v7024_v57, %v4584_v29 }
 0x5b2   : > { %v4653_v48 = vmax.f32 %v4621_v30, 0.0  ;;  %v4435_v63 = vpop.f32.mrf.mxu0 }
 0x5b3   : > { %v4536_v47 = vpop.f32.mrf.mxu1  ;;  %v4844_v9 = vld.sshfl [vmem:[#allocation1 + $0x10] sm:$0xff pattern:$0x75316420]  ;;  %v4436_v42 = vadd.f32 %v4435_v63, %v4323_v62 }
 0x5b4   : > { %v4537_v7 = vadd.f32 %v4536_v47, %v4424_v59  ;;  %4864 = vst [vmem:[%s7070_s12 + $0x28] sm:$0xff] %v4844_v9  ;;  %v4433_v9 = vadd.f32 %v4432_v12, %v4320_v28 }
 0x5b6   : > { %v4585_v43 = vmul.f32 %v7016_v3, %v4537_v7  ;;  %v4326_v7 = vadd.f32 %v4325_v5, %v4213_v19 }
 0x5b8   : > { %v4622_v20 = vadd.f32 %v7024_v57, %v4585_v43 }
 0x5ba   : > { %v4654_v39 = vmax.f32 %v4622_v20, 0.0  ;;  %v4438_v43 = vpop.f32.mrf.mxu0 }
 0x5bb   : > { %v4539_v58 = vpop.f32.mrf.mxu1  ;;  %v4439_v54 = vadd.f32 %v4438_v43, %v4326_v7 }
 0x5bc   : > { %v4672_v10 = vmax.f32 %v4652_v14, %v4654_v39  ;;  %v4540_v25 = vadd.f32 %v4539_v58, %v4427_v34 }
 0x5be   : > { %v4727_v8 = vperm.slane %v4672_v10, %v7037_v60  ;;  %v4586_v4 = vmul.f32 %v7016_v3, %v4540_v25 }
 0x5c0   : > { %v4768_v0 = vrot.slane %v4727_v8, 4  ;;  %v4623_v21 = vadd.f32 %v7024_v57, %v4586_v4 }
 0x5c2   : > { %v4800_v11 = vmax.f32 %v4727_v8, %v4768_v0  ;;  %v4655_v1 = vmax.f32 %v4623_v21, 0.0 }
 0x5c3   : > { %v4542_v53 = vpop.f32.mrf.mxu1 }
 0x5c4   : > { %4845 = vst [vmem:[#allocation1 + $0x20] ss:$2 sm:$0xff] %v4800_v11  ;;  %v4673_v18 = vmax.f32 %v4653_v48, %v4655_v1  ;;  %v4543_v36 = vadd.f32 %v4542_v53, %v4430_v33 }
 0x5c6   : > { %v4731_v45 = vperm.slane %v4673_v18, %v7037_v60  ;;  %v4587_v27 = vmul.f32 %v7016_v3, %v4543_v36 }
 0x5c8   : > { %v4769_v55 = vrot.slane %v4731_v45, 4  ;;  %v4624_v46 = vadd.f32 %v7024_v57, %v4587_v27 }
 0x5ca   : > { %v4801_v38 = vmax.f32 %v4731_v45, %v4769_v55  ;;  %v4656_v20 = vmax.f32 %v4624_v46, 0.0 }
 0x5cb   : > { %v4545_v23 = vpop.f32.mrf.mxu1 }
 0x5cc   : > { %4846 = vst [vmem:[#allocation1 + $0x21] ss:$2 sm:$0xff] %v4801_v38  ;;  %v4546_v22 = vadd.f32 %v4545_v23, %v4433_v9 }
 0x5ce   : > { %v4588_v61 = vmul.f32 %v7016_v3, %v4546_v22 }
 0x5d0   : > { %v4625_v41 = vadd.f32 %v7024_v57, %v4588_v61 }
 0x5d2   : > { %v4657_v8 = vmax.f32 %v4625_v41, 0.0 }
 0x5d3   : > { %v4548_v59 = vpop.f32.mrf.mxu1  ;;  %v4847_v47 = vld.sshfl [vmem:[#allocation1 + $0x20] sm:$0xff pattern:$0x75316420] }
 0x5d4   : > { %v4549_v17 = vadd.f32 %v4548_v59, %v4436_v42  ;;  %4865 = vst [vmem:[%s7070_s12 + $0x30] sm:$0xff] %v4847_v47 }
 0x5d6   : > { %v4589_v52 = vmul.f32 %v7016_v3, %v4549_v17 }
 0x5d8   : > { %v4626_v49 = vadd.f32 %v7024_v57, %v4589_v52 }
 0x5da   : > { %v4658_v14 = vmax.f32 %v4626_v49, 0.0 }
 0x5db   : > { %v4551_v29 = vpop.f32.mrf.mxu1 }
 0x5dc   : > { %v4674_v39 = vmax.f32 %v4656_v20, %v4658_v14  ;;  %v4552_v34 = vadd.f32 %v4551_v29, %v4439_v54 }
 0x5de   : > { %v4735_v58 = vperm.slane %v4674_v39, %v7037_v60  ;;  %v4590_v10 = vmul.f32 %v7016_v3, %v4552_v34 }
 0x5e0   : > { %v4770_v25 = vrot.slane %v4735_v58, 4  ;;  %v4627_v30 = vadd.f32 %v7024_v57, %v4590_v10 }
 0x5e2   : > { %v4802_v4 = vmax.f32 %v4735_v58, %v4770_v25  ;;  %v4659_v0 = vmax.f32 %v4627_v30, 0.0 }
 0x5e4   : > { %4848 = vst [vmem:[#allocation1 + $0x30] ss:$2 sm:$0xff] %v4802_v4  ;;  %v4675_v21 = vmax.f32 %v4657_v8, %v4659_v0 }
 0x5e6   : > { %v4739_v32 = vperm.slane %v4675_v21, %v7037_v60 }
 0x5e8   : > { %v4771_v2 = vrot.slane %v4739_v32, 4 }
 0x5ea   : > { %v4803_v15 = vmax.f32 %v4739_v32, %v4771_v2 }
 0x5ec   : > { %4849 = vst [vmem:[#allocation1 + $0x31] ss:$2 sm:$0xff] %v4803_v15 }
 0x5f3   : > { %v4850_v3 = vld.sshfl [vmem:[#allocation1 + $0x30] sm:$0xff pattern:$0x75316420] }
 0x5f4   : > { %4866 = vst [vmem:[%s7070_s12 + $0x38] sm:$0xff] %v4850_v3 }
 0x5f5   : > { %5231 = shalt.err (!%p5228_p8)
}
 0x5f6   : > { %s5285_s9 = smov 128   ;;  %s5286_s10 = smov 8  }
 0x5f7   : > { %5040 = dma.vmem_to_hbm [thread:$0]  (%p5350_p5), %s4881_s23, 1024, %s4883_s28, %s4868_s29, %s5285_s9, %s5285_s9, %s5286_s10  }
 0x5f8 PF: > { %p5062_p9 = scmp.ge.s32.totalorder %s5274_s18, 2  ;;  %s4897_s11 = sand.u32 1, %s5262_s15  }
 0x5f9   : > { %s4898_s12 = scalar_lea.sflag [#allocation6], %s4897_s11 }
 0x5fa   : > { %p5053_p10 = pnand %p5062_p9, %p5354_p6 }
 0x5fc   : > { %p5054_p11 = pneg %p5053_p10 }
 0x5fe   : > { %5257 = dma.done.wait (%p5054_p11), %s4898_s12, 1024  }
 0x5ff   : > { %5259 = vsyncadd (%p5054_p11), %s4898_s12, 4294966272  ;;  %p16_p12 = scmp.ge.s32.totalorder %s5337_s21, 4   ;;  %s7490_s15 = smov %s5266_s16 }
 0x600   : > { %s7491_s16 = smov %s5270_s17  ;;  %s7492_s17 = smov %s5348_s24 }
 0x601   : > { %s7493_s18 = smov %s5337_s21  ;;  %18 = sbr.rel (!%p16_p12) target bundleno = 5 (0x5), region = 96 }
 0x606   :  { %4904 = vsyncpa [#allocation5], 1 }
 0x607   :  { %4906 = vsyncpa [#allocation5 + $0x1], 1 }
 0x608   :  { %4907 = vsyncpa [#allocation8], 1 }
 0x609   :  { %4908 = vsyncpa [#allocation6], 1 }
 0x60a   :  { %4910 = vsyncpa [#allocation6 + $0x1], 1 }

</bundles_post_ra>
